<compile_context>
chip_gen: v5e
topology: v5e:2x2
jax: 0.10.0
libtpu: 0.0.40
codegen_flags: <defaults>
</compile_context>

<pallas_src>
import jax
import jax.numpy as jnp
import numpy as np
from jax import lax
from jax.experimental import pallas as pl
from jax.experimental.pallas import tpu as pltpu


# ---------------------------------------------------------------------------
# Fused Pallas kernel: conv1 + LReLU + conv2 + LReLU + self-attn + final conv
# ---------------------------------------------------------------------------

def _disc_kernel(scal_ref, x_ref, m1_ref, w1_ref, b1_ref,
                 m2_ref, w2_ref, b2_ref, wqkv_ref, bqkv_ref, w3_ref,
                 o_ref, p1_ref, p2_ref):
    taps = 16                                    # 4x4 conv kernels
    c1 = b1_ref.shape[0]
    c2 = b2_ref.shape[0]
    cq = (wqkv_ref.shape[0] - c2) // 2
    cin_p = w1_ref.shape[1] // taps              # input channels padded to 8
    n1 = m1_ref.shape[1] // taps                 # conv1 output pixels (64)
    n2 = m2_ref.shape[1] // taps                 # conv2 output pixels (16)
    B = x_ref.shape[0] // cin_p

    inv_s1 = scal_ref[0]                         # SMEM scalars (sregs)
    inv_s2 = scal_ref[1]
    gamma = scal_ref[2]

    # ---- conv1: 4x4 stride 2 pad 1, 3->c1, spectral-norm 1/sigma scale, LReLU(0.1).
    # One bf16 gather matmul for the whole batch (1024 lanes), im2col relayout via
    # static slice -> scratch stores, then one f32 weight matmul (K = taps*cin_p).
    g1 = jnp.dot(x_ref[...], m1_ref[...],
                 preferred_element_type=jnp.float32)          # (B*cin_p, taps*n1)
    for b in range(B):
        for t in range(taps):
            p1_ref[t * cin_p:(t + 1) * cin_p, b * n1:(b + 1) * n1] = \
                g1[b * cin_p:(b + 1) * cin_p, t * n1:(t + 1) * n1]
    h1 = jnp.dot(w1_ref[...], p1_ref[...],
                 preferred_element_type=jnp.float32)          # (c1, B*n1) = (16, 128)
    h1 = h1 * inv_s1 + b1_ref[...]
    h1 = jnp.where(h1 >= 0, h1, 0.1 * h1)

    # ---- conv2: 4x4 stride 2 pad 1, c1->c2 (same two-matmul structure).
    h1b = h1.astype(jnp.bfloat16)
    for b in range(B):
        g2 = jnp.dot(h1b[:, b * n1:(b + 1) * n1], m2_ref[...],
                     preferred_element_type=jnp.float32)      # (c1, taps*n2)
        for t in range(taps):
            p2_ref[t * c1:(t + 1) * c1, b * n2:(b + 1) * n2] = \
                g2[:, t * n2:(t + 1) * n2]
    h2 = jnp.dot(w2_ref[...], p2_ref[...],
                 preferred_element_type=jnp.float32)          # (c2, B*n2) = (32, 32)
    h2 = h2 * inv_s2 + b2_ref[...]
    h2 = jnp.where(h2 >= 0, h2, 0.1 * h2)

    # ---- Self_Attn_dynamic: fused q/k/v projection for the whole batch, then
    # per-element softmax attention + gamma*out + x residual.
    qkv = jnp.dot(wqkv_ref[...], h2,
                  preferred_element_type=jnp.float32) + bqkv_ref[...]   # (2cq+c2, B*n2)
    for b in range(B):
        lo = b * n2
        q = qkv[0:cq, lo:lo + n2]                             # (cq, n2)
        k = qkv[cq:2 * cq, lo:lo + n2]                        # (cq, n2)
        v = qkv[2 * cq:, lo:lo + n2]                          # (c2, n2)
        # energy[i, j] = sum_c q[c, i] * k[c, j]   (== bmm(query^T, key))
        energy = lax.dot_general(q, k, (((0,), (0,)), ((), ())),
                                 preferred_element_type=jnp.float32)    # (n2, n2)
        m = jnp.max(energy, axis=-1, keepdims=True)
        p = jnp.exp(energy - m)
        attn = p * pl.reciprocal(jnp.sum(p, axis=-1, keepdims=True), approx=True)
        # out[c, i] = sum_j v[c, j] * attn[i, j]   (== bmm(value, attn^T))
        att = lax.dot_general(v, attn, (((1,), (1,)), ((), ())),
                              preferred_element_type=jnp.float32)       # (c2, n2)
        y = gamma * att + h2[:, lo:lo + n2]
        # final Conv2d(c2, 1, 4) "valid" on the 4x4 map: fused multiply + channel
        # reduction here; the 16-lane spatial sum + bias live in the wrapper.
        o_ref[:, lo:lo + n2] = jnp.sum(y * w3_ref[...], axis=0, keepdims=True)


def _fused_call(scal, x2, pk):
    taps = 16
    m1c, w1c, b1 = pk["m1c"], pk["w1c"], pk["b1"]
    m2c, w2c, b2 = pk["m2c"], pk["w2c"], pk["b2"]
    wqkv, bqkv, w3f = pk["wqkv"], pk["bqkv"], pk["w3f"]
    cin_p = w1c.shape[1] // taps
    c1, c2 = b1.shape[0], b2.shape[0]
    cq = (wqkv.shape[0] - c2) // 2
    n1, n2 = m1c.shape[1] // taps, m2c.shape[1] // taps
    B = x2.shape[0] // cin_p

    operands = (scal, x2, m1c, w1c, b1, m2c, w2c, b2, wqkv, bqkv, w3f)
    vmem = pl.BlockSpec(memory_space=pltpu.MemorySpace.VMEM)
    smem = pl.BlockSpec(memory_space=pltpu.MemorySpace.SMEM)

    # Advisory cost hint so XLA schedules the sigma power-iteration glue around us.
    flops = 2 * (x2.shape[0] * x2.shape[1] * m1c.shape[1]     # conv1 gather
                 + c1 * w1c.shape[1] * B * n1                 # conv1 weights
                 + B * c1 * n1 * m2c.shape[1]                 # conv2 gather
                 + c2 * w2c.shape[1] * B * n2                 # conv2 weights
                 + wqkv.shape[0] * c2 * B * n2                # fused q/k/v
                 + B * n2 * n2 * (cq + c2))                   # attention bmms
    bytes_accessed = sum(int(a.size) * a.dtype.itemsize for a in operands) + B * n2 * 4

    return pl.pallas_call(
        _disc_kernel,
        out_shape=jax.ShapeDtypeStruct((1, B * n2), jnp.float32),
        in_specs=[smem] + [vmem] * (len(operands) - 1),
        out_specs=vmem,
        scratch_shapes=[
            pltpu.VMEM((taps * cin_p, B * n1), jnp.float32),  # conv1 im2col patches
            pltpu.VMEM((taps * c1, B * n2), jnp.float32),     # conv2 im2col patches
        ],
        cost_estimate=pl.CostEstimate(flops=flops,
                                      transcendentals=B * (n2 * n2 + n2),
                                      bytes_accessed=bytes_accessed),
    )(*operands)


# ---------------------------------------------------------------------------
# One-time parameter packing + per-call scalar glue (spectral norm sigma)
# ---------------------------------------------------------------------------

def _l2normalize(v, eps=1e-12):
    return v / (jnp.linalg.norm(v) + eps)


def _spectral_sigma(w_mat, u):
    """SAGAN SpectralNorm, power_iterations=1 (inference step) -> sigma."""
    v = _l2normalize(w_mat.T @ u)
    u_new = _l2normalize(w_mat @ v)
    return u_new @ (w_mat @ v)


def _conv_gather_matrix(in_h, in_w, ksize, stride, pad):
    """0/1 matrix M[y*in_w+x, t*out_hw+o] selecting the input pixel read by tap
    t=(kh,kw) of a (ksize,stride,pad) conv for output o=(oi,oj).  Column blocks are
    tap-major so  x(Cin,HWin) @ M  yields all patches in a single matmul."""
    out_h = (in_h + 2 * pad - ksize) // stride + 1
    out_w = (in_w + 2 * pad - ksize) // stride + 1
    out_hw = out_h * out_w
    m = np.zeros((in_h * in_w, ksize * ksize * out_hw), np.float32)
    for kh in range(ksize):
        for kw in range(ksize):
            t = kh * ksize + kw
            for oi in range(out_h):
                y = stride * oi + kh - pad
                if not (0 <= y < in_h):
                    continue
                for oj in range(out_w):
                    x = stride * oj + kw - pad
                    if 0 <= x < in_w:
                        m[y * in_w + x, t * out_hw + oi * out_w + oj] = 1.0
    return m


def pack_params(p):
    """Repack PyTorch-layout parameters into kernel layout (done once)."""
    taps, cin_p = 16, 8
    c1, cin = p["w1"].shape[0], p["w1"].shape[1]
    c2 = p["w2"].shape[0]
    # conv weights -> (Cout, taps*Cin), column order (tap, cin) matching the scratch.
    w1t = jnp.transpose(p["w1"].reshape(c1, cin, taps), (0, 2, 1))      # (c1, taps, cin)
    w1t = jnp.pad(w1t, ((0, 0), (0, 0), (0, cin_p - cin)))
    w2t = jnp.transpose(p["w2"].reshape(c2, c1, taps), (0, 2, 1))       # (c2, taps, c1)
    return {
        # for the per-call spectral-norm sigma (power iteration in the wrapper)
        "w1_mat": p["w1"].reshape(c1, -1), "u1": p["u1"],
        "w2_mat": p["w2"].reshape(c2, -1), "u2": p["u2"],
        "w1c": w1t.reshape(c1, taps * cin_p),
        "w2c": w2t.reshape(c2, taps * c1),
        "b1": p["b1"].reshape(c1, 1),
        "b2": p["b2"].reshape(c2, 1),
        # fused q/k/v 1x1 convs
        "wqkv": jnp.concatenate([p["wq"], p["wk"], p["wv"]], axis=0),
        "bqkv": jnp.concatenate([p["bq"], p["bk"], p["bv"]],
                                axis=0).reshape(-1, 1),
        "w3f": p["w3"].reshape(c2, 16),
        "gamma": p["gamma"],
        "b3": p["b3"],
        # constant patch-selection matrices, bf16 (0/1 exact) -> halves constant DMA.
        "m1c": jnp.asarray(_conv_gather_matrix(16, 16, 4, 2, 1), jnp.bfloat16),  # (256,1024)
        "m2c": jnp.asarray(_conv_gather_matrix(8, 8, 4, 2, 1), jnp.bfloat16),    # (64, 256)
    }


def discriminator_forward(x, packed):
    B, cin, H, W = x.shape
    inv_s1 = 1.0 / _spectral_sigma(packed["w1_mat"], packed["u1"])
    inv_s2 = 1.0 / _spectral_sigma(packed["w2_mat"], packed["u2"])
    scal = jnp.stack([inv_s1, inv_s2, packed["gamma"][0]]).astype(jnp.float32)   # SMEM
    # batch-folded, channel-padded, bf16 input layout: row = b*8 + cin.
    x2 = jnp.pad(x.reshape(B, cin, H * W), ((0, 0), (0, 8 - cin), (0, 0)))
    x2 = x2.reshape(B * 8, H * W).astype(jnp.bfloat16)
    o = _fused_call(scal, x2, packed)                        # (1, B*16)
    out = o.reshape(B, 16).sum(axis=-1) + packed["b3"][0]    # final-conv spatial sum + bias
    return jnp.squeeze(out), [], []                          # (out, p1, p2) like torch


# ---------------------------------------------------------------------------
# Pure-JAX reference (numerical self-check only)
# ---------------------------------------------------------------------------

def _ref_conv(x, w, b, stride, padding):
    y = lax.conv_general_dilated(x, w, (stride, stride), padding,
                                 dimension_numbers=("NCHW", "OIHW", "NCHW"))
    return y + b[None, :, None, None]


def reference_forward(x, p):
    w1 = p["w1"] / _spectral_sigma(p["w1"].reshape(p["w1"].shape[0], -1), p["u1"])
    h = _ref_conv(x, w1, p["b1"], 2, ((1, 1), (1, 1)))
    h = jnp.where(h >= 0, h, 0.1 * h)
    w2 = p["w2"] / _spectral_sigma(p["w2"].reshape(p["w2"].shape[0], -1), p["u2"])
    h = _ref_conv(h, w2, p["b2"], 2, ((1, 1), (1, 1)))
    h = jnp.where(h >= 0, h, 0.1 * h)
    B, C, H, W = h.shape
    hf = h.reshape(B, C, H * W)
    q = jnp.einsum("oc,bcn->bon", p["wq"], hf) + p["bq"][None, :, None]
    k = jnp.einsum("oc,bcn->bon", p["wk"], hf) + p["bk"][None, :, None]
    v = jnp.einsum("oc,bcn->bon", p["wv"], hf) + p["bv"][None, :, None]
    energy = jnp.einsum("bci,bcj->bij", q, k)
    attn = jax.nn.softmax(energy, axis=-1)
    out = jnp.einsum("bcj,bij->bci", v, attn)
    h = (p["gamma"][0] * out + hf).reshape(B, C, H, W)
    y = _ref_conv(h, p["w3"], p["b3"], 1, ((0, 0), (0, 0)))
    return jnp.squeeze(y)


# ---------------------------------------------------------------------------
# Deterministic synthetic parameters (PyTorch layout)
# ---------------------------------------------------------------------------

def init_params(key, conv_dim=16):
    ks = jax.random.split(key, 12)
    c1, c2 = conv_dim, conv_dim * 2             # 16, 32
    cq = c2 // 8                                # 4
    s = 0.1
    return {
        "w1": s * jax.random.normal(ks[0], (c1, 3, 4, 4), jnp.float32),
        "b1": s * jax.random.normal(ks[1], (c1,), jnp.float32),
        "u1": _l2normalize(jax.random.normal(ks[2], (c1,), jnp.float32)),
        "w2": s * jax.random.normal(ks[3], (c2, c1, 4, 4), jnp.float32),
        "b2": s * jax.random.normal(ks[4], (c2,), jnp.float32),
        "u2": _l2normalize(jax.random.normal(ks[5], (c2,), jnp.float32)),
        # Self_Attn_dynamic(32): 1x1 convs stored as (Cout, Cin)
        "wq": s * jax.random.normal(ks[6], (cq, c2), jnp.float32),
        "bq": s * jax.random.normal(ks[7], (cq,), jnp.float32),
        "wk": s * jax.random.normal(ks[8], (cq, c2), jnp.float32),
        "bk": s * jax.random.normal(ks[9], (cq,), jnp.float32),
        "wv": s * jax.random.normal(ks[10], (c2, c2), jnp.float32),
        "bv": s * jax.random.normal(ks[11], (c2,), jnp.float32),
        # torch init is zeros(1); use a nonzero synthetic value so the attention
        # path is actually exercised by the numeric self-check.
        "gamma": jnp.full((1,), 0.5, jnp.float32),
        "w3": s * jax.random.normal(jax.random.fold_in(key, 100),
                                    (1, c2, 4, 4), jnp.float32),
        "b3": s * jax.random.normal(jax.random.fold_in(key, 101),
                                    (1,), jnp.float32),
    }


if __name__ == "__main__":
    key = jax.random.PRNGKey(0)
    k_x, k_p = jax.random.split(key)
    # batch=2, image_size=16 -> input (2, 3, 16, 16)
    x = jax.random.normal(k_x, (2, 3, 16, 16), jnp.float32)
    params = init_params(k_p, conv_dim=16)
    packed = pack_params(params)                # one-time layout packing

    fwd = jax.jit(discriminator_forward)
    out, p1, p2 = fwd(x, packed)
    out = jax.block_until_ready(out)

    ref = jax.block_until_ready(reference_forward(x, params))
    # tolerance covers the bf16 patch-gather activations + pl.reciprocal(approx=True)
    # in the softmax; real algebra errors would be orders of magnitude larger.
    np.testing.assert_allclose(np.asarray(out), np.asarray(ref),
                               rtol=1e-2, atol=1e-2)
    assert out.shape == (2,) and p1 == [] and p2 == []
    print("KERNEL_OK")
</pallas_src>

<mosaic_0001>
module attributes {stable_mosaic.version = 11 : i64} {
  func.func @_disc_kernel(%arg0: memref<3xf32, #tpu.memory_space<smem>>, %arg1: memref<16x256xbf16, #tpu.memory_space<vmem>>, %arg2: memref<256x1024xbf16, #tpu.memory_space<vmem>>, %arg3: memref<16x128xf32, #tpu.memory_space<vmem>>, %arg4: memref<16x1xf32, #tpu.memory_space<vmem>>, %arg5: memref<64x256xbf16, #tpu.memory_space<vmem>>, %arg6: memref<32x256xf32, #tpu.memory_space<vmem>>, %arg7: memref<32x1xf32, #tpu.memory_space<vmem>>, %arg8: memref<40x32xf32, #tpu.memory_space<vmem>>, %arg9: memref<40x1xf32, #tpu.memory_space<vmem>>, %arg10: memref<32x16xf32, #tpu.memory_space<vmem>>, %arg11: memref<1x32xf32, #tpu.memory_space<vmem>>, %arg12: memref<128x128xf32, #tpu.memory_space<vmem>>, %arg13: memref<256x32xf32, #tpu.memory_space<vmem>>) attributes {dimension_semantics = [], scalar_prefetch = 0 : i64, scratch_operands = 2 : i64, tpu.core_type = #tpu.core_type<tc>} {
    %c0 = arith.constant 0 : index
    %0 = memref.load %arg0[%c0] : memref<3xf32, #tpu.memory_space<smem>>
    %c1 = arith.constant 1 : index
    %1 = memref.load %arg0[%c1] : memref<3xf32, #tpu.memory_space<smem>>
    %c2 = arith.constant 2 : index
    %2 = memref.load %arg0[%c2] : memref<3xf32, #tpu.memory_space<smem>>
    %c0_0 = arith.constant 0 : index
    %c0_1 = arith.constant 0 : index
    %3 = vector.load %arg1[%c0_0, %c0_1] : memref<16x256xbf16, #tpu.memory_space<vmem>>, vector<16x256xbf16>
    %c0_2 = arith.constant 0 : index
    %c0_3 = arith.constant 0 : index
    %4 = vector.load %arg2[%c0_2, %c0_3] : memref<256x1024xbf16, #tpu.memory_space<vmem>>, vector<256x1024xbf16>
    %cst = arith.constant dense<0.000000e+00> : vector<16x1024xf32>
    %5 = tpu.matmul %3, %4, %cst {dimension_numbers = #tpu.dot_dimension_numbers<[1], [0], [0], [1], [0, 0, 1, 1], [], []>} : vector<16x256xbf16>, vector<256x1024xbf16>, vector<16x1024xf32> -> vector<16x1024xf32>
    %6 = vector.extract_strided_slice %5 {offsets = [0, 0], sizes = [8, 64], strides = [1, 1]} : vector<16x1024xf32> to vector<8x64xf32>
    %c0_4 = arith.constant 0 : index
    %c0_5 = arith.constant 0 : index
    %7 = vector.load %arg12[%c0_4, %c0_5] : memref<128x128xf32, #tpu.memory_space<vmem>>, vector<8x64xf32>
    tpu.vector_store %arg12[%c0_4, %c0_5], %6 {strides = array<i32>} : memref<128x128xf32, #tpu.memory_space<vmem>>, vector<8x64xf32>,
    %8 = vector.extract_strided_slice %5 {offsets = [0, 64], sizes = [8, 64], strides = [1, 1]} : vector<16x1024xf32> to vector<8x64xf32>
    %c8 = arith.constant 8 : index
    %c0_6 = arith.constant 0 : index
    %9 = vector.load %arg12[%c8, %c0_6] : memref<128x128xf32, #tpu.memory_space<vmem>>, vector<8x64xf32>
    tpu.vector_store %arg12[%c8, %c0_6], %8 {strides = array<i32>} : memref<128x128xf32, #tpu.memory_space<vmem>>, vector<8x64xf32>,
    %10 = vector.extract_strided_slice %5 {offsets = [0, 128], sizes = [8, 64], strides = [1, 1]} : vector<16x1024xf32> to vector<8x64xf32>
    %c16 = arith.constant 16 : index
    %c0_7 = arith.constant 0 : index
    %11 = vector.load %arg12[%c16, %c0_7] : memref<128x128xf32, #tpu.memory_space<vmem>>, vector<8x64xf32>
    tpu.vector_store %arg12[%c16, %c0_7], %10 {strides = array<i32>} : memref<128x128xf32, #tpu.memory_space<vmem>>, vector<8x64xf32>,
    %12 = vector.extract_strided_slice %5 {offsets = [0, 192], sizes = [8, 64], strides = [1, 1]} : vector<16x1024xf32> to vector<8x64xf32>
    %c24 = arith.constant 24 : index
    %c0_8 = arith.constant 0 : index
    %13 = vector.load %arg12[%c24, %c0_8] : memref<128x128xf32, #tpu.memory_space<vmem>>, vector<8x64xf32>
    tpu.vector_store %arg12[%c24, %c0_8], %12 {strides = array<i32>} : memref<128x128xf32, #tpu.memory_space<vmem>>, vector<8x64xf32>,
    %14 = vector.extract_strided_slice %5 {offsets = [0, 256], sizes = [8, 64], strides = [1, 1]} : vector<16x1024xf32> to vector<8x64xf32>
    %c32 = arith.constant 32 : index
    %c0_9 = arith.constant 0 : index
    %15 = vector.load %arg12[%c32, %c0_9] : memref<128x128xf32, #tpu.memory_space<vmem>>, vector<8x64xf32>
    tpu.vector_store %arg12[%c32, %c0_9], %14 {strides = array<i32>} : memref<128x128xf32, #tpu.memory_space<vmem>>, vector<8x64xf32>,
    %16 = vector.extract_strided_slice %5 {offsets = [0, 320], sizes = [8, 64], strides = [1, 1]} : vector<16x1024xf32> to vector<8x64xf32>
    %c40 = arith.constant 40 : index
    %c0_10 = arith.constant 0 : index
    %17 = vector.load %arg12[%c40, %c0_10] : memref<128x128xf32, #tpu.memory_space<vmem>>, vector<8x64xf32>
    tpu.vector_store %arg12[%c40, %c0_10], %16 {strides = array<i32>} : memref<128x128xf32, #tpu.memory_space<vmem>>, vector<8x64xf32>,
    %18 = vector.extract_strided_slice %5 {offsets = [0, 384], sizes = [8, 64], strides = [1, 1]} : vector<16x1024xf32> to vector<8x64xf32>
    %c48 = arith.constant 48 : index
    %c0_11 = arith.constant 0 : index
    %19 = vector.load %arg12[%c48, %c0_11] : memref<128x128xf32, #tpu.memory_space<vmem>>, vector<8x64xf32>
    tpu.vector_store %arg12[%c48, %c0_11], %18 {strides = array<i32>} : memref<128x128xf32, #tpu.memory_space<vmem>>, vector<8x64xf32>,
    %20 = vector.extract_strided_slice %5 {offsets = [0, 448], sizes = [8, 64], strides = [1, 1]} : vector<16x1024xf32> to vector<8x64xf32>
    %c56 = arith.constant 56 : index
    %c0_12 = arith.constant 0 : index
    %21 = vector.load %arg12[%c56, %c0_12] : memref<128x128xf32, #tpu.memory_space<vmem>>, vector<8x64xf32>
    tpu.vector_store %arg12[%c56, %c0_12], %20 {strides = array<i32>} : memref<128x128xf32, #tpu.memory_space<vmem>>, vector<8x64xf32>,
    %22 = vector.extract_strided_slice %5 {offsets = [0, 512], sizes = [8, 64], strides = [1, 1]} : vector<16x1024xf32> to vector<8x64xf32>
    %c64 = arith.constant 64 : index
    %c0_13 = arith.constant 0 : index
    %23 = vector.load %arg12[%c64, %c0_13] : memref<128x128xf32, #tpu.memory_space<vmem>>, vector<8x64xf32>
    tpu.vector_store %arg12[%c64, %c0_13], %22 {strides = array<i32>} : memref<128x128xf32, #tpu.memory_space<vmem>>, vector<8x64xf32>,
    %24 = vector.extract_strided_slice %5 {offsets = [0, 576], sizes = [8, 64], strides = [1, 1]} : vector<16x1024xf32> to vector<8x64xf32>
    %c72 = arith.constant 72 : index
    %c0_14 = arith.constant 0 : index
    %25 = vector.load %arg12[%c72, %c0_14] : memref<128x128xf32, #tpu.memory_space<vmem>>, vector<8x64xf32>
    tpu.vector_store %arg12[%c72, %c0_14], %24 {strides = array<i32>} : memref<128x128xf32, #tpu.memory_space<vmem>>, vector<8x64xf32>,
    %26 = vector.extract_strided_slice %5 {offsets = [0, 640], sizes = [8, 64], strides = [1, 1]} : vector<16x1024xf32> to vector<8x64xf32>
    %c80 = arith.constant 80 : index
    %c0_15 = arith.constant 0 : index
    %27 = vector.load %arg12[%c80, %c0_15] : memref<128x128xf32, #tpu.memory_space<vmem>>, vector<8x64xf32>
    tpu.vector_store %arg12[%c80, %c0_15], %26 {strides = array<i32>} : memref<128x128xf32, #tpu.memory_space<vmem>>, vector<8x64xf32>,
    %28 = vector.extract_strided_slice %5 {offsets = [0, 704], sizes = [8, 64], strides = [1, 1]} : vector<16x1024xf32> to vector<8x64xf32>
    %c88 = arith.constant 88 : index
    %c0_16 = arith.constant 0 : index
    %29 = vector.load %arg12[%c88, %c0_16] : memref<128x128xf32, #tpu.memory_space<vmem>>, vector<8x64xf32>
    tpu.vector_store %arg12[%c88, %c0_16], %28 {strides = array<i32>} : memref<128x128xf32, #tpu.memory_space<vmem>>, vector<8x64xf32>,
    %30 = vector.extract_strided_slice %5 {offsets = [0, 768], sizes = [8, 64], strides = [1, 1]} : vector<16x1024xf32> to vector<8x64xf32>
    %c96 = arith.constant 96 : index
    %c0_17 = arith.constant 0 : index
    %31 = vector.load %arg12[%c96, %c0_17] : memref<128x128xf32, #tpu.memory_space<vmem>>, vector<8x64xf32>
    tpu.vector_store %arg12[%c96, %c0_17], %30 {strides = array<i32>} : memref<128x128xf32, #tpu.memory_space<vmem>>, vector<8x64xf32>,
    %32 = vector.extract_strided_slice %5 {offsets = [0, 832], sizes = [8, 64], strides = [1, 1]} : vector<16x1024xf32> to vector<8x64xf32>
    %c104 = arith.constant 104 : index
    %c0_18 = arith.constant 0 : index
    %33 = vector.load %arg12[%c104, %c0_18] : memref<128x128xf32, #tpu.memory_space<vmem>>, vector<8x64xf32>
    tpu.vector_store %arg12[%c104, %c0_18], %32 {strides = array<i32>} : memref<128x128xf32, #tpu.memory_space<vmem>>, vector<8x64xf32>,
    %34 = vector.extract_strided_slice %5 {offsets = [0, 896], sizes = [8, 64], strides = [1, 1]} : vector<16x1024xf32> to vector<8x64xf32>
    %c112 = arith.constant 112 : index
    %c0_19 = arith.constant 0 : index
    %35 = vector.load %arg12[%c112, %c0_19] : memref<128x128xf32, #tpu.memory_space<vmem>>, vector<8x64xf32>
    tpu.vector_store %arg12[%c112, %c0_19], %34 {strides = array<i32>} : memref<128x128xf32, #tpu.memory_space<vmem>>, vector<8x64xf32>,
    %36 = vector.extract_strided_slice %5 {offsets = [0, 960], sizes = [8, 64], strides = [1, 1]} : vector<16x1024xf32> to vector<8x64xf32>
    %c120 = arith.constant 120 : index
    %c0_20 = arith.constant 0 : index
    %37 = vector.load %arg12[%c120, %c0_20] : memref<128x128xf32, #tpu.memory_space<vmem>>, vector<8x64xf32>
    tpu.vector_store %arg12[%c120, %c0_20], %36 {strides = array<i32>} : memref<128x128xf32, #tpu.memory_space<vmem>>, vector<8x64xf32>,
    %38 = vector.extract_strided_slice %5 {offsets = [8, 0], sizes = [8, 64], strides = [1, 1]} : vector<16x1024xf32> to vector<8x64xf32>
    %c0_21 = arith.constant 0 : index
    %c64_22 = arith.constant 64 : index
    %39 = vector.load %arg12[%c0_21, %c64_22] : memref<128x128xf32, #tpu.memory_space<vmem>>, vector<8x64xf32>
    tpu.vector_store %arg12[%c0_21, %c64_22], %38 {strides = array<i32>} : memref<128x128xf32, #tpu.memory_space<vmem>>, vector<8x64xf32>,
    %40 = vector.extract_strided_slice %5 {offsets = [8, 64], sizes = [8, 64], strides = [1, 1]} : vector<16x1024xf32> to vector<8x64xf32>
    %c8_23 = arith.constant 8 : index
    %c64_24 = arith.constant 64 : index
    %41 = vector.load %arg12[%c8_23, %c64_24] : memref<128x128xf32, #tpu.memory_space<vmem>>, vector<8x64xf32>
    tpu.vector_store %arg12[%c8_23, %c64_24], %40 {strides = array<i32>} : memref<128x128xf32, #tpu.memory_space<vmem>>, vector<8x64xf32>,
    %42 = vector.extract_strided_slice %5 {offsets = [8, 128], sizes = [8, 64], strides = [1, 1]} : vector<16x1024xf32> to vector<8x64xf32>
    %c16_25 = arith.constant 16 : index
    %c64_26 = arith.constant 64 : index
    %43 = vector.load %arg12[%c16_25, %c64_26] : memref<128x128xf32, #tpu.memory_space<vmem>>, vector<8x64xf32>
    tpu.vector_store %arg12[%c16_25, %c64_26], %42 {strides = array<i32>} : memref<128x128xf32, #tpu.memory_space<vmem>>, vector<8x64xf32>,
    %44 = vector.extract_strided_slice %5 {offsets = [8, 192], sizes = [8, 64], strides = [1, 1]} : vector<16x1024xf32> to vector<8x64xf32>
    %c24_27 = arith.constant 24 : index
    %c64_28 = arith.constant 64 : index
    %45 = vector.load %arg12[%c24_27, %c64_28] : memref<128x128xf32, #tpu.memory_space<vmem>>, vector<8x64xf32>
    tpu.vector_store %arg12[%c24_27, %c64_28], %44 {strides = array<i32>} : memref<128x128xf32, #tpu.memory_space<vmem>>, vector<8x64xf32>,
    %46 = vector.extract_strided_slice %5 {offsets = [8, 256], sizes = [8, 64], strides = [1, 1]} : vector<16x1024xf32> to vector<8x64xf32>
    %c32_29 = arith.constant 32 : index
    %c64_30 = arith.constant 64 : index
    %47 = vector.load %arg12[%c32_29, %c64_30] : memref<128x128xf32, #tpu.memory_space<vmem>>, vector<8x64xf32>
    tpu.vector_store %arg12[%c32_29, %c64_30], %46 {strides = array<i32>} : memref<128x128xf32, #tpu.memory_space<vmem>>, vector<8x64xf32>,
    %48 = vector.extract_strided_slice %5 {offsets = [8, 320], sizes = [8, 64], strides = [1, 1]} : vector<16x1024xf32> to vector<8x64xf32>
    %c40_31 = arith.constant 40 : index
    %c64_32 = arith.constant 64 : index
    %49 = vector.load %arg12[%c40_31, %c64_32] : memref<128x128xf32, #tpu.memory_space<vmem>>, vector<8x64xf32>
    tpu.vector_store %arg12[%c40_31, %c64_32], %48 {strides = array<i32>} : memref<128x128xf32, #tpu.memory_space<vmem>>, vector<8x64xf32>,
    %50 = vector.extract_strided_slice %5 {offsets = [8, 384], sizes = [8, 64], strides = [1, 1]} : vector<16x1024xf32> to vector<8x64xf32>
    %c48_33 = arith.constant 48 : index
    %c64_34 = arith.constant 64 : index
    %51 = vector.load %arg12[%c48_33, %c64_34] : memref<128x128xf32, #tpu.memory_space<vmem>>, vector<8x64xf32>
    tpu.vector_store %arg12[%c48_33, %c64_34], %50 {strides = array<i32>} : memref<128x128xf32, #tpu.memory_space<vmem>>, vector<8x64xf32>,
    %52 = vector.extract_strided_slice %5 {offsets = [8, 448], sizes = [8, 64], strides = [1, 1]} : vector<16x1024xf32> to vector<8x64xf32>
    %c56_35 = arith.constant 56 : index
    %c64_36 = arith.constant 64 : index
    %53 = vector.load %arg12[%c56_35, %c64_36] : memref<128x128xf32, #tpu.memory_space<vmem>>, vector<8x64xf32>
    tpu.vector_store %arg12[%c56_35, %c64_36], %52 {strides = array<i32>} : memref<128x128xf32, #tpu.memory_space<vmem>>, vector<8x64xf32>,
    %54 = vector.extract_strided_slice %5 {offsets = [8, 512], sizes = [8, 64], strides = [1, 1]} : vector<16x1024xf32> to vector<8x64xf32>
    %c64_37 = arith.constant 64 : index
    %c64_38 = arith.constant 64 : index
    %55 = vector.load %arg12[%c64_37, %c64_38] : memref<128x128xf32, #tpu.memory_space<vmem>>, vector<8x64xf32>
    tpu.vector_store %arg12[%c64_37, %c64_38], %54 {strides = array<i32>} : memref<128x128xf32, #tpu.memory_space<vmem>>, vector<8x64xf32>,
    %56 = vector.extract_strided_slice %5 {offsets = [8, 576], sizes = [8, 64], strides = [1, 1]} : vector<16x1024xf32> to vector<8x64xf32>
    %c72_39 = arith.constant 72 : index
    %c64_40 = arith.constant 64 : index
    %57 = vector.load %arg12[%c72_39, %c64_40] : memref<128x128xf32, #tpu.memory_space<vmem>>, vector<8x64xf32>
    tpu.vector_store %arg12[%c72_39, %c64_40], %56 {strides = array<i32>} : memref<128x128xf32, #tpu.memory_space<vmem>>, vector<8x64xf32>,
    %58 = vector.extract_strided_slice %5 {offsets = [8, 640], sizes = [8, 64], strides = [1, 1]} : vector<16x1024xf32> to vector<8x64xf32>
    %c80_41 = arith.constant 80 : index
    %c64_42 = arith.constant 64 : index
    %59 = vector.load %arg12[%c80_41, %c64_42] : memref<128x128xf32, #tpu.memory_space<vmem>>, vector<8x64xf32>
    tpu.vector_store %arg12[%c80_41, %c64_42], %58 {strides = array<i32>} : memref<128x128xf32, #tpu.memory_space<vmem>>, vector<8x64xf32>,
    %60 = vector.extract_strided_slice %5 {offsets = [8, 704], sizes = [8, 64], strides = [1, 1]} : vector<16x1024xf32> to vector<8x64xf32>
    %c88_43 = arith.constant 88 : index
    %c64_44 = arith.constant 64 : index
    %61 = vector.load %arg12[%c88_43, %c64_44] : memref<128x128xf32, #tpu.memory_space<vmem>>, vector<8x64xf32>
    tpu.vector_store %arg12[%c88_43, %c64_44], %60 {strides = array<i32>} : memref<128x128xf32, #tpu.memory_space<vmem>>, vector<8x64xf32>,
    %62 = vector.extract_strided_slice %5 {offsets = [8, 768], sizes = [8, 64], strides = [1, 1]} : vector<16x1024xf32> to vector<8x64xf32>
    %c96_45 = arith.constant 96 : index
    %c64_46 = arith.constant 64 : index
    %63 = vector.load %arg12[%c96_45, %c64_46] : memref<128x128xf32, #tpu.memory_space<vmem>>, vector<8x64xf32>
    tpu.vector_store %arg12[%c96_45, %c64_46], %62 {strides = array<i32>} : memref<128x128xf32, #tpu.memory_space<vmem>>, vector<8x64xf32>,
    %64 = vector.extract_strided_slice %5 {offsets = [8, 832], sizes = [8, 64], strides = [1, 1]} : vector<16x1024xf32> to vector<8x64xf32>
    %c104_47 = arith.constant 104 : index
    %c64_48 = arith.constant 64 : index
    %65 = vector.load %arg12[%c104_47, %c64_48] : memref<128x128xf32, #tpu.memory_space<vmem>>, vector<8x64xf32>
    tpu.vector_store %arg12[%c104_47, %c64_48], %64 {strides = array<i32>} : memref<128x128xf32, #tpu.memory_space<vmem>>, vector<8x64xf32>,
    %66 = vector.extract_strided_slice %5 {offsets = [8, 896], sizes = [8, 64], strides = [1, 1]} : vector<16x1024xf32> to vector<8x64xf32>
    %c112_49 = arith.constant 112 : index
    %c64_50 = arith.constant 64 : index
    %67 = vector.load %arg12[%c112_49, %c64_50] : memref<128x128xf32, #tpu.memory_space<vmem>>, vector<8x64xf32>
    tpu.vector_store %arg12[%c112_49, %c64_50], %66 {strides = array<i32>} : memref<128x128xf32, #tpu.memory_space<vmem>>, vector<8x64xf32>,
    %68 = vector.extract_strided_slice %5 {offsets = [8, 960], sizes = [8, 64], strides = [1, 1]} : vector<16x1024xf32> to vector<8x64xf32>
    %c120_51 = arith.constant 120 : index
    %c64_52 = arith.constant 64 : index
    %69 = vector.load %arg12[%c120_51, %c64_52] : memref<128x128xf32, #tpu.memory_space<vmem>>, vector<8x64xf32>
    tpu.vector_store %arg12[%c120_51, %c64_52], %68 {strides = array<i32>} : memref<128x128xf32, #tpu.memory_space<vmem>>, vector<8x64xf32>,
    %c0_53 = arith.constant 0 : index
    %c0_54 = arith.constant 0 : index
    %70 = vector.load %arg3[%c0_53, %c0_54] : memref<16x128xf32, #tpu.memory_space<vmem>>, vector<16x128xf32>
    %c0_55 = arith.constant 0 : index
    %c0_56 = arith.constant 0 : index
    %71 = vector.load %arg12[%c0_55, %c0_56] : memref<128x128xf32, #tpu.memory_space<vmem>>, vector<128x128xf32>
    %cst_57 = arith.constant dense<0.000000e+00> : vector<16x128xf32>
    %72 = tpu.matmul %70, %71, %cst_57 {dimension_numbers = #tpu.dot_dimension_numbers<[1], [0], [0], [1], [0, 0, 1, 1], [], []>} : vector<16x128xf32>, vector<128x128xf32>, vector<16x128xf32> -> vector<16x128xf32>
    %73 = vector.broadcast %0 : f32 to vector<16x128xf32>
    %74 = arith.mulf %72, %73 : vector<16x128xf32>
    %c0_58 = arith.constant 0 : index
    %c0_59 = arith.constant 0 : index
    %75 = vector.load %arg4[%c0_58, %c0_59] : memref<16x1xf32, #tpu.memory_space<vmem>>, vector<16x1xf32>
    %76 = vector.broadcast %75 : vector<16x1xf32> to vector<16x128xf32>
    %77 = arith.addf %74, %76 : vector<16x128xf32>
    %cst_60 = arith.constant 0.000000e+00 : f32
    %78 = vector.broadcast %cst_60 : f32 to vector<16x128xf32>
    %79 = arith.cmpf oge, %77, %78 : vector<16x128xf32>
    %cst_61 = arith.constant 1.000000e-01 : f32
    %80 = vector.broadcast %cst_61 : f32 to vector<16x128xf32>
    %81 = arith.mulf %80, %77 : vector<16x128xf32>
    %82 = arith.select %79, %77, %81 : vector<16x128xi1>, vector<16x128xf32>
    %83 = arith.truncf %82 : vector<16x128xf32> to vector<16x128xbf16>
    %84 = vector.extract_strided_slice %83 {offsets = [0, 0], sizes = [16, 64], strides = [1, 1]} : vector<16x128xbf16> to vector<16x64xbf16>
    %c0_62 = arith.constant 0 : index
    %c0_63 = arith.constant 0 : index
    %85 = vector.load %arg5[%c0_62, %c0_63] : memref<64x256xbf16, #tpu.memory_space<vmem>>, vector<64x256xbf16>
    %cst_64 = arith.constant dense<0.000000e+00> : vector<16x256xf32>
    %86 = tpu.matmul %84, %85, %cst_64 {dimension_numbers = #tpu.dot_dimension_numbers<[1], [0], [0], [1], [0, 0, 1, 1], [], []>} : vector<16x64xbf16>, vector<64x256xbf16>, vector<16x256xf32> -> vector<16x256xf32>
    %87 = vector.extract_strided_slice %86 {offsets = [0, 0], sizes = [16, 16], strides = [1, 1]} : vector<16x256xf32> to vector<16x16xf32>
    %c0_65 = arith.constant 0 : index
    %c0_66 = arith.constant 0 : index
    %88 = vector.load %arg13[%c0_65, %c0_66] : memref<256x32xf32, #tpu.memory_space<vmem>>, vector<16x16xf32>
    tpu.vector_store %arg13[%c0_65, %c0_66], %87 {strides = array<i32>} : memref<256x32xf32, #tpu.memory_space<vmem>>, vector<16x16xf32>,
    %89 = vector.extract_strided_slice %86 {offsets = [0, 16], sizes = [16, 16], strides = [1, 1]} : vector<16x256xf32> to vector<16x16xf32>
    %c16_67 = arith.constant 16 : index
    %c0_68 = arith.constant 0 : index
    %90 = vector.load %arg13[%c16_67, %c0_68] : memref<256x32xf32, #tpu.memory_space<vmem>>, vector<16x16xf32>
    tpu.vector_store %arg13[%c16_67, %c0_68], %89 {strides = array<i32>} : memref<256x32xf32, #tpu.memory_space<vmem>>, vector<16x16xf32>,
    %91 = vector.extract_strided_slice %86 {offsets = [0, 32], sizes = [16, 16], strides = [1, 1]} : vector<16x256xf32> to vector<16x16xf32>
    %c32_69 = arith.constant 32 : index
    %c0_70 = arith.constant 0 : index
    %92 = vector.load %arg13[%c32_69, %c0_70] : memref<256x32xf32, #tpu.memory_space<vmem>>, vector<16x16xf32>
    tpu.vector_store %arg13[%c32_69, %c0_70], %91 {strides = array<i32>} : memref<256x32xf32, #tpu.memory_space<vmem>>, vector<16x16xf32>,
    %93 = vector.extract_strided_slice %86 {offsets = [0, 48], sizes = [16, 16], strides = [1, 1]} : vector<16x256xf32> to vector<16x16xf32>
    %c48_71 = arith.constant 48 : index
    %c0_72 = arith.constant 0 : index
    %94 = vector.load %arg13[%c48_71, %c0_72] : memref<256x32xf32, #tpu.memory_space<vmem>>, vector<16x16xf32>
    tpu.vector_store %arg13[%c48_71, %c0_72], %93 {strides = array<i32>} : memref<256x32xf32, #tpu.memory_space<vmem>>, vector<16x16xf32>,
    %95 = vector.extract_strided_slice %86 {offsets = [0, 64], sizes = [16, 16], strides = [1, 1]} : vector<16x256xf32> to vector<16x16xf32>
    %c64_73 = arith.constant 64 : index
    %c0_74 = arith.constant 0 : index
    %96 = vector.load %arg13[%c64_73, %c0_74] : memref<256x32xf32, #tpu.memory_space<vmem>>, vector<16x16xf32>
    tpu.vector_store %arg13[%c64_73, %c0_74], %95 {strides = array<i32>} : memref<256x32xf32, #tpu.memory_space<vmem>>, vector<16x16xf32>,
    %97 = vector.extract_strided_slice %86 {offsets = [0, 80], sizes = [16, 16], strides = [1, 1]} : vector<16x256xf32> to vector<16x16xf32>
    %c80_75 = arith.constant 80 : index
    %c0_76 = arith.constant 0 : index
    %98 = vector.load %arg13[%c80_75, %c0_76] : memref<256x32xf32, #tpu.memory_space<vmem>>, vector<16x16xf32>
    tpu.vector_store %arg13[%c80_75, %c0_76], %97 {strides = array<i32>} : memref<256x32xf32, #tpu.memory_space<vmem>>, vector<16x16xf32>,
    %99 = vector.extract_strided_slice %86 {offsets = [0, 96], sizes = [16, 16], strides = [1, 1]} : vector<16x256xf32> to vector<16x16xf32>
    %c96_77 = arith.constant 96 : index
    %c0_78 = arith.constant 0 : index
    %100 = vector.load %arg13[%c96_77, %c0_78] : memref<256x32xf32, #tpu.memory_space<vmem>>, vector<16x16xf32>
    tpu.vector_store %arg13[%c96_77, %c0_78], %99 {strides = array<i32>} : memref<256x32xf32, #tpu.memory_space<vmem>>, vector<16x16xf32>,
    %101 = vector.extract_strided_slice %86 {offsets = [0, 112], sizes = [16, 16], strides = [1, 1]} : vector<16x256xf32> to vector<16x16xf32>
    %c112_79 = arith.constant 112 : index
    %c0_80 = arith.constant 0 : index
    %102 = vector.load %arg13[%c112_79, %c0_80] : memref<256x32xf32, #tpu.memory_space<vmem>>, vector<16x16xf32>
    tpu.vector_store %arg13[%c112_79, %c0_80], %101 {strides = array<i32>} : memref<256x32xf32, #tpu.memory_space<vmem>>, vector<16x16xf32>,
    %103 = vector.extract_strided_slice %86 {offsets = [0, 128], sizes = [16, 16], strides = [1, 1]} : vector<16x256xf32> to vector<16x16xf32>
    %c128 = arith.constant 128 : index
    %c0_81 = arith.constant 0 : index
    %104 = vector.load %arg13[%c128, %c0_81] : memref<256x32xf32, #tpu.memory_space<vmem>>, vector<16x16xf32>
    tpu.vector_store %arg13[%c128, %c0_81], %103 {strides = array<i32>} : memref<256x32xf32, #tpu.memory_space<vmem>>, vector<16x16xf32>,
    %105 = vector.extract_strided_slice %86 {offsets = [0, 144], sizes = [16, 16], strides = [1, 1]} : vector<16x256xf32> to vector<16x16xf32>
    %c144 = arith.constant 144 : index
    %c0_82 = arith.constant 0 : index
    %106 = vector.load %arg13[%c144, %c0_82] : memref<256x32xf32, #tpu.memory_space<vmem>>, vector<16x16xf32>
    tpu.vector_store %arg13[%c144, %c0_82], %105 {strides = array<i32>} : memref<256x32xf32, #tpu.memory_space<vmem>>, vector<16x16xf32>,
    %107 = vector.extract_strided_slice %86 {offsets = [0, 160], sizes = [16, 16], strides = [1, 1]} : vector<16x256xf32> to vector<16x16xf32>
    %c160 = arith.constant 160 : index
    %c0_83 = arith.constant 0 : index
    %108 = vector.load %arg13[%c160, %c0_83] : memref<256x32xf32, #tpu.memory_space<vmem>>, vector<16x16xf32>
    tpu.vector_store %arg13[%c160, %c0_83], %107 {strides = array<i32>} : memref<256x32xf32, #tpu.memory_space<vmem>>, vector<16x16xf32>,
    %109 = vector.extract_strided_slice %86 {offsets = [0, 176], sizes = [16, 16], strides = [1, 1]} : vector<16x256xf32> to vector<16x16xf32>
    %c176 = arith.constant 176 : index
    %c0_84 = arith.constant 0 : index
    %110 = vector.load %arg13[%c176, %c0_84] : memref<256x32xf32, #tpu.memory_space<vmem>>, vector<16x16xf32>
    tpu.vector_store %arg13[%c176, %c0_84], %109 {strides = array<i32>} : memref<256x32xf32, #tpu.memory_space<vmem>>, vector<16x16xf32>,
    %111 = vector.extract_strided_slice %86 {offsets = [0, 192], sizes = [16, 16], strides = [1, 1]} : vector<16x256xf32> to vector<16x16xf32>
    %c192 = arith.constant 192 : index
    %c0_85 = arith.constant 0 : index
    %112 = vector.load %arg13[%c192, %c0_85] : memref<256x32xf32, #tpu.memory_space<vmem>>, vector<16x16xf32>
    tpu.vector_store %arg13[%c192, %c0_85], %111 {strides = array<i32>} : memref<256x32xf32, #tpu.memory_space<vmem>>, vector<16x16xf32>,
    %113 = vector.extract_strided_slice %86 {offsets = [0, 208], sizes = [16, 16], strides = [1, 1]} : vector<16x256xf32> to vector<16x16xf32>
    %c208 = arith.constant 208 : index
    %c0_86 = arith.constant 0 : index
    %114 = vector.load %arg13[%c208, %c0_86] : memref<256x32xf32, #tpu.memory_space<vmem>>, vector<16x16xf32>
    tpu.vector_store %arg13[%c208, %c0_86], %113 {strides = array<i32>} : memref<256x32xf32, #tpu.memory_space<vmem>>, vector<16x16xf32>,
    %115 = vector.extract_strided_slice %86 {offsets = [0, 224], sizes = [16, 16], strides = [1, 1]} : vector<16x256xf32> to vector<16x16xf32>
    %c224 = arith.constant 224 : index
    %c0_87 = arith.constant 0 : index
    %116 = vector.load %arg13[%c224, %c0_87] : memref<256x32xf32, #tpu.memory_space<vmem>>, vector<16x16xf32>
    tpu.vector_store %arg13[%c224, %c0_87], %115 {strides = array<i32>} : memref<256x32xf32, #tpu.memory_space<vmem>>, vector<16x16xf32>,
    %117 = vector.extract_strided_slice %86 {offsets = [0, 240], sizes = [16, 16], strides = [1, 1]} : vector<16x256xf32> to vector<16x16xf32>
    %c240 = arith.constant 240 : index
    %c0_88 = arith.constant 0 : index
    %118 = vector.load %arg13[%c240, %c0_88] : memref<256x32xf32, #tpu.memory_space<vmem>>, vector<16x16xf32>
    tpu.vector_store %arg13[%c240, %c0_88], %117 {strides = array<i32>} : memref<256x32xf32, #tpu.memory_space<vmem>>, vector<16x16xf32>,
    %119 = vector.extract_strided_slice %83 {offsets = [0, 64], sizes = [16, 64], strides = [1, 1]} : vector<16x128xbf16> to vector<16x64xbf16>
    %c0_89 = arith.constant 0 : index
    %c0_90 = arith.constant 0 : index
    %120 = vector.load %arg5[%c0_89, %c0_90] : memref<64x256xbf16, #tpu.memory_space<vmem>>, vector<64x256xbf16>
    %cst_91 = arith.constant dense<0.000000e+00> : vector<16x256xf32>
    %121 = tpu.matmul %119, %120, %cst_91 {dimension_numbers = #tpu.dot_dimension_numbers<[1], [0], [0], [1], [0, 0, 1, 1], [], []>} : vector<16x64xbf16>, vector<64x256xbf16>, vector<16x256xf32> -> vector<16x256xf32>
    %122 = vector.extract_strided_slice %121 {offsets = [0, 0], sizes = [16, 16], strides = [1, 1]} : vector<16x256xf32> to vector<16x16xf32>
    %c0_92 = arith.constant 0 : index
    %c16_93 = arith.constant 16 : index
    %123 = vector.load %arg13[%c0_92, %c16_93] : memref<256x32xf32, #tpu.memory_space<vmem>>, vector<16x16xf32>
    tpu.vector_store %arg13[%c0_92, %c16_93], %122 {strides = array<i32>} : memref<256x32xf32, #tpu.memory_space<vmem>>, vector<16x16xf32>,
    %124 = vector.extract_strided_slice %121 {offsets = [0, 16], sizes = [16, 16], strides = [1, 1]} : vector<16x256xf32> to vector<16x16xf32>
    %c16_94 = arith.constant 16 : index
    %c16_95 = arith.constant 16 : index
    %125 = vector.load %arg13[%c16_94, %c16_95] : memref<256x32xf32, #tpu.memory_space<vmem>>, vector<16x16xf32>
    tpu.vector_store %arg13[%c16_94, %c16_95], %124 {strides = array<i32>} : memref<256x32xf32, #tpu.memory_space<vmem>>, vector<16x16xf32>,
    %126 = vector.extract_strided_slice %121 {offsets = [0, 32], sizes = [16, 16], strides = [1, 1]} : vector<16x256xf32> to vector<16x16xf32>
    %c32_96 = arith.constant 32 : index
    %c16_97 = arith.constant 16 : index
    %127 = vector.load %arg13[%c32_96, %c16_97] : memref<256x32xf32, #tpu.memory_space<vmem>>, vector<16x16xf32>
    tpu.vector_store %arg13[%c32_96, %c16_97], %126 {strides = array<i32>} : memref<256x32xf32, #tpu.memory_space<vmem>>, vector<16x16xf32>,
    %128 = vector.extract_strided_slice %121 {offsets = [0, 48], sizes = [16, 16], strides = [1, 1]} : vector<16x256xf32> to vector<16x16xf32>
    %c48_98 = arith.constant 48 : index
    %c16_99 = arith.constant 16 : index
    %129 = vector.load %arg13[%c48_98, %c16_99] : memref<256x32xf32, #tpu.memory_space<vmem>>, vector<16x16xf32>
    tpu.vector_store %arg13[%c48_98, %c16_99], %128 {strides = array<i32>} : memref<256x32xf32, #tpu.memory_space<vmem>>, vector<16x16xf32>,
    %130 = vector.extract_strided_slice %121 {offsets = [0, 64], sizes = [16, 16], strides = [1, 1]} : vector<16x256xf32> to vector<16x16xf32>
    %c64_100 = arith.constant 64 : index
    %c16_101 = arith.constant 16 : index
    %131 = vector.load %arg13[%c64_100, %c16_101] : memref<256x32xf32, #tpu.memory_space<vmem>>, vector<16x16xf32>
    tpu.vector_store %arg13[%c64_100, %c16_101], %130 {strides = array<i32>} : memref<256x32xf32, #tpu.memory_space<vmem>>, vector<16x16xf32>,
    %132 = vector.extract_strided_slice %121 {offsets = [0, 80], sizes = [16, 16], strides = [1, 1]} : vector<16x256xf32> to vector<16x16xf32>
    %c80_102 = arith.constant 80 : index
    %c16_103 = arith.constant 16 : index
    %133 = vector.load %arg13[%c80_102, %c16_103] : memref<256x32xf32, #tpu.memory_space<vmem>>, vector<16x16xf32>
    tpu.vector_store %arg13[%c80_102, %c16_103], %132 {strides = array<i32>} : memref<256x32xf32, #tpu.memory_space<vmem>>, vector<16x16xf32>,
    %134 = vector.extract_strided_slice %121 {offsets = [0, 96], sizes = [16, 16], strides = [1, 1]} : vector<16x256xf32> to vector<16x16xf32>
    %c96_104 = arith.constant 96 : index
    %c16_105 = arith.constant 16 : index
    %135 = vector.load %arg13[%c96_104, %c16_105] : memref<256x32xf32, #tpu.memory_space<vmem>>, vector<16x16xf32>
    tpu.vector_store %arg13[%c96_104, %c16_105], %134 {strides = array<i32>} : memref<256x32xf32, #tpu.memory_space<vmem>>, vector<16x16xf32>,
    %136 = vector.extract_strided_slice %121 {offsets = [0, 112], sizes = [16, 16], strides = [1, 1]} : vector<16x256xf32> to vector<16x16xf32>
    %c112_106 = arith.constant 112 : index
    %c16_107 = arith.constant 16 : index
    %137 = vector.load %arg13[%c112_106, %c16_107] : memref<256x32xf32, #tpu.memory_space<vmem>>, vector<16x16xf32>
    tpu.vector_store %arg13[%c112_106, %c16_107], %136 {strides = array<i32>} : memref<256x32xf32, #tpu.memory_space<vmem>>, vector<16x16xf32>,
    %138 = vector.extract_strided_slice %121 {offsets = [0, 128], sizes = [16, 16], strides = [1, 1]} : vector<16x256xf32> to vector<16x16xf32>
    %c128_108 = arith.constant 128 : index
    %c16_109 = arith.constant 16 : index
    %139 = vector.load %arg13[%c128_108, %c16_109] : memref<256x32xf32, #tpu.memory_space<vmem>>, vector<16x16xf32>
    tpu.vector_store %arg13[%c128_108, %c16_109], %138 {strides = array<i32>} : memref<256x32xf32, #tpu.memory_space<vmem>>, vector<16x16xf32>,
    %140 = vector.extract_strided_slice %121 {offsets = [0, 144], sizes = [16, 16], strides = [1, 1]} : vector<16x256xf32> to vector<16x16xf32>
    %c144_110 = arith.constant 144 : index
    %c16_111 = arith.constant 16 : index
    %141 = vector.load %arg13[%c144_110, %c16_111] : memref<256x32xf32, #tpu.memory_space<vmem>>, vector<16x16xf32>
    tpu.vector_store %arg13[%c144_110, %c16_111], %140 {strides = array<i32>} : memref<256x32xf32, #tpu.memory_space<vmem>>, vector<16x16xf32>,
    %142 = vector.extract_strided_slice %121 {offsets = [0, 160], sizes = [16, 16], strides = [1, 1]} : vector<16x256xf32> to vector<16x16xf32>
    %c160_112 = arith.constant 160 : index
    %c16_113 = arith.constant 16 : index
    %143 = vector.load %arg13[%c160_112, %c16_113] : memref<256x32xf32, #tpu.memory_space<vmem>>, vector<16x16xf32>
    tpu.vector_store %arg13[%c160_112, %c16_113], %142 {strides = array<i32>} : memref<256x32xf32, #tpu.memory_space<vmem>>, vector<16x16xf32>,
    %144 = vector.extract_strided_slice %121 {offsets = [0, 176], sizes = [16, 16], strides = [1, 1]} : vector<16x256xf32> to vector<16x16xf32>
    %c176_114 = arith.constant 176 : index
    %c16_115 = arith.constant 16 : index
    %145 = vector.load %arg13[%c176_114, %c16_115] : memref<256x32xf32, #tpu.memory_space<vmem>>, vector<16x16xf32>
    tpu.vector_store %arg13[%c176_114, %c16_115], %144 {strides = array<i32>} : memref<256x32xf32, #tpu.memory_space<vmem>>, vector<16x16xf32>,
    %146 = vector.extract_strided_slice %121 {offsets = [0, 192], sizes = [16, 16], strides = [1, 1]} : vector<16x256xf32> to vector<16x16xf32>
    %c192_116 = arith.constant 192 : index
    %c16_117 = arith.constant 16 : index
    %147 = vector.load %arg13[%c192_116, %c16_117] : memref<256x32xf32, #tpu.memory_space<vmem>>, vector<16x16xf32>
    tpu.vector_store %arg13[%c192_116, %c16_117], %146 {strides = array<i32>} : memref<256x32xf32, #tpu.memory_space<vmem>>, vector<16x16xf32>,
    %148 = vector.extract_strided_slice %121 {offsets = [0, 208], sizes = [16, 16], strides = [1, 1]} : vector<16x256xf32> to vector<16x16xf32>
    %c208_118 = arith.constant 208 : index
    %c16_119 = arith.constant 16 : index
    %149 = vector.load %arg13[%c208_118, %c16_119] : memref<256x32xf32, #tpu.memory_space<vmem>>, vector<16x16xf32>
    tpu.vector_store %arg13[%c208_118, %c16_119], %148 {strides = array<i32>} : memref<256x32xf32, #tpu.memory_space<vmem>>, vector<16x16xf32>,
    %150 = vector.extract_strided_slice %121 {offsets = [0, 224], sizes = [16, 16], strides = [1, 1]} : vector<16x256xf32> to vector<16x16xf32>
    %c224_120 = arith.constant 224 : index
    %c16_121 = arith.constant 16 : index
    %151 = vector.load %arg13[%c224_120, %c16_121] : memref<256x32xf32, #tpu.memory_space<vmem>>, vector<16x16xf32>
    tpu.vector_store %arg13[%c224_120, %c16_121], %150 {strides = array<i32>} : memref<256x32xf32, #tpu.memory_space<vmem>>, vector<16x16xf32>,
    %152 = vector.extract_strided_slice %121 {offsets = [0, 240], sizes = [16, 16], strides = [1, 1]} : vector<16x256xf32> to vector<16x16xf32>
    %c240_122 = arith.constant 240 : index
    %c16_123 = arith.constant 16 : index
    %153 = vector.load %arg13[%c240_122, %c16_123] : memref<256x32xf32, #tpu.memory_space<vmem>>, vector<16x16xf32>
    tpu.vector_store %arg13[%c240_122, %c16_123], %152 {strides = array<i32>} : memref<256x32xf32, #tpu.memory_space<vmem>>, vector<16x16xf32>,
    %c0_124 = arith.constant 0 : index
    %c0_125 = arith.constant 0 : index
    %154 = vector.load %arg6[%c0_124, %c0_125] : memref<32x256xf32, #tpu.memory_space<vmem>>, vector<32x256xf32>
    %c0_126 = arith.constant 0 : index
    %c0_127 = arith.constant 0 : index
    %155 = vector.load %arg13[%c0_126, %c0_127] : memref<256x32xf32, #tpu.memory_space<vmem>>, vector<256x32xf32>
    %cst_128 = arith.constant dense<0.000000e+00> : vector<32x32xf32>
    %156 = tpu.matmul %154, %155, %cst_128 {dimension_numbers = #tpu.dot_dimension_numbers<[1], [0], [0], [1], [0, 0, 1, 1], [], []>} : vector<32x256xf32>, vector<256x32xf32>, vector<32x32xf32> -> vector<32x32xf32>
    %157 = vector.broadcast %1 : f32 to vector<32x32xf32>
    %158 = arith.mulf %156, %157 : vector<32x32xf32>
    %c0_129 = arith.constant 0 : index
    %c0_130 = arith.constant 0 : index
    %159 = vector.load %arg7[%c0_129, %c0_130] : memref<32x1xf32, #tpu.memory_space<vmem>>, vector<32x1xf32>
    %160 = vector.broadcast %159 : vector<32x1xf32> to vector<32x32xf32>
    %161 = arith.addf %158, %160 : vector<32x32xf32>
    %cst_131 = arith.constant 0.000000e+00 : f32
    %162 = vector.broadcast %cst_131 : f32 to vector<32x32xf32>
    %163 = arith.cmpf oge, %161, %162 : vector<32x32xf32>
    %cst_132 = arith.constant 1.000000e-01 : f32
    %164 = vector.broadcast %cst_132 : f32 to vector<32x32xf32>
    %165 = arith.mulf %164, %161 : vector<32x32xf32>
    %166 = arith.select %163, %161, %165 : vector<32x32xi1>, vector<32x32xf32>
    %c0_133 = arith.constant 0 : index
    %c0_134 = arith.constant 0 : index
    %167 = vector.load %arg8[%c0_133, %c0_134] : memref<40x32xf32, #tpu.memory_space<vmem>>, vector<40x32xf32>
    %cst_135 = arith.constant dense<0.000000e+00> : vector<40x32xf32>
    %168 = tpu.matmul %167, %166, %cst_135 {dimension_numbers = #tpu.dot_dimension_numbers<[1], [0], [0], [1], [0, 0, 1, 1], [], []>} : vector<40x32xf32>, vector<32x32xf32>, vector<40x32xf32> -> vector<40x32xf32>
    %c0_136 = arith.constant 0 : index
    %c0_137 = arith.constant 0 : index
    %169 = vector.load %arg9[%c0_136, %c0_137] : memref<40x1xf32, #tpu.memory_space<vmem>>, vector<40x1xf32>
    %170 = vector.broadcast %169 : vector<40x1xf32> to vector<40x32xf32>
    %171 = arith.addf %168, %170 : vector<40x32xf32>
    %172 = vector.extract_strided_slice %171 {offsets = [0, 0], sizes = [4, 16], strides = [1, 1]} : vector<40x32xf32> to vector<4x16xf32>
    %173 = vector.extract_strided_slice %171 {offsets = [4, 0], sizes = [4, 16], strides = [1, 1]} : vector<40x32xf32> to vector<4x16xf32>
    %174 = vector.extract_strided_slice %171 {offsets = [8, 0], sizes = [32, 16], strides = [1, 1]} : vector<40x32xf32> to vector<32x16xf32>
    %cst_138 = arith.constant dense<0.000000e+00> : vector<16x16xf32>
    %175 = tpu.matmul %172, %173, %cst_138 {dimension_numbers = #tpu.dot_dimension_numbers<[0], [0], [1], [1], [0, 1, 1, 1], [], []>} : vector<4x16xf32>, vector<4x16xf32>, vector<16x16xf32> -> vector<16x16xf32>
    %cst_139 = arith.constant dense<0xFF800000> : vector<16xf32>
    %176 = vector.multi_reduction <maximumf>, %175, %cst_139 [1] : vector<16x16xf32> to vector<16xf32>
    %177 = vector.shape_cast %176 : vector<16xf32> to vector<16x1xf32>
    %178 = vector.broadcast %177 : vector<16x1xf32> to vector<16x16xf32>
    %179 = arith.subf %175, %178 : vector<16x16xf32>
    %180 = math.exp %179 : vector<16x16xf32>
    %cst_140 = arith.constant dense<0.000000e+00> : vector<16xf32>
    %181 = vector.multi_reduction <add>, %180, %cst_140 [1] : vector<16x16xf32> to vector<16xf32>
    %182 = vector.shape_cast %181 : vector<16xf32> to vector<16x1xf32>
    %183 = tpu.reciprocal %182 {approx = true} : vector<16x1xf32> -> vector<16x1xf32>
    %184 = vector.broadcast %183 : vector<16x1xf32> to vector<16x16xf32>
    %185 = arith.mulf %180, %184 : vector<16x16xf32>
    %cst_141 = arith.constant dense<0.000000e+00> : vector<32x16xf32>
    %186 = tpu.matmul %174, %185, %cst_141 {dimension_numbers = #tpu.dot_dimension_numbers<[1], [1], [0], [0], [0, 0, 1, 0], [], []>} : vector<32x16xf32>, vector<16x16xf32>, vector<32x16xf32> -> vector<32x16xf32>
    %187 = vector.broadcast %2 : f32 to vector<32x16xf32>
    %188 = arith.mulf %187, %186 : vector<32x16xf32>
    %189 = vector.extract_strided_slice %166 {offsets = [0, 0], sizes = [32, 16], strides = [1, 1]} : vector<32x32xf32> to vector<32x16xf32>
    %190 = arith.addf %188, %189 : vector<32x16xf32>
    %c0_142 = arith.constant 0 : index
    %c0_143 = arith.constant 0 : index
    %191 = vector.load %arg10[%c0_142, %c0_143] : memref<32x16xf32, #tpu.memory_space<vmem>>, vector<32x16xf32>
    %192 = arith.mulf %190, %191 : vector<32x16xf32>
    %cst_144 = arith.constant dense<0.000000e+00> : vector<16xf32>
    %193 = vector.multi_reduction <add>, %192, %cst_144 [0] : vector<32x16xf32> to vector<16xf32>
    %194 = vector.shape_cast %193 : vector<16xf32> to vector<1x16xf32>
    %c0_145 = arith.constant 0 : index
    %c0_146 = arith.constant 0 : index
    %195 = vector.load %arg11[%c0_145, %c0_146] : memref<1x32xf32, #tpu.memory_space<vmem>>, vector<1x16xf32>
    tpu.vector_store %arg11[%c0_145, %c0_146], %194 {strides = array<i32>} : memref<1x32xf32, #tpu.memory_space<vmem>>, vector<1x16xf32>,
    %196 = vector.extract_strided_slice %171 {offsets = [0, 16], sizes = [4, 16], strides = [1, 1]} : vector<40x32xf32> to vector<4x16xf32>
    %197 = vector.extract_strided_slice %171 {offsets = [4, 16], sizes = [4, 16], strides = [1, 1]} : vector<40x32xf32> to vector<4x16xf32>
    %198 = vector.extract_strided_slice %171 {offsets = [8, 16], sizes = [32, 16], strides = [1, 1]} : vector<40x32xf32> to vector<32x16xf32>
    %cst_147 = arith.constant dense<0.000000e+00> : vector<16x16xf32>
    %199 = tpu.matmul %196, %197, %cst_147 {dimension_numbers = #tpu.dot_dimension_numbers<[0], [0], [1], [1], [0, 1, 1, 1], [], []>} : vector<4x16xf32>, vector<4x16xf32>, vector<16x16xf32> -> vector<16x16xf32>
    %cst_148 = arith.constant dense<0xFF800000> : vector<16xf32>
    %200 = vector.multi_reduction <maximumf>, %199, %cst_148 [1] : vector<16x16xf32> to vector<16xf32>
    %201 = vector.shape_cast %200 : vector<16xf32> to vector<16x1xf32>
    %202 = vector.broadcast %201 : vector<16x1xf32> to vector<16x16xf32>
    %203 = arith.subf %199, %202 : vector<16x16xf32>
    %204 = math.exp %203 : vector<16x16xf32>
    %cst_149 = arith.constant dense<0.000000e+00> : vector<16xf32>
    %205 = vector.multi_reduction <add>, %204, %cst_149 [1] : vector<16x16xf32> to vector<16xf32>
    %206 = vector.shape_cast %205 : vector<16xf32> to vector<16x1xf32>
    %207 = tpu.reciprocal %206 {approx = true} : vector<16x1xf32> -> vector<16x1xf32>
    %208 = vector.broadcast %207 : vector<16x1xf32> to vector<16x16xf32>
    %209 = arith.mulf %204, %208 : vector<16x16xf32>
    %cst_150 = arith.constant dense<0.000000e+00> : vector<32x16xf32>
    %210 = tpu.matmul %198, %209, %cst_150 {dimension_numbers = #tpu.dot_dimension_numbers<[1], [1], [0], [0], [0, 0, 1, 0], [], []>} : vector<32x16xf32>, vector<16x16xf32>, vector<32x16xf32> -> vector<32x16xf32>
    %211 = vector.broadcast %2 : f32 to vector<32x16xf32>
    %212 = arith.mulf %211, %210 : vector<32x16xf32>
    %213 = vector.extract_strided_slice %166 {offsets = [0, 16], sizes = [32, 16], strides = [1, 1]} : vector<32x32xf32> to vector<32x16xf32>
    %214 = arith.addf %212, %213 : vector<32x16xf32>
    %c0_151 = arith.constant 0 : index
    %c0_152 = arith.constant 0 : index
    %215 = vector.load %arg10[%c0_151, %c0_152] : memref<32x16xf32, #tpu.memory_space<vmem>>, vector<32x16xf32>
    %216 = arith.mulf %214, %215 : vector<32x16xf32>
    %cst_153 = arith.constant dense<0.000000e+00> : vector<16xf32>
    %217 = vector.multi_reduction <add>, %216, %cst_153 [0] : vector<32x16xf32> to vector<16xf32>
    %218 = vector.shape_cast %217 : vector<16xf32> to vector<1x16xf32>
    %c0_154 = arith.constant 0 : index
    %c16_155 = arith.constant 16 : index
    %219 = vector.load %arg11[%c0_154, %c16_155] : memref<1x32xf32, #tpu.memory_space<vmem>>, vector<1x16xf32>
    tpu.vector_store %arg11[%c0_154, %c16_155], %218 {strides = array<i32>} : memref<1x32xf32, #tpu.memory_space<vmem>>, vector<1x16xf32>,
    return
  }
}

</mosaic_0001>

<bundles_post_ra>
// kernel: discriminator_forward.1
= control target key start
LH: loop header
LB: loop body
LE: loop exit
PB: predicated region body
PF: predicated region fallthrough
CT: control target
= control target key end

     0   :  { %16 = vsyncpa [#allocation6], 0  ;;  %s3678_s0 = inlined_call_operand.vmem [shape: f32[3], index: 0, kind: input, shape index: {}]   ;;  %s3679_s1 = inlined_call_operand.vmem [shape: bf16[16,256], index: 1, kind: input, shape index: {}]   ;;  %s3680_s2 = inlined_call_operand.hbm [shape: bf16[256,1024], index: 2, kind: input, shape index: {}]   ;;  %s3681_s3 = inlined_call_operand.vmem [shape: f32[16,128], index: 3, kind: input, shape index: {}]   ;;  %s3682_s4 = inlined_call_operand.vmem [shape: f32[16,1], index: 4, kind: input, shape index: {}]   ;;  %s3683_s5 = inlined_call_operand.vmem [shape: bf16[64,256], index: 5, kind: input, shape index: {}]   ;;  %s3684_s6 = inlined_call_operand.vmem [shape: f32[32,256], index: 6, kind: input, shape index: {}]   ;;  %s3685_s7 = inlined_call_operand.vmem [shape: f32[32,1], index: 7, kind: input, shape index: {}]   ;;  %s3686_s8 = inlined_call_operand.vmem [shape: f32[40,32], index: 8, kind: input, shape index: {}]   ;;  %s3687_s9 = inlined_call_operand.vmem [shape: f32[40,1], index: 9, kind: input, shape index: {}]   ;;  %s3688_s10 = inlined_call_operand.vmem [shape: f32[32,16], index: 10, kind: input, shape index: {}]   ;;  %s3689_s11 = inlined_call_operand.vmem [shape: f32[1,32], index: 11, kind: output, shape index: {}]  }
   0x1   :  { %s23_s19 = sshll.u32 %s3678_s0, 4  ;;  %s24_s19 = int_to_ptr.vmem [resolvable:$true] %s23_s19 }
   0x2   :  { %17 = vsyncpa [#allocation5], 0  ;;  %s33_s22 = sshll.u32 %s3680_s2, 4  ;;  %s3068_s23 = smov [#allocation4]   ;;  %s34_s22 = int_to_ptr.hbm [resolvable:$true] %s33_s22 }
   0x3   :  { %26 = dma.vmem_to_smem %s24_s19, 16, %s3068_s23, [#allocation6]  }
   0x4   :  { %s3069_s24 = smov [#allocation7]   ;;  %s3070_s26 = smov 512  }
   0x5   :  { %s35_s25 = sshll.u32 %s3069_s24, 4  ;;  %s3071_s27 = smov 32   ;;  %s36_s25 = int_to_ptr.vmem [resolvable:$true] %s35_s25 }
   0x6   :  { %41 = dma.hbm_to_vmem [thread:$0]  %s34_s22, 16384, %s36_s25, [#allocation5], %s3070_s26, %s3070_s26, %s3071_s27  }
   0x7   :  { %3064 = dma.done.wait [#allocation6], 16  }
   0x8   :  { %3065 = vsyncadd [#allocation6], 4294967280 }
   0x9   :  { %3066 = dma.done.wait [#allocation5], 16384  }
   0xa   :  { %3067 = vsyncadd [#allocation5], 4294950912 }
   0xb   :  { %66 = sfence }
   0xc   :  { %v2474_v0 = vld [vmem:[#allocation7 + $0x1c0] sm:$0xf]  ;;  %v2909_v5 = vld [vmem:[#allocation7 + $0x1c4] sm:$0xf]  ;;  %vm1075_vm0 = vcmask 523264   ;;  %vm1128_vm1 = vcmask 1048064  }
   0xd   :  { %v2913_v1 = vld [vmem:[#allocation7 + $0x1dc] sm:$0xf0]  ;;  %v2476_v6 = vld [vmem:[#allocation7 + $0x1e0] sm:$0xf0]  ;;  %s3302_s30 = sld [smem:[#allocation4]]  ;;  %vm1323_vm4 = vcmask 130048  }
   0xe   :  { %v2730_v2 = vld [vmem:[#allocation7 + $0x3c0] sm:$0xf]  ;;  %v2475_v3 = vor.u32 %v2913_v1, %v2474_v0  ;;  %v2479_v8 = vor.u32 %v2909_v5, %v2476_v6  ;;  %v2973_v9 = vld [vmem:[#allocation7 + $0x3c4] sm:$0xf]  ;;  %s3075_s21 = smov 16   ;;  %s3076_s22 = smov 96  }
   0xf   :  { %v2977_v4 = vld [vmem:[#allocation7 + $0x3dc] sm:$0xf0]  ;;  %v2732_v10 = vld [vmem:[#allocation7 + $0x3e0] sm:$0xf0]  ;;  %s3077_s23 = smov 80   ;;  %s3078_s24 = smov 112  }
  0x10   :  { %v2731_v7 = vor.u32 %v2977_v4, %v2730_v2  ;;  %v2442_v11 = vld [vmem:[#allocation7 + $0x180] sm:$0xf]  ;;  %851 = vmatpush.bf16.msra.mxu0 %v2475_v3  ;;  %v2735_v12 = vor.u32 %v2973_v9, %v2732_v10  ;;  %879 = vmatpush.bf16.msra.mxu2 %v2479_v8  ;;  %v2901_v18 = vld [vmem:[#allocation7 + $0x184] sm:$0xf]  ;;  %vm1533_vm5 = vcmask 261248   ;;  %s2238_s25 = sld [smem:[#allocation4 + $0x1]] }
  0x11   :  { %v2905_v13 = vld [vmem:[#allocation7 + $0x19c] sm:$0xf0]  ;;  %v2444_v19 = vld [vmem:[#allocation7 + $0x1a0] sm:$0xf0]  ;;  %vm1824_vm10 = vcmask 261120   ;;  %vm1913_vm11 = vcmask 1043456  }
  0x12   :  { %v2698_v14 = vld [vmem:[#allocation7 + $0x380] sm:$0xf]  ;;  %865 = vmatpush.bf16.msra.mxu1 %v2731_v7  ;;  %v2443_v16 = vor.u32 %v2905_v13, %v2442_v11  ;;  %v2965_v20 = vld [vmem:[#allocation7 + $0x384] sm:$0xf]  ;;  %893 = vmatpush.bf16.msra.mxu3 %v2735_v12  ;;  %v2447_v21 = vor.u32 %v2901_v18, %v2444_v19  ;;  %vm1906_vm12 = vcmask 31744   ;;  %vm2038_vm13 = vcmask 122880  }
  0x13   :  { %v2969_v15 = vld [vmem:[#allocation7 + $0x39c] sm:$0xf0]  ;;  %v2700_v22 = vld [vmem:[#allocation7 + $0x3a0] sm:$0xf0]  ;;  %vm2230_vm14 = vcmask 254080  }
  0x14   :  { %v2699_v17 = vor.u32 %v2969_v15, %v2698_v14  ;;  %v2410_v23 = vld [vmem:[#allocation7 + $0x140] sm:$0xf]  ;;  %v2703_v25 = vor.u32 %v2965_v20, %v2700_v22  ;;  %v2893_v28 = vld [vmem:[#allocation7 + $0x144] sm:$0xf]  ;;  %852 = vmatpush.bf16.msra.mxu0 %v2443_v16  ;;  %880 = vmatpush.bf16.msra.mxu2 %v2447_v21 }
  0x15   :  { %v2897_v24 = vld [vmem:[#allocation7 + $0x15c] sm:$0xf0]  ;;  %v2412_v30 = vld [vmem:[#allocation7 + $0x160] sm:$0xf0] }
  0x16   :  { %v2666_v26 = vld [vmem:[#allocation7 + $0x340] sm:$0xf]  ;;  %v2411_v29 = vor.u32 %v2897_v24, %v2410_v23  ;;  %v2957_v31 = vld [vmem:[#allocation7 + $0x344] sm:$0xf]  ;;  %866 = vmatpush.bf16.msra.mxu1 %v2699_v17  ;;  %v2415_v34 = vor.u32 %v2893_v28, %v2412_v30  ;;  %894 = vmatpush.bf16.msra.mxu3 %v2703_v25  ;;  %v2482_v28 = vld [vmem:[#allocation7 + $0x1c8] sm:$0xf] }
  0x17   :  { %v2961_v27 = vld [vmem:[#allocation7 + $0x35c] sm:$0xf0]  ;;  %v2668_v32 = vld [vmem:[#allocation7 + $0x360] sm:$0xf0]  ;;  %v2738_v30 = vld [vmem:[#allocation7 + $0x3c8] sm:$0xf] }
  0x18   :  { %v2667_v33 = vor.u32 %v2961_v27, %v2666_v26  ;;  %v2378_v35 = vld [vmem:[#allocation7 + $0x100] sm:$0xf]  ;;  %v2671_v38 = vor.u32 %v2957_v31, %v2668_v32  ;;  %v2885_v40 = vld [vmem:[#allocation7 + $0x104] sm:$0xf]  ;;  %853 = vmatpush.bf16.msra.mxu0 %v2411_v29  ;;  %881 = vmatpush.bf16.msra.mxu2 %v2415_v34  ;;  %v2914_v29 = vld [vmem:[#allocation7 + $0x1e4] sm:$0xf0] }
  0x19   :  { %v2889_v36 = vld [vmem:[#allocation7 + $0x11c] sm:$0xf0]  ;;  %v2380_v41 = vld [vmem:[#allocation7 + $0x120] sm:$0xf0]  ;;  %v2978_v32 = vld [vmem:[#allocation7 + $0x3e4] sm:$0xf0] }
  0x1a   :  { %v2634_v37 = vld [vmem:[#allocation7 + $0x300] sm:$0xf]  ;;  %v2949_v42 = vld [vmem:[#allocation7 + $0x304] sm:$0xf]  ;;  %v2379_v44 = vor.u32 %v2889_v36, %v2378_v35  ;;  %867 = vmatpush.bf16.msra.mxu1 %v2667_v33  ;;  %v2383_v46 = vor.u32 %v2885_v40, %v2380_v41  ;;  %895 = vmatpush.bf16.msra.mxu3 %v2671_v38  ;;  %v2910_v33 = vld [vmem:[#allocation7 + $0x1cc] sm:$0xf]  ;;  %v2483_v40 = vor.u32 %v2914_v29, %v2482_v28 }
  0x1b   :  { %v2953_v39 = vld [vmem:[#allocation7 + $0x31c] sm:$0xf0]  ;;  %v2636_v43 = vld [vmem:[#allocation7 + $0x320] sm:$0xf0]  ;;  %v2484_v34 = vld [vmem:[#allocation7 + $0x1e8] sm:$0xf0]  ;;  %v2739_v41 = vor.u32 %v2978_v32, %v2738_v30 }
  0x1c   :  { %v2635_v45 = vor.u32 %v2953_v39, %v2634_v37  ;;  %v2346_v47 = vld [vmem:[#allocation7 + $0xc0] sm:$0xf]  ;;  %v2639_v50 = vor.u32 %v2949_v42, %v2636_v43  ;;  %v2877_v52 = vld [vmem:[#allocation7 + $0xc4] sm:$0xf]  ;;  %854 = vmatpush.bf16.msra.mxu0 %v2379_v44  ;;  %882 = vmatpush.bf16.msra.mxu2 %v2383_v46  ;;  %v2974_v37 = vld [vmem:[#allocation7 + $0x3cc] sm:$0xf]  ;;  %v2487_v42 = vor.u32 %v2910_v33, %v2484_v34 }
  0x1d   :  { %v2881_v48 = vld [vmem:[#allocation7 + $0xdc] sm:$0xf0]  ;;  %v2348_v53 = vld [vmem:[#allocation7 + $0xe0] sm:$0xf0]  ;;  %v2740_v38 = vld [vmem:[#allocation7 + $0x3e8] sm:$0xf0] }
  0x1e   :  { %v2602_v49 = vld [vmem:[#allocation7 + $0x2c0] sm:$0xf]  ;;  %v2941_v54 = vld [vmem:[#allocation7 + $0x2c4] sm:$0xf]  ;;  %v2347_v56 = vor.u32 %v2881_v48, %v2346_v47  ;;  %868 = vmatpush.bf16.msra.mxu1 %v2635_v45  ;;  %v2351_v58 = vor.u32 %v2877_v52, %v2348_v53  ;;  %896 = vmatpush.bf16.msra.mxu3 %v2639_v50  ;;  %v2450_v43 = vld [vmem:[#allocation7 + $0x188] sm:$0xf]  ;;  %v2743_v46 = vor.u32 %v2974_v37, %v2740_v38 }
  0x1f   :  { %v2945_v51 = vld [vmem:[#allocation7 + $0x2dc] sm:$0xf0]  ;;  %v2604_v55 = vld [vmem:[#allocation7 + $0x2e0] sm:$0xf0]  ;;  %v2906_v44 = vld [vmem:[#allocation7 + $0x1a4] sm:$0xf0] }
  0x20   :  { %v2603_v57 = vor.u32 %v2945_v51, %v2602_v49  ;;  %v2314_v59 = vld [vmem:[#allocation7 + $0x80] sm:$0xf]  ;;  %v2607_v62 = vor.u32 %v2941_v54, %v2604_v55  ;;  %v2869_v0 = vld [vmem:[#allocation7 + $0x84] sm:$0xf]  ;;  %855 = vmatpush.bf16.msra.mxu0 %v2347_v56  ;;  %883 = vmatpush.bf16.msra.mxu2 %v2351_v58  ;;  %v2706_v45 = vld [vmem:[#allocation7 + $0x388] sm:$0xf]  ;;  %v2451_v52 = vor.u32 %v2906_v44, %v2450_v43 }
  0x21   :  { %v2873_v60 = vld [vmem:[#allocation7 + $0x9c] sm:$0xf0]  ;;  %v2316_v1 = vld [vmem:[#allocation7 + $0xa0] sm:$0xf0]  ;;  %v2970_v47 = vld [vmem:[#allocation7 + $0x3a4] sm:$0xf0] }
  0x22   :  { %v2570_v61 = vld [vmem:[#allocation7 + $0x280] sm:$0xf]  ;;  %v2933_v2 = vld [vmem:[#allocation7 + $0x284] sm:$0xf]  ;;  %v2315_v4 = vor.u32 %v2873_v60, %v2314_v59  ;;  %869 = vmatpush.bf16.msra.mxu1 %v2603_v57  ;;  %v2319_v6 = vor.u32 %v2869_v0, %v2316_v1  ;;  %897 = vmatpush.bf16.msra.mxu3 %v2607_v62  ;;  %v2902_v48 = vld [vmem:[#allocation7 + $0x18c] sm:$0xf]  ;;  %v2707_v53 = vor.u32 %v2970_v47, %v2706_v45 }
  0x23   :  { %v2937_v63 = vld [vmem:[#allocation7 + $0x29c] sm:$0xf0]  ;;  %v2572_v3 = vld [vmem:[#allocation7 + $0x2a0] sm:$0xf0]  ;;  %v2452_v49 = vld [vmem:[#allocation7 + $0x1a8] sm:$0xf0] }
  0x24   :  { %v2571_v5 = vor.u32 %v2937_v63, %v2570_v61  ;;  %v2282_v7 = vld [vmem:[#allocation7 + $0x40] sm:$0xf]  ;;  %v2575_v10 = vor.u32 %v2933_v2, %v2572_v3  ;;  %v2861_v12 = vld [vmem:[#allocation7 + $0x44] sm:$0xf]  ;;  %856 = vmatpush.bf16.msra.mxu0 %v2315_v4  ;;  %884 = vmatpush.bf16.msra.mxu2 %v2319_v6  ;;  %v2966_v50 = vld [vmem:[#allocation7 + $0x38c] sm:$0xf]  ;;  %v2455_v54 = vor.u32 %v2902_v48, %v2452_v49 }
  0x25   :  { %v2865_v8 = vld [vmem:[#allocation7 + $0x5c] sm:$0xf0]  ;;  %v2284_v13 = vld [vmem:[#allocation7 + $0x60] sm:$0xf0]  ;;  %v2708_v51 = vld [vmem:[#allocation7 + $0x3a8] sm:$0xf0] }
  0x26   :  { %v2538_v9 = vld [vmem:[#allocation7 + $0x240] sm:$0xf]  ;;  %v2925_v14 = vld [vmem:[#allocation7 + $0x244] sm:$0xf]  ;;  %v2283_v16 = vor.u32 %v2865_v8, %v2282_v7  ;;  %870 = vmatpush.bf16.msra.mxu1 %v2571_v5  ;;  %v2287_v20 = vor.u32 %v2861_v12, %v2284_v13  ;;  %898 = vmatpush.bf16.msra.mxu3 %v2575_v10  ;;  %v2418_v55 = vld [vmem:[#allocation7 + $0x148] sm:$0xf]  ;;  %v2711_v58 = vor.u32 %v2966_v50, %v2708_v51 }
  0x27   :  { %v2929_v11 = vld [vmem:[#allocation7 + $0x25c] sm:$0xf0]  ;;  %v2540_v15 = vld [vmem:[#allocation7 + $0x260] sm:$0xf0]  ;;  %v2898_v56 = vld [vmem:[#allocation7 + $0x164] sm:$0xf0] }
  0x28   :  { %v2250_v17 = vld [vmem:[#allocation7] sm:$0xf]  ;;  %v2539_v19 = vor.u32 %v2929_v11, %v2538_v9  ;;  %v2853_v23 = vld [vmem:[#allocation7 + $0x4] sm:$0xf]  ;;  %v2543_v24 = vor.u32 %v2925_v14, %v2540_v15  ;;  %857 = vmatpush.bf16.msra.mxu0 %v2283_v16  ;;  %885 = vmatpush.bf16.msra.mxu2 %v2287_v20  ;;  %v2674_v57 = vld [vmem:[#allocation7 + $0x348] sm:$0xf]  ;;  %v2419_v1 = vor.u32 %v2898_v56, %v2418_v55 }
  0x29   :  { %v2857_v18 = vld [vmem:[#allocation7 + $0x1c] sm:$0xf0]  ;;  %v2252_v25 = vld [vmem:[#allocation7 + $0x20] sm:$0xf0]  ;;  %v2962_v59 = vld [vmem:[#allocation7 + $0x364] sm:$0xf0] }
  0x2a   :  { %v2506_v21 = vld [vmem:[#allocation7 + $0x200] sm:$0xf]  ;;  %v2917_v26 = vld [vmem:[#allocation7 + $0x204] sm:$0xf]  ;;  %v2251_v31 = vor.u32 %v2857_v18, %v2250_v17  ;;  %871 = vmatpush.bf16.msra.mxu1 %v2539_v19  ;;  %v2255_v36 = vor.u32 %v2853_v23, %v2252_v25  ;;  %899 = vmatpush.bf16.msra.mxu3 %v2543_v24  ;;  %v2894_v60 = vld [vmem:[#allocation7 + $0x14c] sm:$0xf]  ;;  %v2675_v5 = vor.u32 %v2962_v59, %v2674_v57 }
  0x2b   :  { %v2921_v22 = vld [vmem:[#allocation7 + $0x21c] sm:$0xf0]  ;;  %v2508_v27 = vld [vmem:[#allocation7 + $0x220] sm:$0xf0]  ;;  %v2420_v61 = vld [vmem:[#allocation7 + $0x168] sm:$0xf0] }
  0x2c   :  { %v2507_v35 = vor.u32 %v2921_v22, %v2506_v21  ;;  %v2511_v39 = vor.u32 %v2917_v26, %v2508_v27  ;;  %858 = vmatpush.bf16.msra.mxu0 %v2251_v31  ;;  %886 = vmatpush.bf16.msra.mxu2 %v2255_v36  ;;  %v2958_v62 = vld [vmem:[#allocation7 + $0x34c] sm:$0xf]  ;;  %v2386_v0 = vld [vmem:[#allocation7 + $0x108] sm:$0xf]  ;;  %v2242_v3 = vld [vmem:[%s3679_s1] sm:$0xf]  ;;  %v2423_v6 = vor.u32 %v2894_v60, %v2420_v61 }
  0x2d   :  { %v2676_v63 = vld [vmem:[#allocation7 + $0x368] sm:$0xf0]  ;;  %v2890_v2 = vld [vmem:[#allocation7 + $0x124] sm:$0xf0]  ;;  %v2851_v9 = vld [vmem:[%s3679_s1 + $0x4] sm:$0xf] }
  0x2e   :  { %872 = vmatpush.bf16.msra.mxu1 %v2507_v35  ;;  %900 = vmatpush.bf16.msra.mxu3 %v2511_v39  ;;  %v2852_v4 = vld [vmem:[%s3679_s1 + $0x4] sm:$0xf0]  ;;  %v2244_v10 = vld [vmem:[%s3679_s1 + $0x8] sm:$0xf0]  ;;  %v2679_v11 = vor.u32 %v2958_v62, %v2676_v63  ;;  %v2387_v18 = vor.u32 %v2890_v2, %v2386_v0  ;;  %v2490_v2 = vld [vmem:[#allocation7 + $0x1d0] sm:$0xf] }
  0x2f   :  { %v2642_v7 = vld [vmem:[#allocation7 + $0x308] sm:$0xf]  ;;  %v3152_v8 = vor.u32 %v2852_v4, %v2242_v3  ;;  %v2886_v13 = vld [vmem:[#allocation7 + $0x10c] sm:$0xf]  ;;  %v3160_v15 = vor.u32 %v2851_v9, %v2244_v10  ;;  %v2915_v3 = vld [vmem:[#allocation7 + $0x1ec] sm:$0xf0] }
  0x30   :  { %907 = vmatpush.bf16.msrb.mxu0 %v2483_v40  ;;  %935 = vmatpush.bf16.msrb.mxu2 %v2487_v42  ;;  %v2954_v12 = vld [vmem:[#allocation7 + $0x324] sm:$0xf0]  ;;  %v2388_v14 = vld [vmem:[#allocation7 + $0x128] sm:$0xf0]  ;;  %v2746_v4 = vld [vmem:[#allocation7 + $0x3d0] sm:$0xf] }
  0x31   :  { %v2950_v16 = vld [vmem:[#allocation7 + $0x30c] sm:$0xf]  ;;  %887 = vmatmul.bf16.vlgmr.msra.gmra.mxu2 %v3152_v8  ;;  %859 = vmatmul.bf16.vlgmr.msra.gmra.mxu0 %v3152_v8  ;;  %v2643_v19 = vor.u32 %v2954_v12, %v2642_v7  ;;  %v2391_v20 = vor.u32 %v2886_v13, %v2388_v14  ;;  %v2354_v21 = vld [vmem:[#allocation7 + $0xc8] sm:$0xf]  ;;  %v2911_v7 = vld [vmem:[#allocation7 + $0x1d4] sm:$0xf] }
  0x32   :  { %921 = vmatpush.bf16.msrb.mxu1 %v2739_v41  ;;  %949 = vmatpush.bf16.msrb.mxu3 %v2743_v46  ;;  %v2644_v17 = vld [vmem:[#allocation7 + $0x328] sm:$0xf0]  ;;  %v2882_v22 = vld [vmem:[#allocation7 + $0xe4] sm:$0xf0]  ;;  %v2492_v9 = vld [vmem:[#allocation7 + $0x1f0] sm:$0xf0] }
  0x33   :  { %901 = vmatmul.bf16.vlgmr.msra.gmra.mxu3 %v3160_v15  ;;  %v2610_v23 = vld [vmem:[#allocation7 + $0x2c8] sm:$0xf]  ;;  %v2647_v24 = vor.u32 %v2950_v16, %v2644_v17  ;;  %v2878_v26 = vld [vmem:[#allocation7 + $0xcc] sm:$0xf]  ;;  %873 = vmatmul.bf16.vlgmr.msra.gmra.mxu1 %v3160_v15  ;;  %v2355_v30 = vor.u32 %v2882_v22, %v2354_v21  ;;  %v2975_v12 = vld [vmem:[#allocation7 + $0x3d4] sm:$0xf]  ;;  %v2491_v16 = vor.u32 %v2915_v3, %v2490_v2 }
  0x34   :  { %908 = vmatpush.bf16.msrb.mxu0 %v2451_v52  ;;  %936 = vmatpush.bf16.msrb.mxu2 %v2455_v54  ;;  %v2946_v25 = vld [vmem:[#allocation7 + $0x2e4] sm:$0xf0]  ;;  %v2356_v27 = vld [vmem:[#allocation7 + $0xe8] sm:$0xf0]  ;;  %v2748_v13 = vld [vmem:[#allocation7 + $0x3f0] sm:$0xf0] }
  0x35   :  { %v2942_v28 = vld [vmem:[#allocation7 + $0x2cc] sm:$0xf]  ;;  %v2611_v31 = vor.u32 %v2946_v25, %v2610_v23  ;;  %v2359_v32 = vor.u32 %v2878_v26, %v2356_v27  ;;  %v2322_v33 = vld [vmem:[#allocation7 + $0x88] sm:$0xf]  ;;  %v2714_v21 = vld [vmem:[#allocation7 + $0x390] sm:$0xf]  ;;  %v2751_v22 = vor.u32 %v2975_v12, %v2748_v13 }
  0x36   :  { %922 = vmatpush.bf16.msrb.mxu1 %v2707_v53  ;;  %950 = vmatpush.bf16.msrb.mxu3 %v2711_v58  ;;  %v2612_v29 = vld [vmem:[#allocation7 + $0x2e8] sm:$0xf0]  ;;  %v2874_v34 = vld [vmem:[#allocation7 + $0xa4] sm:$0xf0]  ;;  %v2971_v23 = vld [vmem:[#allocation7 + $0x3ac] sm:$0xf0] }
  0x37   :  { %v2578_v35 = vld [vmem:[#allocation7 + $0x288] sm:$0xf]  ;;  %v2615_v36 = vor.u32 %v2942_v28, %v2612_v29  ;;  %v2870_v38 = vld [vmem:[#allocation7 + $0x8c] sm:$0xf]  ;;  %v2323_v42 = vor.u32 %v2874_v34, %v2322_v33  ;;  %v2460_v25 = vld [vmem:[#allocation7 + $0x1b0] sm:$0xf0]  ;;  %v2715_v29 = vor.u32 %v2971_v23, %v2714_v21 }
  0x38   :  { %909 = vmatpush.bf16.msrb.mxu0 %v2419_v1  ;;  %937 = vmatpush.bf16.msrb.mxu2 %v2423_v6  ;;  %v2938_v37 = vld [vmem:[#allocation7 + $0x2a4] sm:$0xf0]  ;;  %v2324_v39 = vld [vmem:[#allocation7 + $0xa8] sm:$0xf0]  ;;  %v2979_v6 = vld [vmem:[#allocation7 + $0x3ec] sm:$0xf0] }
  0x39   :  { %v2934_v40 = vld [vmem:[#allocation7 + $0x28c] sm:$0xf]  ;;  %v2579_v43 = vor.u32 %v2938_v37, %v2578_v35  ;;  %v2327_v44 = vor.u32 %v2870_v38, %v2324_v39  ;;  %v2290_v45 = vld [vmem:[#allocation7 + $0x48] sm:$0xf]  ;;  %v2747_v17 = vor.u32 %v2979_v6, %v2746_v4  ;;  %v2967_v26 = vld [vmem:[#allocation7 + $0x394] sm:$0xf] }
  0x3a   :  { %923 = vmatpush.bf16.msrb.mxu1 %v2675_v5  ;;  %951 = vmatpush.bf16.msrb.mxu3 %v2679_v11  ;;  %v2580_v41 = vld [vmem:[#allocation7 + $0x2a8] sm:$0xf0]  ;;  %v2866_v46 = vld [vmem:[#allocation7 + $0x64] sm:$0xf0]  ;;  %v2716_v27 = vld [vmem:[#allocation7 + $0x3b0] sm:$0xf0] }
  0x3b   :  { %v2546_v47 = vld [vmem:[#allocation7 + $0x248] sm:$0xf]  ;;  %v2583_v48 = vor.u32 %v2934_v40, %v2580_v41  ;;  %v2862_v50 = vld [vmem:[#allocation7 + $0x4c] sm:$0xf]  ;;  %v2291_v54 = vor.u32 %v2866_v46, %v2290_v45  ;;  %v2682_v33 = vld [vmem:[#allocation7 + $0x350] sm:$0xf]  ;;  %v2719_v34 = vor.u32 %v2967_v26, %v2716_v27 }
  0x3c   :  { %910 = vmatpush.bf16.msrb.mxu0 %v2387_v18  ;;  %938 = vmatpush.bf16.msrb.mxu2 %v2391_v20  ;;  %v2930_v49 = vld [vmem:[#allocation7 + $0x264] sm:$0xf0]  ;;  %v2292_v51 = vld [vmem:[#allocation7 + $0x68] sm:$0xf0]  ;;  %v2495_v18 = vor.u32 %v2911_v7, %v2492_v9  ;;  %v2907_v20 = vld [vmem:[#allocation7 + $0x1ac] sm:$0xf0] }
  0x3d   :  { %v2926_v52 = vld [vmem:[#allocation7 + $0x24c] sm:$0xf]  ;;  %v2258_v55 = vld [vmem:[#allocation7 + $0x8] sm:$0xf]  ;;  %v2547_v57 = vor.u32 %v2930_v49, %v2546_v47  ;;  %v2295_v58 = vor.u32 %v2862_v50, %v2292_v51  ;;  %v2963_v35 = vld [vmem:[#allocation7 + $0x36c] sm:$0xf0] }
  0x3e   :  { %924 = vmatpush.bf16.msrb.mxu1 %v2643_v19  ;;  %952 = vmatpush.bf16.msrb.mxu3 %v2647_v24  ;;  %v2548_v53 = vld [vmem:[#allocation7 + $0x268] sm:$0xf0]  ;;  %v2858_v56 = vld [vmem:[#allocation7 + $0x24] sm:$0xf0]  ;;  %v2458_v19 = vld [vmem:[#allocation7 + $0x190] sm:$0xf]  ;;  %v2683_v41 = vor.u32 %v2963_v35, %v2682_v33 }
  0x3f   :  { %v2514_v59 = vld [vmem:[#allocation7 + $0x208] sm:$0xf]  ;;  %v2854_v61 = vld [vmem:[#allocation7 + $0xc] sm:$0xf]  ;;  %v2551_v62 = vor.u32 %v2926_v52, %v2548_v53  ;;  %v2259_v5 = vor.u32 %v2858_v56, %v2258_v55  ;;  %v2903_v24 = vld [vmem:[#allocation7 + $0x194] sm:$0xf]  ;;  %v2459_v28 = vor.u32 %v2907_v20, %v2458_v19 }
  0x40   :  { %911 = vmatpush.bf16.msrb.mxu0 %v2355_v30  ;;  %939 = vmatpush.bf16.msrb.mxu2 %v2359_v32  ;;  %v2922_v60 = vld [vmem:[#allocation7 + $0x224] sm:$0xf0]  ;;  %v2260_v63 = vld [vmem:[#allocation7 + $0x28] sm:$0xf0]  ;;  %v2463_v30 = vor.u32 %v2903_v24, %v2460_v25  ;;  %v2899_v32 = vld [vmem:[#allocation7 + $0x16c] sm:$0xf0] }
  0x41   :  { %v2918_v0 = vld [vmem:[#allocation7 + $0x20c] sm:$0xf]  ;;  %v2515_v10 = vor.u32 %v2922_v60, %v2514_v59  ;;  %v2263_v11 = vor.u32 %v2854_v61, %v2260_v63  ;;  %v2428_v37 = vld [vmem:[#allocation7 + $0x170] sm:$0xf0]  ;;  %v2650_v45 = vld [vmem:[#allocation7 + $0x310] sm:$0xf] }
  0x42   :  { %925 = vmatpush.bf16.msrb.mxu1 %v2611_v31  ;;  %953 = vmatpush.bf16.msrb.mxu3 %v2615_v36  ;;  %v2516_v1 = vld [vmem:[#allocation7 + $0x228] sm:$0xf0]  ;;  %v2426_v31 = vld [vmem:[#allocation7 + $0x150] sm:$0xf]  ;;  %v2895_v36 = vld [vmem:[#allocation7 + $0x154] sm:$0xf] }
  0x43   :  { %v2519_v14 = vor.u32 %v2918_v0, %v2516_v1  ;;  %v2959_v38 = vld [vmem:[#allocation7 + $0x354] sm:$0xf]  ;;  %v2427_v40 = vor.u32 %v2899_v32, %v2426_v31  ;;  %v2955_v47 = vld [vmem:[#allocation7 + $0x32c] sm:$0xf0]  ;;  %s3072_s1 = smov 64  }
  0x44   :  { %912 = vmatpush.bf16.msrb.mxu0 %v2323_v42  ;;  %940 = vmatpush.bf16.msrb.mxu2 %v2327_v44  ;;  %v2684_v39 = vld [vmem:[#allocation7 + $0x370] sm:$0xf0]  ;;  %v2431_v42 = vor.u32 %v2895_v36, %v2428_v37  ;;  %v2891_v44 = vld [vmem:[#allocation7 + $0x12c] sm:$0xf0]  ;;  %v2651_v53 = vor.u32 %v2955_v47, %v2650_v45  ;;  %v2976_v47 = vld [vmem:[#allocation7 + $0x3dc] sm:$0xf] }
  0x45   :  { %v2687_v46 = vor.u32 %v2959_v38, %v2684_v39  ;;  %v2396_v49 = vld [vmem:[#allocation7 + $0x130] sm:$0xf0]  ;;  %v2362_v55 = vld [vmem:[#allocation7 + $0xd0] sm:$0xf]  ;;  %v2498_v38 = vld [vmem:[#allocation7 + $0x1d8] sm:$0xf] }
  0x46   :  { %926 = vmatpush.bf16.msrb.mxu1 %v2579_v43  ;;  %954 = vmatpush.bf16.msrb.mxu3 %v2583_v48  ;;  %v2394_v43 = vld [vmem:[#allocation7 + $0x110] sm:$0xf]  ;;  %v2887_v48 = vld [vmem:[#allocation7 + $0x114] sm:$0xf]  ;;  %v2916_v39 = vld [vmem:[#allocation7 + $0x1f4] sm:$0xf0] }
  0x47   :  { %v2951_v50 = vld [vmem:[#allocation7 + $0x314] sm:$0xf]  ;;  %v2395_v52 = vor.u32 %v2891_v44, %v2394_v43  ;;  %v2883_v56 = vld [vmem:[#allocation7 + $0xec] sm:$0xf0]  ;;  %v2912_v43 = vld [vmem:[#allocation7 + $0x1dc] sm:$0xf] }
  0x48   :  { %913 = vmatpush.bf16.msrb.mxu0 %v2291_v54  ;;  %941 = vmatpush.bf16.msrb.mxu2 %v2295_v58  ;;  %v2652_v51 = vld [vmem:[#allocation7 + $0x330] sm:$0xf0]  ;;  %v2399_v54 = vor.u32 %v2887_v48, %v2396_v49  ;;  %v2947_v59 = vld [vmem:[#allocation7 + $0x2ec] sm:$0xf0]  ;;  %v2363_v0 = vor.u32 %v2883_v56, %v2362_v55  ;;  %v2500_v44 = vld [vmem:[#allocation7 + $0x1f8] sm:$0xf0] }
  0x49   :  { %v2655_v58 = vor.u32 %v2951_v50, %v2652_v51  ;;  %v2879_v60 = vld [vmem:[#allocation7 + $0xd4] sm:$0xf]  ;;  %v2330_v3 = vld [vmem:[#allocation7 + $0x90] sm:$0xf]  ;;  %v2756_v48 = vld [vmem:[#allocation7 + $0x3f8] sm:$0xf0]  ;;  %v2499_v50 = vor.u32 %v2916_v39, %v2498_v38 }
  0x4a   :  { %927 = vmatpush.bf16.msrb.mxu1 %v2547_v57  ;;  %955 = vmatpush.bf16.msrb.mxu3 %v2551_v62  ;;  %v2618_v57 = vld [vmem:[#allocation7 + $0x2d0] sm:$0xf]  ;;  %v2364_v61 = vld [vmem:[#allocation7 + $0xf0] sm:$0xf0]  ;;  %v2722_v55 = vld [vmem:[#allocation7 + $0x398] sm:$0xf]  ;;  %v2759_v56 = vor.u32 %v2976_v47, %v2756_v48 }
  0x4b   :  { %v2943_v62 = vld [vmem:[#allocation7 + $0x2d4] sm:$0xf]  ;;  %v2619_v1 = vor.u32 %v2947_v59, %v2618_v57  ;;  %v2367_v2 = vor.u32 %v2879_v60, %v2364_v61  ;;  %v2875_v4 = vld [vmem:[#allocation7 + $0xac] sm:$0xf0]  ;;  %v2972_v57 = vld [vmem:[#allocation7 + $0x3b4] sm:$0xf0] }
  0x4c   :  { %914 = vmatpush.bf16.msrb.mxu0 %v2259_v5  ;;  %942 = vmatpush.bf16.msrb.mxu2 %v2263_v11  ;;  %v2620_v63 = vld [vmem:[#allocation7 + $0x2f0] sm:$0xf0]  ;;  %v2586_v5 = vld [vmem:[#allocation7 + $0x290] sm:$0xf]  ;;  %v2331_v13 = vor.u32 %v2875_v4, %v2330_v3  ;;  %v2468_v59 = vld [vmem:[#allocation7 + $0x1b8] sm:$0xf0] }
  0x4d   :  { %v2623_v6 = vor.u32 %v2943_v62, %v2620_v63  ;;  %v2939_v7 = vld [vmem:[#allocation7 + $0x2ac] sm:$0xf0]  ;;  %v2871_v9 = vld [vmem:[#allocation7 + $0x94] sm:$0xf]  ;;  %v2968_v60 = vld [vmem:[#allocation7 + $0x39c] sm:$0xf]  ;;  %v2723_v63 = vor.u32 %v2972_v57, %v2722_v55 }
  0x4e   :  { %928 = vmatpush.bf16.msrb.mxu1 %v2515_v10  ;;  %956 = vmatpush.bf16.msrb.mxu3 %v2519_v14  ;;  %v2332_v10 = vld [vmem:[#allocation7 + $0xb0] sm:$0xf0]  ;;  %v2587_v14 = vor.u32 %v2939_v7, %v2586_v5  ;;  %v2554_v19 = vld [vmem:[#allocation7 + $0x250] sm:$0xf]  ;;  %v2724_v61 = vld [vmem:[#allocation7 + $0x3b8] sm:$0xf0] }
  0x4f   :  { %943 = vmatmul.bf16.vlgmr.msrb.gmra.mxu2 %v3152_v8  ;;  %915 = vmatmul.bf16.vlgmr.msrb.gmra.mxu0 %v3152_v8  ;;  %v2935_v11 = vld [vmem:[#allocation7 + $0x294] sm:$0xf]  ;;  %v2931_v21 = vld [vmem:[#allocation7 + $0x26c] sm:$0xf0]  ;;  %v2690_v3 = vld [vmem:[#allocation7 + $0x358] sm:$0xf]  ;;  %v2727_v4 = vor.u32 %v2968_v60, %v2724_v61 }
  0x50   :  { %963 = vmatpush.bf16.msra.mxu0 %v2491_v16  ;;  %991 = vmatpush.bf16.msra.mxu2 %v2495_v18  ;;  %v2588_v12 = vld [vmem:[#allocation7 + $0x2b0] sm:$0xf0]  ;;  %v2335_v16 = vor.u32 %v2871_v9, %v2332_v10  ;;  %v2867_v18 = vld [vmem:[#allocation7 + $0x6c] sm:$0xf0]  ;;  %v2964_v5 = vld [vmem:[#allocation7 + $0x374] sm:$0xf0] }
  0x51   :  { %957 = vmatmul.bf16.vlgmr.msrb.gmra.mxu3 %v3160_v15  ;;  %929 = vmatmul.bf16.vlgmr.msrb.gmra.mxu1 %v3160_v15  ;;  %v2591_v20 = vor.u32 %v2935_v11, %v2588_v12  ;;  %v2300_v23 = vld [vmem:[#allocation7 + $0x70] sm:$0xf0]  ;;  %v2266_v27 = vld [vmem:[#allocation7 + $0x10] sm:$0xf]  ;;  %v2436_v7 = vld [vmem:[#allocation7 + $0x178] sm:$0xf0]  ;;  %v2691_v12 = vor.u32 %v2964_v5, %v2690_v3 }
  0x52   :  { %977 = vmatpush.bf16.msra.mxu1 %v2747_v17  ;;  %1005 = vmatpush.bf16.msra.mxu3 %v2751_v22  ;;  %v2298_v17 = vld [vmem:[#allocation7 + $0x50] sm:$0xf]  ;;  %v2863_v22 = vld [vmem:[#allocation7 + $0x54] sm:$0xf]  ;;  %v2960_v9 = vld [vmem:[#allocation7 + $0x35c] sm:$0xf] }
  0x53   :  { %v2927_v24 = vld [vmem:[#allocation7 + $0x254] sm:$0xf]  ;;  %v2299_v26 = vor.u32 %v2867_v18, %v2298_v17  ;;  %v2522_v31 = vld [vmem:[#allocation7 + $0x210] sm:$0xf]  ;;  %v2692_v10 = vld [vmem:[#allocation7 + $0x378] sm:$0xf0] }
  0x54   :  { %964 = vmatpush.bf16.msra.mxu0 %v2459_v28  ;;  %992 = vmatpush.bf16.msra.mxu2 %v2463_v30  ;;  %v2556_v25 = vld [vmem:[#allocation7 + $0x270] sm:$0xf0]  ;;  %v2859_v28 = vld [vmem:[#allocation7 + $0x2c] sm:$0xf0]  ;;  %v2303_v30 = vor.u32 %v2863_v22, %v2300_v23  ;;  %v2658_v17 = vld [vmem:[#allocation7 + $0x318] sm:$0xf]  ;;  %v2695_v18 = vor.u32 %v2960_v9, %v2692_v10 }
  0x55   :  { %v2923_v32 = vld [vmem:[#allocation7 + $0x22c] sm:$0xf0]  ;;  %v2855_v33 = vld [vmem:[#allocation7 + $0x14] sm:$0xf]  ;;  %v2952_v22 = vld [vmem:[#allocation7 + $0x31c] sm:$0xf] }
  0x56   :  { %978 = vmatpush.bf16.msra.mxu1 %v2715_v29  ;;  %1006 = vmatpush.bf16.msra.mxu3 %v2719_v34  ;;  %v2555_v29 = vor.u32 %v2931_v21, %v2554_v19  ;;  %v2559_v34 = vor.u32 %v2927_v24, %v2556_v25  ;;  %v2268_v35 = vld [vmem:[#allocation7 + $0x30] sm:$0xf0]  ;;  %v2523_v45 = vor.u32 %v2923_v32, %v2522_v31  ;;  %v2956_v19 = vld [vmem:[#allocation7 + $0x334] sm:$0xf0]  ;;  %v2404_v21 = vld [vmem:[#allocation7 + $0x138] sm:$0xf0] }
  0x57   :  { %v2919_v36 = vld [vmem:[#allocation7 + $0x214] sm:$0xf]  ;;  %v2660_v23 = vld [vmem:[#allocation7 + $0x338] sm:$0xf0]  ;;  %v2659_v25 = vor.u32 %v2956_v19, %v2658_v17  ;;  %v2948_v31 = vld [vmem:[#allocation7 + $0x2f4] sm:$0xf0] }
  0x58   :  { %965 = vmatpush.bf16.msra.mxu0 %v2427_v40  ;;  %993 = vmatpush.bf16.msra.mxu2 %v2431_v42  ;;  %v2524_v37 = vld [vmem:[#allocation7 + $0x230] sm:$0xf0]  ;;  %v2754_v40 = vld [vmem:[#allocation7 + $0x3d8] sm:$0xf]  ;;  %v2880_v32 = vld [vmem:[#allocation7 + $0xdc] sm:$0xf] }
  0x59   :  { %v2980_v42 = vld [vmem:[#allocation7 + $0x3f4] sm:$0xf0]  ;;  %v2527_v49 = vor.u32 %v2919_v36, %v2524_v37  ;;  %v2596_v47 = vld [vmem:[#allocation7 + $0x2b8] sm:$0xf0] }
  0x5a   :  { %979 = vmatpush.bf16.msra.mxu1 %v2683_v41  ;;  %1007 = vmatpush.bf16.msra.mxu3 %v2687_v46  ;;  %v2267_v41 = vor.u32 %v2859_v28, %v2266_v27  ;;  %v2271_v46 = vor.u32 %v2855_v33, %v2268_v35  ;;  %v2755_v51 = vor.u32 %v2980_v42, %v2754_v40  ;;  %v2370_v27 = vld [vmem:[#allocation7 + $0xd8] sm:$0xf]  ;;  %v2372_v33 = vld [vmem:[#allocation7 + $0xf8] sm:$0xf0] }
  0x5b   :  { %v2884_v28 = vld [vmem:[#allocation7 + $0xf4] sm:$0xf0]  ;;  %v2628_v35 = vld [vmem:[#allocation7 + $0x2f8] sm:$0xf0]  ;;  %v2375_v38 = vor.u32 %v2880_v32, %v2372_v33 }
  0x5c   :  { %966 = vmatpush.bf16.msra.mxu0 %v2395_v52  ;;  %994 = vmatpush.bf16.msra.mxu2 %v2399_v54  ;;  %v2503_v52 = vor.u32 %v2912_v43, %v2500_v44  ;;  %v2908_v54 = vld [vmem:[#allocation7 + $0x1b4] sm:$0xf0]  ;;  %v2371_v36 = vor.u32 %v2884_v28, %v2370_v27  ;;  %v2872_v44 = vld [vmem:[#allocation7 + $0x9c] sm:$0xf] }
  0x5d   :  { %v2338_v39 = vld [vmem:[#allocation7 + $0x98] sm:$0xf]  ;;  %v2308_v57 = vld [vmem:[#allocation7 + $0x78] sm:$0xf0] }
  0x5e   :  { %980 = vmatpush.bf16.msra.mxu1 %v2651_v53  ;;  %1008 = vmatpush.bf16.msra.mxu3 %v2655_v58  ;;  %v2466_v53 = vld [vmem:[#allocation7 + $0x198] sm:$0xf]  ;;  %v2904_v58 = vld [vmem:[#allocation7 + $0x19c] sm:$0xf] }
  0x5f   :  { %v2467_v62 = vor.u32 %v2908_v54, %v2466_v53  ;;  %v2876_v40 = vld [vmem:[#allocation7 + $0xb4] sm:$0xf0]  ;;  %v2276_v5 = vld [vmem:[#allocation7 + $0x38] sm:$0xf0] }
  0x60   :  { %967 = vmatpush.bf16.msra.mxu0 %v2363_v0  ;;  %995 = vmatpush.bf16.msra.mxu2 %v2367_v2  ;;  %v2471_v0 = vor.u32 %v2904_v58, %v2468_v59  ;;  %v2900_v2 = vld [vmem:[#allocation7 + $0x174] sm:$0xf0]  ;;  %v2339_v48 = vor.u32 %v2876_v40, %v2338_v39  ;;  %v2928_v58 = vld [vmem:[#allocation7 + $0x25c] sm:$0xf] }
  0x61   :  { %v2940_v43 = vld [vmem:[#allocation7 + $0x2b4] sm:$0xf0]  ;;  %v2564_v59 = vld [vmem:[#allocation7 + $0x278] sm:$0xf0] }
  0x62   :  { %981 = vmatpush.bf16.msra.mxu1 %v2619_v1  ;;  %1009 = vmatpush.bf16.msra.mxu3 %v2623_v6  ;;  %v2434_v1 = vld [vmem:[#allocation7 + $0x158] sm:$0xf]  ;;  %v2896_v6 = vld [vmem:[#allocation7 + $0x15c] sm:$0xf] }
  0x63   :  { %v2435_v11 = vor.u32 %v2900_v2, %v2434_v1  ;;  %v2562_v53 = vld [vmem:[#allocation7 + $0x258] sm:$0xf]  ;;  %v2567_v2 = vor.u32 %v2928_v58, %v2564_v59 }
  0x64   :  { %968 = vmatpush.bf16.msra.mxu0 %v2331_v13  ;;  %996 = vmatpush.bf16.msra.mxu2 %v2335_v16  ;;  %v2439_v13 = vor.u32 %v2896_v6, %v2436_v7  ;;  %v2892_v16 = vld [vmem:[#allocation7 + $0x134] sm:$0xf0]  ;;  %v2920_v6 = vld [vmem:[#allocation7 + $0x21c] sm:$0xf] }
  0x65   :  { %v2932_v55 = vld [vmem:[#allocation7 + $0x274] sm:$0xf0]  ;;  %v2532_v7 = vld [vmem:[#allocation7 + $0x238] sm:$0xf0] }
  0x66   :  { %982 = vmatpush.bf16.msra.mxu1 %v2587_v14  ;;  %1010 = vmatpush.bf16.msra.mxu3 %v2591_v20  ;;  %v2402_v14 = vld [vmem:[#allocation7 + $0x118] sm:$0xf]  ;;  %v2888_v20 = vld [vmem:[#allocation7 + $0x11c] sm:$0xf]  ;;  %v2563_v61 = vor.u32 %v2932_v55, %v2562_v53 }
  0x67   :  { %v2403_v24 = vor.u32 %v2892_v16, %v2402_v14  ;;  %v2530_v1 = vld [vmem:[#allocation7 + $0x218] sm:$0xf] }
  0x68   :  { %969 = vmatpush.bf16.msra.mxu0 %v2299_v26  ;;  %997 = vmatpush.bf16.msra.mxu2 %v2303_v30  ;;  %v2407_v26 = vor.u32 %v2888_v20, %v2404_v21  ;;  %v2663_v30 = vor.u32 %v2952_v22, %v2660_v23  ;;  %v2924_v3 = vld [vmem:[#allocation7 + $0x234] sm:$0xf0] }
  0x69   :  { %v2531_v10 = vor.u32 %v2924_v3, %v2530_v1 }
  0x6a   :  { %983 = vmatpush.bf16.msra.mxu1 %v2555_v29  ;;  %1011 = vmatpush.bf16.msra.mxu3 %v2559_v34  ;;  %v2626_v29 = vld [vmem:[#allocation7 + $0x2d8] sm:$0xf]  ;;  %v2944_v34 = vld [vmem:[#allocation7 + $0x2dc] sm:$0xf] }
  0x6b   :  { %v2627_v37 = vor.u32 %v2948_v31, %v2626_v29  ;;  %v2631_v42 = vor.u32 %v2944_v34, %v2628_v35 }
  0x6c   :  { %970 = vmatpush.bf16.msra.mxu0 %v2267_v41  ;;  %998 = vmatpush.bf16.msra.mxu2 %v2271_v46  ;;  %v2594_v41 = vld [vmem:[#allocation7 + $0x298] sm:$0xf]  ;;  %v2936_v46 = vld [vmem:[#allocation7 + $0x29c] sm:$0xf] }
  0x6d   :  { %v2599_v54 = vor.u32 %v2936_v46, %v2596_v47 }
  0x6e   :  { %984 = vmatpush.bf16.msra.mxu1 %v2523_v45  ;;  %1012 = vmatpush.bf16.msra.mxu3 %v2527_v49  ;;  %v2340_v45 = vld [vmem:[#allocation7 + $0xb8] sm:$0xf0]  ;;  %v2595_v49 = vor.u32 %v2940_v43, %v2594_v41 }
  0x6f   :  { %999 = vmatmul.bf16.vlgmr.msra.gmra.mxu2 %v3152_v8  ;;  %971 = vmatmul.bf16.vlgmr.msra.gmra.mxu0 %v3152_v8 }
  0x70   :  { %1019 = vmatpush.bf16.msrb.mxu0 %v2499_v50  ;;  %1047 = vmatpush.bf16.msrb.mxu2 %v2503_v52  ;;  %v2343_v50 = vor.u32 %v2872_v44, %v2340_v45  ;;  %v2868_v52 = vld [vmem:[#allocation7 + $0x74] sm:$0xf0] }
  0x71   :  { %1013 = vmatmul.bf16.vlgmr.msra.gmra.mxu3 %v3160_v15  ;;  %985 = vmatmul.bf16.vlgmr.msra.gmra.mxu1 %v3160_v15 }
  0x72   :  { %1033 = vmatpush.bf16.msrb.mxu1 %v2755_v51  ;;  %1061 = vmatpush.bf16.msrb.mxu3 %v2759_v56  ;;  %v2306_v51 = vld [vmem:[#allocation7 + $0x58] sm:$0xf]  ;;  %v2864_v56 = vld [vmem:[#allocation7 + $0x5c] sm:$0xf] }
  0x73   :  { %v2307_v60 = vor.u32 %v2868_v52, %v2306_v51 }
  0x74   :  { %1020 = vmatpush.bf16.msrb.mxu0 %v2467_v62  ;;  %1048 = vmatpush.bf16.msrb.mxu2 %v2471_v0  ;;  %v2311_v62 = vor.u32 %v2864_v56, %v2308_v57  ;;  %v2860_v0 = vld [vmem:[#allocation7 + $0x34] sm:$0xf0] }
  0x76   :  { %1034 = vmatpush.bf16.msrb.mxu1 %v2723_v63  ;;  %1062 = vmatpush.bf16.msrb.mxu3 %v2727_v4  ;;  %v2274_v63 = vld [vmem:[#allocation7 + $0x18] sm:$0xf]  ;;  %v2856_v4 = vld [vmem:[#allocation7 + $0x1c] sm:$0xf] }
  0x77   :  { %v2275_v9 = vor.u32 %v2860_v0, %v2274_v63 }
  0x78   :  { %1021 = vmatpush.bf16.msrb.mxu0 %v2435_v11  ;;  %1049 = vmatpush.bf16.msrb.mxu2 %v2439_v13  ;;  %v2279_v11 = vor.u32 %v2856_v4, %v2276_v5 }
  0x7a   :  { %1035 = vmatpush.bf16.msrb.mxu1 %v2691_v12  ;;  %1063 = vmatpush.bf16.msrb.mxu3 %v2695_v18  ;;  %v2535_v12 = vor.u32 %v2920_v6, %v2532_v7 }
  0x7c   :  { %1022 = vmatpush.bf16.msrb.mxu0 %v2403_v24  ;;  %1050 = vmatpush.bf16.msrb.mxu2 %v2407_v26 }
  0x7e   :  { %1036 = vmatpush.bf16.msrb.mxu1 %v2659_v25  ;;  %1064 = vmatpush.bf16.msrb.mxu3 %v2663_v30 }
  0x80   :  { %1023 = vmatpush.bf16.msrb.mxu0 %v2371_v36  ;;  %1051 = vmatpush.bf16.msrb.mxu2 %v2375_v38 }
  0x82   :  { %1037 = vmatpush.bf16.msrb.mxu1 %v2627_v37  ;;  %1065 = vmatpush.bf16.msrb.mxu3 %v2631_v42 }
  0x84   :  { %1024 = vmatpush.bf16.msrb.mxu0 %v2339_v48  ;;  %1052 = vmatpush.bf16.msrb.mxu2 %v2343_v50 }
  0x86   :  { %1038 = vmatpush.bf16.msrb.mxu1 %v2595_v49  ;;  %1066 = vmatpush.bf16.msrb.mxu3 %v2599_v54 }
  0x88   :  { %1025 = vmatpush.bf16.msrb.mxu0 %v2307_v60  ;;  %1053 = vmatpush.bf16.msrb.mxu2 %v2311_v62 }
  0x8a   :  { %1039 = vmatpush.bf16.msrb.mxu1 %v2563_v61  ;;  %1067 = vmatpush.bf16.msrb.mxu3 %v2567_v2 }
  0x8c   :  { %1026 = vmatpush.bf16.msrb.mxu0 %v2275_v9  ;;  %1054 = vmatpush.bf16.msrb.mxu2 %v2279_v11 }
  0x8e   :  { %1040 = vmatpush.bf16.msrb.mxu1 %v2531_v10  ;;  %1068 = vmatpush.bf16.msrb.mxu3 %v2535_v12 }
  0x8f   :  { %1027 = vmatmul.bf16.vlgmr.msrb.gmra.mxu0 %v3152_v8  ;;  %1055 = vmatmul.bf16.vlgmr.msrb.gmra.mxu2 %v3152_v8 }
  0x91   :  { %1041 = vmatmul.bf16.vlgmr.msrb.gmra.mxu1 %v3160_v15  ;;  %1069 = vmatmul.bf16.vlgmr.msrb.gmra.mxu3 %v3160_v15 }
  0xae   :  { %v860_v13 = vpop.f32.mrf.mxu0 }
  0xb0   :  { %v874_v14 = vpop.f32.mrf.mxu1 }
  0xb1   :  { %v875_v16 = vadd.f32 %v874_v14, %v860_v13 }
  0xb3   :  { %1076 = vst.msk [vmem:[#allocation2] sm:$0xff] %vm1075_vm0, %v875_v16 }
  0xb4   :  { %v888_v17 = vpop.f32.mrf.mxu2 }
  0xb6   :  { %v902_v18 = vpop.f32.mrf.mxu3  ;;  %v862_v20 = vpop.f32.mrf.mxu0 }
  0xb7   :  { %v3179_v19 = vadd.f32 %v902_v18, %v888_v17 }
  0xb8   :  { %v876_v21 = vpop.f32.mrf.mxu1 }
  0xb9   :  { %1082 = vst.msk [vmem:[#allocation2 + $0x10] sm:$0xff] %vm1075_vm0, %v3179_v19  ;;  %v3183_v22 = vadd.f32 %v876_v21, %v862_v20  ;;  %v1218_v20 = vld [vmem:[%s3682_s4 + $0x8] sm:$0xff]  ;;  %v3073_v21 = vmov 0  }
  0xba   :  { %3009 = vset.pattern.permute.xlu1 %v3073_v21  ;;  %3010 = vset.pattern.permute.xlu2 %v3073_v21 }
  0xbb   :  { %3011 = vset.pattern.permute.xlu0 %v3073_v21 }
  0xbc   :  { %v890_v8 = vpop.f32.mrf.mxu2 }
  0xbe   :  { %v904_v23 = vpop.f32.mrf.mxu3 }
  0xbf   :  { %v3185_v15 = vadd.f32 %v904_v23, %v890_v8 }
  0xcc   :  { %v916_v24 = vpop.f32.mrf.mxu0 }
  0xce   :  { %v930_v25 = vpop.f32.mrf.mxu1 }
  0xcf   :  { %v931_v26 = vadd.f32 %v930_v25, %v916_v24 }
  0xd1   :  { %1088 = vst.msk [vmem:[#allocation2 + $0x20] sm:$0xff] %vm1075_vm0, %v931_v26 }
  0xd2   :  { %v944_v27 = vpop.f32.mrf.mxu2 }
  0xd4   :  { %v958_v28 = vpop.f32.mrf.mxu3  ;;  %v918_v30 = vpop.f32.mrf.mxu0 }
  0xd5   :  { %v959_v29 = vadd.f32 %v958_v28, %v944_v27 }
  0xd6   :  { %v932_v31 = vpop.f32.mrf.mxu1 }
  0xd7   :  { %1094 = vst.msk [vmem:[#allocation2 + $0x30] sm:$0xff] %vm1075_vm0, %v959_v29  ;;  %v3194_v48 = vadd.f32 %v932_v31, %v918_v30  ;;  %v1173_v31 = vld [vmem:[%s3681_s3] sm:$0xff] }
  0xda   :  { %v946_v32 = vpop.f32.mrf.mxu2 }
  0xdc   :  { %v960_v33 = vpop.f32.mrf.mxu3 }
  0xdd   :  { %v961_v59 = vadd.f32 %v960_v33, %v946_v32  ;;  %v2786_v33 = vld [vmem:[%s3683_s5 + $0x30] sm:$0xf] }
  0xec   :  { %v972_v34 = vpop.f32.mrf.mxu0 }
  0xee   :  { %v986_v35 = vpop.f32.mrf.mxu1 }
  0xef   :  { %v987_v36 = vadd.f32 %v986_v35, %v972_v34  ;;  %v2988_v34 = vld [vmem:[%s3683_s5 + $0x34] sm:$0xf0]  ;;  %v2987_v35 = vld [vmem:[%s3683_s5 + $0x34] sm:$0xf] }
  0xf1   :  { %1100 = vst.msk [vmem:[#allocation2 + $0x40] sm:$0xff] %vm1075_vm0, %v987_v36 }
  0xf2   :  { %v1000_v37 = vpop.f32.mrf.mxu2 }
  0xf4   :  { %v1014_v38 = vpop.f32.mrf.mxu3  ;;  %v974_v43 = vpop.f32.mrf.mxu0 }
  0xf5   :  { %v1015_v39 = vadd.f32 %v1014_v38, %v1000_v37  ;;  %v2788_v37 = vld [vmem:[%s3683_s5 + $0x38] sm:$0xf0] }
  0xf6   :  { %v988_v44 = vpop.f32.mrf.mxu1  ;;  %v2791_v38 = vor.u32 %v2987_v35, %v2788_v37 }
  0xf7   :  { %1106 = vst.msk [vmem:[#allocation2 + $0x50] sm:$0xff] %vm1075_vm0, %v1015_v39  ;;  %1108 = vrot.lane.b32.xlu2 %v1015_v39, %s3072_s1  ;;  %v989_v58 = vadd.f32 %v988_v44, %v974_v43  ;;  %v2778_v39 = vld [vmem:[%s3683_s5 + $0x20] sm:$0xf]  ;;  %v2780_v43 = vld [vmem:[%s3683_s5 + $0x28] sm:$0xf0] }
  0xf8   :  { %1313 = vmatpush.bf16.msra.mxu2 %v2791_v38 }
  0xfa   :  { %v1002_v40 = vpop.f32.mrf.mxu2 }
  0xfc   :  { %v1016_v41 = vpop.f32.mrf.mxu3 }
  0xfd   :  { %v1017_v42 = vadd.f32 %v1016_v41, %v1002_v40  ;;  %v2986_v40 = vld [vmem:[%s3683_s5 + $0x24] sm:$0xf0]  ;;  %v2985_v41 = vld [vmem:[%s3683_s5 + $0x24] sm:$0xf] }
  0xfe   :  { %v2783_v44 = vor.u32 %v2985_v41, %v2780_v43 }
  0xff   :  { %1156 = vrot.lane.b32.xlu2 %v1017_v42, %s3072_s1 }
 0x100   :  { %1314 = vmatpush.bf16.msra.mxu2 %v2783_v44 }
 0x107   :  { %1096 = vrot.lane.b32.xlu2 %v959_v29, %s3072_s1 }
 0x10c   :  { %v1028_v45 = vpop.f32.mrf.mxu0 }
 0x10e   :  { %v1042_v46 = vpop.f32.mrf.mxu1 }
 0x10f   :  { %v1043_v47 = vadd.f32 %v1042_v46, %v1028_v45  ;;  %1138 = vrot.lane.b32.xlu2 %v3194_v48, %s3072_s1  ;;  %v2770_v45 = vld [vmem:[%s3683_s5 + $0x10] sm:$0xf]  ;;  %v2984_v46 = vld [vmem:[%s3683_s5 + $0x14] sm:$0xf0] }
 0x111   :  { %1112 = vst.msk [vmem:[#allocation2 + $0x60] sm:$0xff] %vm1075_vm0, %v1043_v47  ;;  %1114 = vrot.lane.b32.xlu1 %v1043_v47, %s3072_s1  ;;  %v2983_v47 = vld [vmem:[%s3683_s5 + $0x14] sm:$0xf] }
 0x112   :  { %v1056_v49 = vpop.f32.mrf.mxu2 }
 0x114   :  { %v1070_v50 = vpop.f32.mrf.mxu3  ;;  %v1030_v51 = vpop.f32.mrf.mxu0 }
 0x115   :  { %v1071_v52 = vadd.f32 %v1070_v50, %v1056_v49  ;;  %v2772_v49 = vld [vmem:[%s3683_s5 + $0x18] sm:$0xf0] }
 0x116   :  { %v1044_v53 = vpop.f32.mrf.mxu1  ;;  %v2775_v50 = vor.u32 %v2983_v47, %v2772_v49 }
 0x117   :  { %v1045_v54 = vadd.f32 %v1044_v53, %v1030_v51  ;;  %1118 = vst.msk [vmem:[#allocation2 + $0x70] sm:$0xff] %vm1075_vm0, %v1071_v52  ;;  %1120 = vrot.lane.b32.xlu0 %v1071_v52, %s3072_s1  ;;  %1078 = vrot.lane.b32.xlu2 %v875_v16, %s3072_s1  ;;  %v2762_v51 = vld [vmem:[%s3683_s5] sm:$0xf]  ;;  %v2982_v52 = vld [vmem:[%s3683_s5 + $0x4] sm:$0xf0] }
 0x118   :  { %1315 = vmatpush.bf16.msra.mxu2 %v2775_v50  ;;  %v2981_v53 = vld [vmem:[%s3683_s5 + $0x4] sm:$0xf] }
 0x119   :  { %1162 = vrot.lane.b32.xlu1 %v1045_v54, %s3072_s1 }
 0x11a   :  { %v1058_v55 = vpop.f32.mrf.mxu2 }
 0x11c   :  { %v1072_v56 = vpop.f32.mrf.mxu3 }
 0x11d   :  { %v1073_v57 = vadd.f32 %v1072_v56, %v1058_v55  ;;  %v2764_v55 = vld [vmem:[%s3683_s5 + $0x8] sm:$0xf0] }
 0x11e   :  { %v2767_v56 = vor.u32 %v2981_v53, %v2764_v55 }
 0x11f   :  { %1168 = vrot.lane.b32.xlu0 %v1073_v57, %s3072_s1  ;;  %1226 = vperm.xlu2 %3010, %v1218_v20  }
 0x120   :  { %1316 = vmatpush.bf16.msra.mxu2 %v2767_v56 }
 0x121   :  { %1150 = vrot.lane.b32.xlu1 %v989_v58, %s3072_s1 }
 0x127   :  { %1102 = vrot.lane.b32.xlu0 %v987_v36, %s3072_s1  ;;  %v2787_v36 = vor.u32 %v2988_v34, %v2786_v33 }
 0x129   :  { %1090 = vrot.lane.b32.xlu1 %v931_v26, %s3072_s1  ;;  %1299 = vmatpush.bf16.msra.mxu1 %v2787_v36 }
 0x12f   :  { %1144 = vrot.lane.b32.xlu0 %v961_v59, %s3072_s1 }
 0x131   :  { %1132 = vrot.lane.b32.xlu1 %v3185_v15, %s3072_s1 }
 0x137   :  { %1084 = vrot.lane.b32.xlu0 %v3179_v19, %s3072_s1  ;;  %v1217_v19 = vld [vmem:[%s3682_s4] sm:$0xff] }
 0x139   :  { %1221 = vperm.xlu1 %3009, %v1217_v19   ;;  %v2798_v19 = vld [vmem:[%s3683_s5 + $0x8] sm:$0xf0] }
 0x13f   :  { %1125 = vrot.lane.b32.xlu0 %v3183_v22, %s3072_s1 }
 0x151   :  { %v1109_v60 = vpop.permute.xlu2 %1108 }
 0x152   :  { %1111 = vst.msk [vmem:[#allocation2 + $0x58] sm:$0xff] %vm1075_vm0, %v1109_v60 }
 0x153   :  { %1160 = vst.msk [vmem:[#allocation2 + $0x58] sm:$0xff] %vm1128_vm1, %v1017_v42  ;;  %v2779_v42 = vor.u32 %v2986_v40, %v2778_v39 }
 0x155   :  { %1300 = vmatpush.bf16.msra.mxu1 %v2779_v42 }
 0x159   :  { %v1157_v61 = vpop.permute.xlu2 %1156 }
 0x15a   :  { %1159 = vst.msk [vmem:[#allocation2 + $0x50] sm:$0xff] %vm1128_vm1, %v1157_v61  ;;  %v1186_v13 = vld [vmem:[#allocation2 + $0x58] sm:$0xff] }
 0x15b   :  { %v2822_v61 = vld [vmem:[%s3683_s5 + $0x38] sm:$0xf0] }
 0x161   :  { %v1097_v62 = vpop.permute.xlu2 %1096  ;;  %v1185_v16 = vld [vmem:[#allocation2 + $0x50] sm:$0xff] }
 0x162   :  { %1099 = vst.msk [vmem:[#allocation2 + $0x38] sm:$0xff] %vm1075_vm0, %v1097_v62  ;;  %v2812_v62 = vld [vmem:[%s3683_s5 + $0x20] sm:$0xf] }
 0x163   :  { %1148 = vst.msk [vmem:[#allocation2 + $0x38] sm:$0xff] %vm1128_vm1, %v961_v59  ;;  %v2995_v59 = vld [vmem:[%s3683_s5 + $0x34] sm:$0xf] }
 0x169   :  { %v1139_v63 = vpop.permute.xlu2 %1138 }
 0x16a   :  { %1141 = vst.msk [vmem:[#allocation2 + $0x20] sm:$0xff] %vm1128_vm1, %v1139_v63  ;;  %v1182_v8 = vld [vmem:[#allocation2 + $0x38] sm:$0xff]  ;;  %v2994_v63 = vld [vmem:[%s3683_s5 + $0x24] sm:$0xf0] }
 0x171   :  { %v1079_v0 = vpop.permute.xlu2 %1078  ;;  %v1179_v26 = vld [vmem:[#allocation2 + $0x20] sm:$0xff] }
 0x172   :  { %1081 = vst.msk [vmem:[#allocation2 + $0x8] sm:$0xff] %vm1075_vm0, %v1079_v0  ;;  %v2825_v0 = vor.u32 %v2995_v59, %v2822_v61 }
 0x173   :  { %1130 = vst.msk [vmem:[#allocation2 + $0x8] sm:$0xff] %vm1128_vm1, %v3183_v22 }
 0x17a   :  { %v1176_v30 = vld [vmem:[#allocation2 + $0x8] sm:$0xff] }
 0x183   :  { %v1115_v1 = vpop.permute.xlu1 %1114 }
 0x184   :  { %1117 = vst.msk [vmem:[#allocation2 + $0x68] sm:$0xff] %vm1075_vm0, %v1115_v1  ;;  %v2993_v1 = vld [vmem:[%s3683_s5 + $0x24] sm:$0xf] }
 0x185   :  { %1166 = vst.msk [vmem:[#allocation2 + $0x68] sm:$0xff] %vm1128_vm1, %v1045_v54  ;;  %v2763_v54 = vor.u32 %v2982_v52, %v2762_v51 }
 0x189   :  { %v1121_v2 = vpop.permute.xlu0 %1120 }
 0x18a   :  { %1123 = vst.msk [vmem:[#allocation2 + $0x78] sm:$0xff] %vm1075_vm0, %v1121_v2  ;;  %v2814_v2 = vld [vmem:[%s3683_s5 + $0x28] sm:$0xf0] }
 0x18b   :  { %v1163_v3 = vpop.permute.xlu1 %1162  ;;  %1172 = vst.msk [vmem:[#allocation2 + $0x78] sm:$0xff] %vm1128_vm1, %v1073_v57  ;;  %v2820_v57 = vld [vmem:[%s3683_s5 + $0x30] sm:$0xf] }
 0x18c   :  { %1165 = vst.msk [vmem:[#allocation2 + $0x60] sm:$0xff] %vm1128_vm1, %v1163_v3  ;;  %v1188_v11 = vld [vmem:[#allocation2 + $0x68] sm:$0xff]  ;;  %v2813_v3 = vor.u32 %v2994_v63, %v2812_v62 }
 0x191   :  { %v1169_v4 = vpop.permute.xlu0 %1168 }
 0x192   :  { %1171 = vst.msk [vmem:[#allocation2 + $0x70] sm:$0xff] %vm1128_vm1, %v1169_v4  ;;  %v1190_v5 = vld [vmem:[#allocation2 + $0x78] sm:$0xff]  ;;  %v2817_v4 = vor.u32 %v2993_v1, %v2814_v2 }
 0x193   :  { %v1151_v6 = vpop.permute.xlu1 %1150  ;;  %1191 = vmatpush.msra.mxu0 %v1190_v5  ;;  %v1187_v12 = vld [vmem:[#allocation2 + $0x60] sm:$0xff]  ;;  %v2804_v5 = vld [vmem:[%s3683_s5 + $0x10] sm:$0xf] }
 0x194   :  { %1153 = vst.msk [vmem:[#allocation2 + $0x40] sm:$0xff] %vm1128_vm1, %v1151_v6  ;;  %v2992_v6 = vld [vmem:[%s3683_s5 + $0x14] sm:$0xf0] }
 0x199   :  { %v1103_v7 = vpop.permute.xlu0 %1102  ;;  %v1189_v9 = vld [vmem:[#allocation2 + $0x70] sm:$0xff] }
 0x19a   :  { %1105 = vst.msk [vmem:[#allocation2 + $0x48] sm:$0xff] %vm1075_vm0, %v1103_v7  ;;  %1192 = vmatpush.msra.mxu0 %v1189_v9  ;;  %v2991_v7 = vld [vmem:[%s3683_s5 + $0x14] sm:$0xf]  ;;  %v2806_v9 = vld [vmem:[%s3683_s5 + $0x18] sm:$0xf0] }
 0x19b   :  { %v1091_v10 = vpop.permute.xlu1 %1090  ;;  %1154 = vst.msk [vmem:[#allocation2 + $0x48] sm:$0xff] %vm1128_vm1, %v989_v58  ;;  %v1183_v22 = vld [vmem:[#allocation2 + $0x40] sm:$0xff]  ;;  %v2996_v58 = vld [vmem:[%s3683_s5 + $0x34] sm:$0xf0] }
 0x19c   :  { %1093 = vst.msk [vmem:[#allocation2 + $0x28] sm:$0xff] %vm1075_vm0, %v1091_v10  ;;  %1193 = vmatpush.msra.mxu0 %v1188_v11  ;;  %v2821_v60 = vor.u32 %v2996_v58, %v2820_v57  ;;  %v1214_v10 = vstv %s3302_s30  ;;  %v2805_v11 = vor.u32 %v2992_v6, %v2804_v5  ;;  %v1751_v6 = vld [vmem:[%s3685_s7 + $0x10] sm:$0xff] }
 0x19d   :  { %1142 = vst.msk [vmem:[#allocation2 + $0x28] sm:$0xff] %vm1128_vm1, %v3194_v48  ;;  %v2771_v48 = vor.u32 %v2984_v46, %v2770_v45 }
 0x19e   :  { %1194 = vmatpush.msra.mxu0 %v1187_v12  ;;  %v2809_v12 = vor.u32 %v2991_v7, %v2806_v9  ;;  %v1750_v7 = vld [vmem:[%s3685_s7 + $0x8] sm:$0xff]  ;;  %v1749_v9 = vld [vmem:[%s3685_s7] sm:$0xff] }
 0x19f   :  { %1301 = vmatpush.bf16.msra.mxu1 %v2771_v48 }
 0x1a0   :  { %1195 = vmatpush.msra.mxu0 %v1186_v13  ;;  %v2796_v13 = vld [vmem:[%s3683_s5] sm:$0xf] }
 0x1a1   :  { %v1145_v14 = vpop.permute.xlu0 %1144 }
 0x1a2   :  { %1147 = vst.msk [vmem:[#allocation2 + $0x30] sm:$0xff] %vm1128_vm1, %v1145_v14  ;;  %1196 = vmatpush.msra.mxu0 %v1185_v16  ;;  %v1184_v18 = vld [vmem:[#allocation2 + $0x48] sm:$0xff] }
 0x1a3   :  { %v1133_v17 = vpop.permute.xlu1 %1132  ;;  %1302 = vmatpush.bf16.msra.mxu1 %v2763_v54  ;;  %v2990_v14 = vld [vmem:[%s3683_s5 + $0x4] sm:$0xf0] }
 0x1a4   :  { %1135 = vst.msk [vmem:[#allocation2 + $0x10] sm:$0xff] %vm1128_vm1, %v1133_v17  ;;  %1197 = vmatpush.msra.mxu0 %v1184_v18  ;;  %v1180_v25 = vld [vmem:[#allocation2 + $0x28] sm:$0xff]  ;;  %v2989_v18 = vld [vmem:[%s3683_s5 + $0x4] sm:$0xf]  ;;  %v2797_v21 = vor.u32 %v2990_v14, %v2796_v13  ;;  %s3074_s5 = smov 48  }
 0x1a6   :  { %1198 = vmatpush.msra.mxu0 %v1183_v22 }
 0x1a7   :  { %1515 = vmatpush.bf16.msrb.mxu1 %v2825_v0 }
 0x1a8   :  { %1199 = vmatpush.msra.mxu0 %v1182_v8  ;;  %v2801_v8 = vor.u32 %v2989_v18, %v2798_v19 }
 0x1a9   :  { %v1085_v23 = vpop.permute.xlu0 %1084  ;;  %v1181_v24 = vld [vmem:[#allocation2 + $0x30] sm:$0xff] }
 0x1aa   :  { %1087 = vst.msk [vmem:[#allocation2 + $0x18] sm:$0xff] %vm1075_vm0, %v1085_v23  ;;  %1200 = vmatpush.msra.mxu0 %v1181_v24 }
 0x1ab   :  { %1136 = vst.msk [vmem:[#allocation2 + $0x18] sm:$0xff] %vm1128_vm1, %v3185_v15  ;;  %v1177_v29 = vld [vmem:[#allocation2 + $0x10] sm:$0xff]  ;;  %v1174_v15 = vld [vmem:[%s3681_s3 + $0x8] sm:$0xff]  ;;  %1516 = vmatpush.bf16.msrb.mxu1 %v2817_v4  ;;  %v1222_v17 = vpop.permute.xlu1 %1221 }
 0x1ac   :  { %1201 = vmatpush.msra.mxu0 %v1180_v25  ;;  %v1227_v25 = vpop.permute.xlu2 %1226 }
 0x1ae   :  { %1202 = vmatpush.msra.mxu0 %v1179_v26 }
 0x1af   :  { %1517 = vmatpush.bf16.msrb.mxu1 %v2809_v12 }
 0x1b1   :  { %v1126_v27 = vpop.permute.xlu0 %1125 }
 0x1b2   :  { %1129 = vst.msk [vmem:[#allocation2] sm:$0xff] %vm1128_vm1, %v1126_v27  ;;  %v1178_v28 = vld [vmem:[#allocation2 + $0x18] sm:$0xff] }
 0x1b3   :  { %1203 = vmatpush.msra.mxu0 %v1178_v28  ;;  %1518 = vmatpush.bf16.msrb.mxu1 %v2801_v8 }
 0x1b5   :  { %1204 = vmatpush.msra.mxu0 %v1177_v29 }
 0x1b7   :  { %1205 = vmatpush.msra.mxu0 %v1176_v30 }
 0x1b9   :  { %v1175_v32 = vld [vmem:[#allocation2] sm:$0xff] }
 0x1ba   :  { %1206 = vmatpush.msra.mxu0 %v1175_v32 }
 0x1bb   :  { %1207 = vmatmul.f32.vlgmr.msra.gmra.mxu0 %v1173_v31 }
 0x1bc   :  { %1501 = vmatpush.bf16.msrb.mxu0 %v2821_v60 }
 0x1c0   :  { %1502 = vmatpush.bf16.msrb.mxu0 %v2813_v3 }
 0x1c3   :  { %1210 = vmatmul.f32.gmra.mxu0 %v1174_v15 }
 0x1c4   :  { %1503 = vmatpush.bf16.msrb.mxu0 %v2805_v11 }
 0x1c8   :  { %1504 = vmatpush.bf16.msrb.mxu0 %v2797_v21 }
 0x238   :  { %v1208_v16 = vpop.f32.mrf.mxu0 }
 0x239   :  { %v1215_v20 = vmul.f32 %v1214_v10, %v1208_v16 }
 0x23b   :  { %v1229_v22 = vadd.f32 %v1222_v17, %v1215_v20 }
 0x23d   :  { %v1233_v23 = vmul.f32 0.1, %v1229_v22  ;;  %vm1231_vm2 = vcmp.ge.f32.partialorder %v1229_v22, 0.0 }
 0x23f   :  { %v1235_v27 = vsel %vm1231_vm2, %v1229_v22, %v1233_v23 }
 0x240   :  { %v1211_v24 = vpop.f32.mrf.mxu0  ;;  %v1237_v30 = vpack.c.bf16 %v1235_v27, %v1235_v27 }
 0x241   :  { %v1216_v26 = vmul.f32 %v1214_v10, %v1211_v24  ;;  %v1794_v10 = vld [vmem:[%s3687_s9] sm:$0xff] }
 0x242   :  { %v1249_v15 = vunpack.c.l.b16 %v1237_v30 }
 0x243   :  { %v1230_v28 = vadd.f32 %v1227_v25, %v1216_v26 }
 0x245   :  { %vm1232_vm3 = vcmp.ge.f32.partialorder %v1230_v28, 0.0  ;;  %v1234_v29 = vmul.f32 0.1, %v1230_v28 }
 0x247   :  { %v1236_v31 = vsel %vm1232_vm3, %v1230_v28, %v1234_v29 }
 0x248   :  { %v1238_v32 = vpack.c.bf16 %v1236_v31, %v1236_v31 }
 0x24a   :  { %v1250_v33 = vunpack.c.l.b16 %v1238_v32 }
 0x24c   :  { %v1251_v34 = vpack.c.b16 %v1250_v33, %v1249_v15 }
 0x24e   :  { %1452 = vrot.lane.b32.xlu0 %v1251_v34, %s3072_s1  ;;  %2792 = vmatmul.msk.bf16.vlgmr.msra.gmra.mxu1 %vm1075_vm0, %v1251_v34 }
 0x24f   :  { %2793 = vmatmul.msk.bf16.vlgmr.msra.gmra.mxu2 %vm1075_vm0, %v1251_v34 }
 0x2c0   :  { %v1453_v35 = vpop.permute.xlu0 %1452 }
 0x2c1   :  { %2826 = vmatmul.msk.bf16.vlgmr.msrb.gmra.mxu0 %vm1075_vm0, %v1453_v35  ;;  %2827 = vmatmul.msk.bf16.vlgmr.msrb.gmra.mxu1 %vm1075_vm0, %v1453_v35 }
 0x2cb   :  { %v3358_v36 = vpop.f32.mrf.mxu1 }
 0x2cc   :  { %1360 = vrot.lane.b32.xlu0 %v3358_v36, %s3074_s5  ;;  %1368 = vrot.lane.b32.xlu1 %v3358_v36, %s3071_s27  ;;  %1324 = vst.msk [vmem:[#allocation3] sm:$0xff] %vm1323_vm4, %v3358_v36 }
 0x2cd   :  { %1376 = vrot.lane.b32.xlu2 %v3358_v36, %s3075_s21 }
 0x2d2   :  { %v3368_v37 = vpop.f32.mrf.mxu2 }
 0x2d3   :  { %v1306_v38 = vpop.f32.mrf.mxu1  ;;  %1384 = vst.msk [vmem:[#allocation3 + $0x80] sm:$0xff] %vm1323_vm4, %v3368_v37 }
 0x2d4   :  { %1336 = vrot.lane.b32.xlu0 %v3358_v36, %s3076_s22  ;;  %1344 = vrot.lane.b32.xlu1 %v3358_v36, %s3077_s23  ;;  %1325 = vst.msk [vmem:[#allocation3 + $0x8] sm:$0xff] %vm1323_vm4, %v1306_v38 }
 0x2d5   :  { %1352 = vrot.lane.b32.xlu2 %v3358_v36, %s3072_s1 }
 0x2da   :  { %v1320_v39 = vpop.f32.mrf.mxu2 }
 0x2db   :  { %1385 = vst.msk [vmem:[#allocation3 + $0x88] sm:$0xff] %vm1323_vm4, %v1320_v39 }
 0x2dc   :  { %1436 = vrot.lane.b32.xlu0 %v3368_v37, %s3075_s21  ;;  %1420 = vrot.lane.b32.xlu1 %v3368_v37, %s3074_s5 }
 0x2dd   :  { %1428 = vrot.lane.b32.xlu2 %v3368_v37, %s3071_s27 }
 0x2e4   :  { %1412 = vrot.lane.b32.xlu0 %v3368_v37, %s3072_s1  ;;  %1396 = vrot.lane.b32.xlu1 %v3368_v37, %s3076_s22 }
 0x2e5   :  { %1404 = vrot.lane.b32.xlu2 %v3368_v37, %s3077_s23 }
 0x2ec   :  { %1370 = vrot.lane.b32.xlu0 %v1306_v38, %s3071_s27  ;;  %1378 = vrot.lane.b32.xlu1 %v1306_v38, %s3075_s21 }
 0x2ed   :  { %1362 = vrot.lane.b32.xlu2 %v1306_v38, %s3074_s5 }
 0x2f4   :  { %1346 = vrot.lane.b32.xlu0 %v1306_v38, %s3077_s23  ;;  %1354 = vrot.lane.b32.xlu1 %v1306_v38, %s3072_s1 }
 0x2f5   :  { %1338 = vrot.lane.b32.xlu2 %v1306_v38, %s3076_s22 }
 0x2fc   :  { %1422 = vrot.lane.b32.xlu0 %v1320_v39, %s3074_s5  ;;  %1330 = vrot.lane.b32.xlu1 %v1306_v38, %s3078_s24 }
 0x2fd   :  { %1438 = vrot.lane.b32.xlu2 %v1320_v39, %s3075_s21 }
 0x304   :  { %1398 = vrot.lane.b32.xlu0 %v1320_v39, %s3076_s22  ;;  %1430 = vrot.lane.b32.xlu1 %v1320_v39, %s3071_s27 }
 0x305   :  { %1414 = vrot.lane.b32.xlu2 %v1320_v39, %s3072_s1 }
 0x30c   :  { %1406 = vrot.lane.b32.xlu1 %v1320_v39, %s3077_s23 }
 0x30d   :  { %1390 = vrot.lane.b32.xlu2 %v1320_v39, %s3078_s24 }
 0x327   :  { %v1377_v40 = vpop.permute.xlu2 %1376 }
 0x328   :  { %1382 = vst.msk [vmem:[#allocation3 + $0x70] sm:$0xff] %vm1323_vm4, %v1377_v40 }
 0x32f   :  { %v1353_v41 = vpop.permute.xlu2 %1352 }
 0x330   :  { %1358 = vst.msk [vmem:[#allocation3 + $0x40] sm:$0xff] %vm1323_vm4, %v1353_v41 }
 0x337   :  { %v1429_v42 = vpop.permute.xlu2 %1428 }
 0x338   :  { %1434 = vst.msk [vmem:[#allocation3 + $0xe0] sm:$0xff] %vm1323_vm4, %v1429_v42 }
 0x33e   :  { %v3409_v43 = vpop.f32.mrf.mxu0  ;;  %v1361_v44 = vpop.permute.xlu0 %1360 }
 0x33f   :  { %1366 = vst.msk [vmem:[#allocation3 + $0x50] sm:$0xff] %vm1323_vm4, %v1361_v44  ;;  %v1369_v45 = vpop.permute.xlu1 %1368  ;;  %v1405_v46 = vpop.permute.xlu2 %1404  ;;  %1570 = vrot.lane.b32.xlu0 %v3409_v43, %s3074_s5  ;;  %1578 = vrot.lane.b32.xlu1 %v3409_v43, %s3071_s27 }
 0x340   :  { %1374 = vst.msk [vmem:[#allocation3 + $0x60] sm:$0xff] %vm1323_vm4, %v1369_v45  ;;  %v3417_v47 = vpop.f32.mrf.mxu1 }
 0x341   :  { %1410 = vst.msk [vmem:[#allocation3 + $0xb0] sm:$0xff] %vm1323_vm4, %v1405_v46  ;;  %1638 = vrot.lane.b32.xlu2 %v3417_v47, %s3071_s27 }
 0x346   :  { %v1337_v48 = vpop.permute.xlu0 %1336  ;;  %v1508_v57 = vpop.f32.mrf.mxu0 }
 0x347   :  { %1342 = vst.msk [vmem:[#allocation3 + $0x20] sm:$0xff] %vm1323_vm4, %v1337_v48  ;;  %v1345_v49 = vpop.permute.xlu1 %1344  ;;  %v1363_v50 = vpop.permute.xlu2 %1362  ;;  %1622 = vrot.lane.b32.xlu0 %v3417_v47, %s3072_s1  ;;  %1630 = vrot.lane.b32.xlu1 %v3417_v47, %s3074_s5 }
 0x348   :  { %1350 = vst.msk [vmem:[#allocation3 + $0x30] sm:$0xff] %vm1323_vm4, %v1345_v49  ;;  %v1522_v58 = vpop.f32.mrf.mxu1 }
 0x349   :  { %1367 = vst.msk [vmem:[#allocation3 + $0x58] sm:$0xff] %vm1323_vm4, %v1363_v50  ;;  %1562 = vrot.lane.b32.xlu2 %v3409_v43, %s3072_s1 }
 0x34e   :  { %v1437_v51 = vpop.permute.xlu0 %1436 }
 0x34f   :  { %1442 = vst.msk [vmem:[#allocation3 + $0xf0] sm:$0xff] %vm1323_vm4, %v1437_v51  ;;  %v1421_v52 = vpop.permute.xlu1 %1420  ;;  %v1339_v53 = vpop.permute.xlu2 %1338  ;;  %1546 = vrot.lane.b32.xlu0 %v3409_v43, %s3076_s22  ;;  %1554 = vrot.lane.b32.xlu1 %v3409_v43, %s3077_s23 }
 0x350   :  { %1426 = vst.msk [vmem:[#allocation3 + $0xd0] sm:$0xff] %vm1323_vm4, %v1421_v52 }
 0x351   :  { %1343 = vst.msk [vmem:[#allocation3 + $0x28] sm:$0xff] %vm1323_vm4, %v1339_v53  ;;  %1614 = vrot.lane.b32.xlu2 %v3417_v47, %s3077_s23 }
 0x356   :  { %v1413_v54 = vpop.permute.xlu0 %1412 }
 0x357   :  { %1418 = vst.msk [vmem:[#allocation3 + $0xc0] sm:$0xff] %vm1323_vm4, %v1413_v54  ;;  %v1397_v55 = vpop.permute.xlu1 %1396  ;;  %v1439_v56 = vpop.permute.xlu2 %1438  ;;  %1598 = vrot.lane.b32.xlu0 %v3417_v47, %s3078_s24  ;;  %1606 = vrot.lane.b32.xlu1 %v3417_v47, %s3076_s22 }
 0x358   :  { %1402 = vst.msk [vmem:[#allocation3 + $0xa0] sm:$0xff] %vm1323_vm4, %v1397_v55 }
 0x359   :  { %1443 = vst.msk [vmem:[#allocation3 + $0xf8] sm:$0xff] %vm1323_vm4, %v1439_v56  ;;  %1538 = vrot.lane.b32.xlu2 %v3409_v43, %s3078_s24 }
 0x35e   :  { %v1371_v59 = vpop.permute.xlu0 %1370 }
 0x35f   :  { %v1415_v60 = vpop.permute.xlu2 %1414  ;;  %1375 = vst.msk [vmem:[#allocation3 + $0x68] sm:$0xff] %vm1323_vm4, %v1371_v59  ;;  %v1379_v61 = vpop.permute.xlu1 %1378  ;;  %1580 = vrot.lane.b32.xlu0 %v1508_v57, %s3071_s27  ;;  %1640 = vrot.lane.b32.xlu1 %v1522_v58, %s3071_s27 }
 0x360   :  { %1419 = vst.msk [vmem:[#allocation3 + $0xc8] sm:$0xff] %vm1323_vm4, %v1415_v60 }
 0x361   :  { %1383 = vst.msk [vmem:[#allocation3 + $0x78] sm:$0xff] %vm1323_vm4, %v1379_v61  ;;  %1572 = vrot.lane.b32.xlu2 %v1508_v57, %s3074_s5 }
 0x366   :  { %v1347_v62 = vpop.permute.xlu0 %1346 }
 0x367   :  { %v1391_v63 = vpop.permute.xlu2 %1390  ;;  %1351 = vst.msk [vmem:[#allocation3 + $0x38] sm:$0xff] %vm1323_vm4, %v1347_v62  ;;  %v1355_v0 = vpop.permute.xlu1 %1354  ;;  %1632 = vrot.lane.b32.xlu0 %v1522_v58, %s3074_s5  ;;  %1564 = vrot.lane.b32.xlu1 %v1508_v57, %s3072_s1 }
 0x368   :  { %1395 = vst.msk [vmem:[#allocation3 + $0x98] sm:$0xff] %vm1323_vm4, %v1391_v63 }
 0x369   :  { %1597 = vst.msk [vmem:[#allocation3 + $0x98] sm:$0xff] %vm1533_vm5, %v1522_v58  ;;  %1624 = vrot.lane.b32.xlu2 %v1522_v58, %s3072_s1 }
 0x36a   :  { %1359 = vst.msk [vmem:[#allocation3 + $0x48] sm:$0xff] %vm1323_vm4, %v1355_v0 }
 0x36e   :  { %v1423_v1 = vpop.permute.xlu0 %1422 }
 0x36f   :  { %1427 = vst.msk [vmem:[#allocation3 + $0xd8] sm:$0xff] %vm1323_vm4, %v1423_v1  ;;  %v1331_v2 = vpop.permute.xlu1 %1330  ;;  %1556 = vrot.lane.b32.xlu0 %v1508_v57, %s3077_s23  ;;  %1616 = vrot.lane.b32.xlu1 %v1522_v58, %s3077_s23 }
 0x370   :  { %1335 = vst.msk [vmem:[#allocation3 + $0x18] sm:$0xff] %vm1323_vm4, %v1331_v2 }
 0x371   :  { %1537 = vst.msk [vmem:[#allocation3 + $0x18] sm:$0xff] %vm1533_vm5, %v1508_v57  ;;  %1548 = vrot.lane.b32.xlu2 %v1508_v57, %s3076_s22 }
 0x376   :  { %v1399_v3 = vpop.permute.xlu0 %1398 }
 0x377   :  { %1403 = vst.msk [vmem:[#allocation3 + $0xa8] sm:$0xff] %vm1323_vm4, %v1399_v3  ;;  %v1431_v4 = vpop.permute.xlu1 %1430  ;;  %1608 = vrot.lane.b32.xlu0 %v1522_v58, %s3076_s22  ;;  %1540 = vrot.lane.b32.xlu1 %v1508_v57, %s3078_s24  ;;  %v1673_v3 = vld [vmem:[#allocation3 + $0x98] sm:$0xff] }
 0x378   :  { %1435 = vst.msk [vmem:[#allocation3 + $0xe8] sm:$0xff] %vm1323_vm4, %v1431_v4  ;;  %v1657_v63 = vld [vmem:[#allocation3 + $0x18] sm:$0xff] }
 0x379   :  { %1600 = vrot.lane.b32.xlu2 %v1522_v58, %s3078_s24 }
 0x37f   :  { %v1407_v5 = vpop.permute.xlu1 %1406  ;;  %1328 = vrot.lane.b32.xlu0 %v3358_v36, %s3078_s24  ;;  %1388 = vrot.lane.b32.xlu1 %v3368_v37, %s3078_s24 }
 0x380   :  { %1411 = vst.msk [vmem:[#allocation3 + $0xb8] sm:$0xff] %vm1323_vm4, %v1407_v5 }
 0x381   :  { %1529 = vrot.lane.b32.xlu2 %v1508_v57, %s3075_s21 }
 0x387   :  { %1590 = vrot.lane.b32.xlu0 %v1522_v58, %s3075_s21  ;;  %1527 = vrot.lane.b32.xlu1 %v3409_v43, %s3075_s21 }
 0x389   :  { %1588 = vrot.lane.b32.xlu2 %v3417_v47, %s3075_s21 }
 0x38f   :  { %1765 = vperm.xlu1 %3009, %v1751_v6  }
 0x391   :  { %1760 = vperm.xlu2 %3010, %v1750_v7   ;;  %v1646_v7 = vld [vmem:[%s3684_s6] sm:$0xff] }
 0x397   :  { %1755 = vperm.xlu1 %3009, %v1749_v9  }
 0x399   :  { %1801 = vperm.xlu2 %3010, %v1794_v10   ;;  %v1647_v10 = vld [vmem:[%s3684_s6 + $0x8] sm:$0xff] }
 0x39b   :  { %v1639_v11 = vpop.permute.xlu2 %1638 }
 0x39c   :  { %1644 = vst.msk [vmem:[#allocation3 + $0xf0] sm:$0xff] %vm1533_vm5, %v1639_v11 }
 0x3a3   :  { %v1563_v12 = vpop.permute.xlu2 %1562  ;;  %v1684_v34 = vld [vmem:[#allocation3 + $0xf0] sm:$0xff] }
 0x3a4   :  { %1568 = vst.msk [vmem:[#allocation3 + $0x50] sm:$0xff] %vm1533_vm5, %v1563_v12  ;;  %v1648_v12 = vld [vmem:[%s3684_s6 + $0x10] sm:$0xff] }
 0x3ab   :  { %v1615_v13 = vpop.permute.xlu2 %1614  ;;  %v1664_v44 = vld [vmem:[#allocation3 + $0x50] sm:$0xff] }
 0x3ac   :  { %1620 = vst.msk [vmem:[#allocation3 + $0xc0] sm:$0xff] %vm1533_vm5, %v1615_v13  ;;  %v1649_v13 = vld [vmem:[%s3684_s6 + $0x18] sm:$0xff] }
 0x3b1   :  { %v1571_v14 = vpop.permute.xlu0 %1570  ;;  %v1579_v16 = vpop.permute.xlu1 %1578 }
 0x3b2   :  { %1576 = vst.msk [vmem:[#allocation3 + $0x60] sm:$0xff] %vm1533_vm5, %v1571_v14  ;;  %v1650_v14 = vld [vmem:[%s3684_s6 + $0x20] sm:$0xff] }
 0x3b3   :  { %1584 = vst.msk [vmem:[#allocation3 + $0x70] sm:$0xff] %vm1533_vm5, %v1579_v16  ;;  %v1539_v17 = vpop.permute.xlu2 %1538  ;;  %v1678_v53 = vld [vmem:[#allocation3 + $0xc0] sm:$0xff]  ;;  %v1651_v16 = vld [vmem:[%s3684_s6 + $0x28] sm:$0xff] }
 0x3b4   :  { %1544 = vst.msk [vmem:[#allocation3 + $0x20] sm:$0xff] %vm1533_vm5, %v1539_v17  ;;  %v1652_v17 = vld [vmem:[%s3684_s6 + $0x30] sm:$0xff] }
 0x3b9   :  { %v1623_v18 = vpop.permute.xlu0 %1622  ;;  %v1631_v19 = vpop.permute.xlu1 %1630  ;;  %v1666_v36 = vld [vmem:[#allocation3 + $0x60] sm:$0xff] }
 0x3ba   :  { %1628 = vst.msk [vmem:[#allocation3 + $0xd0] sm:$0xff] %vm1533_vm5, %v1623_v18  ;;  %v1668_v33 = vld [vmem:[#allocation3 + $0x70] sm:$0xff]  ;;  %v1653_v18 = vld [vmem:[%s3684_s6 + $0x38] sm:$0xff] }
 0x3bb   :  { %1636 = vst.msk [vmem:[#allocation3 + $0xe0] sm:$0xff] %vm1533_vm5, %v1631_v19  ;;  %v1573_v20 = vpop.permute.xlu2 %1572  ;;  %v1658_v61 = vld [vmem:[#allocation3 + $0x20] sm:$0xff] }
 0x3bc   :  { %1577 = vst.msk [vmem:[#allocation3 + $0x68] sm:$0xff] %vm1533_vm5, %v1573_v20 }
 0x3c1   :  { %v1547_v21 = vpop.permute.xlu0 %1546  ;;  %v1555_v22 = vpop.permute.xlu1 %1554  ;;  %v1680_v46 = vld [vmem:[#allocation3 + $0xd0] sm:$0xff] }
 0x3c2   :  { %1552 = vst.msk [vmem:[#allocation3 + $0x30] sm:$0xff] %vm1533_vm5, %v1547_v21  ;;  %v1682_v42 = vld [vmem:[#allocation3 + $0xe0] sm:$0xff] }
 0x3c3   :  { %1560 = vst.msk [vmem:[#allocation3 + $0x40] sm:$0xff] %vm1533_vm5, %v1555_v22  ;;  %v1625_v8 = vpop.permute.xlu2 %1624  ;;  %v1667_v35 = vld [vmem:[#allocation3 + $0x68] sm:$0xff] }
 0x3c4   :  { %1629 = vst.msk [vmem:[#allocation3 + $0xd8] sm:$0xff] %vm1533_vm5, %v1625_v8 }
 0x3c9   :  { %v1599_v23 = vpop.permute.xlu0 %1598  ;;  %v1607_v24 = vpop.permute.xlu1 %1606  ;;  %v1660_v55 = vld [vmem:[#allocation3 + $0x30] sm:$0xff] }
 0x3ca   :  { %1604 = vst.msk [vmem:[#allocation3 + $0xa0] sm:$0xff] %vm1533_vm5, %v1599_v23  ;;  %v1662_v52 = vld [vmem:[#allocation3 + $0x40] sm:$0xff] }
 0x3cb   :  { %1612 = vst.msk [vmem:[#allocation3 + $0xb0] sm:$0xff] %vm1533_vm5, %v1607_v24  ;;  %v1549_v25 = vpop.permute.xlu2 %1548  ;;  %v1681_v45 = vld [vmem:[#allocation3 + $0xd8] sm:$0xff] }
 0x3cc   :  { %1553 = vst.msk [vmem:[#allocation3 + $0x38] sm:$0xff] %vm1533_vm5, %v1549_v25 }
 0x3d1   :  { %v1581_v26 = vpop.permute.xlu0 %1580  ;;  %v1641_v27 = vpop.permute.xlu1 %1640  ;;  %v1674_v0 = vld [vmem:[#allocation3 + $0xa0] sm:$0xff] }
 0x3d2   :  { %1585 = vst.msk [vmem:[#allocation3 + $0x78] sm:$0xff] %vm1533_vm5, %v1581_v26  ;;  %v1676_v60 = vld [vmem:[#allocation3 + $0xb0] sm:$0xff] }
 0x3d3   :  { %v1601_v28 = vpop.permute.xlu2 %1600  ;;  %1645 = vst.msk [vmem:[#allocation3 + $0xf8] sm:$0xff] %vm1533_vm5, %v1641_v27  ;;  %v1661_v54 = vld [vmem:[#allocation3 + $0x38] sm:$0xff]  ;;  %v1744_v27 = vstv %s2238_s25 }
 0x3d4   :  { %1605 = vst.msk [vmem:[#allocation3 + $0xa8] sm:$0xff] %vm1533_vm5, %v1601_v28 }
 0x3d9   :  { %v1633_v29 = vpop.permute.xlu0 %1632  ;;  %v1565_v30 = vpop.permute.xlu1 %1564  ;;  %v1669_v31 = vld [vmem:[#allocation3 + $0x78] sm:$0xff] }
 0x3da   :  { %1637 = vst.msk [vmem:[#allocation3 + $0xe8] sm:$0xff] %vm1533_vm5, %v1633_v29  ;;  %1686 = vmatpush.msrb.mxu2 %v1669_v31  ;;  %v1685_v32 = vld [vmem:[#allocation3 + $0xf8] sm:$0xff] }
 0x3db   :  { %v1530_v15 = vpop.permute.xlu2 %1529  ;;  %1569 = vst.msk [vmem:[#allocation3 + $0x58] sm:$0xff] %vm1533_vm5, %v1565_v30  ;;  %1715 = vmatpush.msra.mxu3 %v1685_v32  ;;  %v1675_v62 = vld [vmem:[#allocation3 + $0xa8] sm:$0xff] }
 0x3dc   :  { %1535 = vst.msk [vmem:[#allocation3 + $0x8] sm:$0xff] %vm1533_vm5, %v1530_v15  ;;  %1687 = vmatpush.msrb.mxu2 %v1668_v33 }
 0x3dd   :  { %1716 = vmatpush.msra.mxu3 %v1684_v34 }
 0x3de   :  { %1688 = vmatpush.msrb.mxu2 %v1667_v35 }
 0x3e0   :  { %1689 = vmatpush.msrb.mxu2 %v1666_v36 }
 0x3e1   :  { %v1557_v37 = vpop.permute.xlu0 %1556  ;;  %v1617_v38 = vpop.permute.xlu1 %1616  ;;  %v1683_v39 = vld [vmem:[#allocation3 + $0xe8] sm:$0xff] }
 0x3e2   :  { %1561 = vst.msk [vmem:[#allocation3 + $0x48] sm:$0xff] %vm1533_vm5, %v1557_v37  ;;  %v1665_v40 = vld [vmem:[#allocation3 + $0x58] sm:$0xff]  ;;  %1717 = vmatpush.msra.mxu3 %v1683_v39 }
 0x3e3   :  { %v1589_v41 = vpop.permute.xlu2 %1588  ;;  %1621 = vst.msk [vmem:[#allocation3 + $0xc8] sm:$0xff] %vm1533_vm5, %v1617_v38  ;;  %1690 = vmatpush.msrb.mxu2 %v1665_v40  ;;  %v1655_v5 = vld [vmem:[#allocation3 + $0x8] sm:$0xff] }
 0x3e4   :  { %1594 = vst.msk [vmem:[#allocation3 + $0x80] sm:$0xff] %vm1533_vm5, %v1589_v41  ;;  %1718 = vmatpush.msra.mxu3 %v1682_v42 }
 0x3e5   :  { %1691 = vmatpush.msrb.mxu2 %v1664_v44 }
 0x3e6   :  { %1719 = vmatpush.msra.mxu3 %v1681_v45 }
 0x3e8   :  { %1720 = vmatpush.msra.mxu3 %v1680_v46 }
 0x3e9   :  { %v1609_v48 = vpop.permute.xlu0 %1608  ;;  %v1541_v49 = vpop.permute.xlu1 %1540  ;;  %v1663_v50 = vld [vmem:[#allocation3 + $0x48] sm:$0xff] }
 0x3ea   :  { %1613 = vst.msk [vmem:[#allocation3 + $0xb8] sm:$0xff] %vm1533_vm5, %v1609_v48  ;;  %1692 = vmatpush.msrb.mxu2 %v1663_v50  ;;  %v1679_v51 = vld [vmem:[#allocation3 + $0xc8] sm:$0xff] }
 0x3eb   :  { %1545 = vst.msk [vmem:[#allocation3 + $0x28] sm:$0xff] %vm1533_vm5, %v1541_v49  ;;  %1721 = vmatpush.msra.mxu3 %v1679_v51  ;;  %v1670_v11 = vld [vmem:[#allocation3 + $0x80] sm:$0xff]  ;;  %v1761_v37 = vpop.permute.xlu2 %1760 }
 0x3ec   :  { %1693 = vmatpush.msrb.mxu2 %v1662_v52  ;;  %v1789_v51 = vld [vmem:[%s3686_s8] sm:$0xff] }
 0x3ed   :  { %1722 = vmatpush.msra.mxu3 %v1678_v53  ;;  %v1790_v53 = vld [vmem:[%s3686_s8 + $0x8] sm:$0xff] }
 0x3ee   :  { %1694 = vmatpush.msrb.mxu2 %v1661_v54  ;;  %v1791_v54 = vld [vmem:[%s3686_s8 + $0x10] sm:$0xff] }
 0x3f0   :  { %1695 = vmatpush.msrb.mxu2 %v1660_v55  ;;  %v1792_v55 = vld [vmem:[%s3686_s8 + $0x18] sm:$0xff] }
 0x3f1   :  { %v1329_v56 = vpop.permute.xlu0 %1328  ;;  %v1389_v57 = vpop.permute.xlu1 %1388  ;;  %v1677_v58 = vld [vmem:[#allocation3 + $0xb8] sm:$0xff] }
 0x3f2   :  { %1334 = vst.msk [vmem:[#allocation3 + $0x10] sm:$0xff] %vm1323_vm4, %v1329_v56  ;;  %v1659_v59 = vld [vmem:[#allocation3 + $0x28] sm:$0xff]  ;;  %1723 = vmatpush.msra.mxu3 %v1677_v58 }
 0x3f3   :  { %1536 = vst.msk [vmem:[#allocation3 + $0x10] sm:$0xff] %vm1533_vm5, %v3409_v43  ;;  %1696 = vmatpush.msrb.mxu2 %v1659_v59  ;;  %v1802_v56 = vpop.permute.xlu2 %1801 }
 0x3f4   :  { %1394 = vst.msk [vmem:[#allocation3 + $0x90] sm:$0xff] %vm1323_vm4, %v1389_v57  ;;  %1724 = vmatpush.msra.mxu3 %v1676_v60  ;;  %v1796_v60 = vld [vmem:[%s3687_s9 + $0x10] sm:$0xff] }
 0x3f5   :  { %1596 = vst.msk [vmem:[#allocation3 + $0x90] sm:$0xff] %vm1533_vm5, %v3417_v47  ;;  %1697 = vmatpush.msrb.mxu2 %v1658_v61  ;;  %v1752_v47 = vld [vmem:[%s3685_s7 + $0x18] sm:$0xff] }
 0x3f6   :  { %1725 = vmatpush.msra.mxu3 %v1675_v62  ;;  %1770 = vperm.xlu0 %3011, %v1752_v47   ;;  %v1797_v61 = vld [vmem:[%s3687_s9 + $0x18] sm:$0xff] }
 0x3f7   :  { %1698 = vmatpush.msrb.mxu2 %v1657_v63 }
 0x3f8   :  { %1726 = vmatpush.msra.mxu3 %v1674_v0 }
 0x3f9   :  { %v1591_v1 = vpop.permute.xlu0 %1590  ;;  %v1528_v2 = vpop.permute.xlu1 %1527 }
 0x3fa   :  { %1595 = vst.msk [vmem:[#allocation3 + $0x88] sm:$0xff] %vm1533_vm5, %v1591_v1  ;;  %1727 = vmatpush.msra.mxu3 %v1673_v3  ;;  %v1656_v43 = vld [vmem:[#allocation3 + $0x10] sm:$0xff] }
 0x3fb   :  { %1534 = vst.msk [vmem:[#allocation3] sm:$0xff] %vm1533_vm5, %v1528_v2  ;;  %1699 = vmatpush.msrb.mxu2 %v1656_v43  ;;  %v1795_v43 = vld [vmem:[%s3687_s9 + $0x8] sm:$0xff] }
 0x3fc   :  { %v1672_v4 = vld [vmem:[#allocation3 + $0x90] sm:$0xff] }
 0x3fd   :  { %1728 = vmatpush.msra.mxu3 %v1672_v4  ;;  %1700 = vmatpush.msrb.mxu2 %v1655_v5 }
 0x401   :  { %v1671_v6 = vld [vmem:[#allocation3 + $0x88] sm:$0xff]  ;;  %v1766_v25 = vpop.permute.xlu1 %1765 }
 0x402   :  { %v1654_v9 = vld [vmem:[#allocation3] sm:$0xff]  ;;  %1729 = vmatpush.msra.mxu3 %v1671_v6 }
 0x403   :  { %1701 = vmatpush.msrb.mxu2 %v1654_v9 }
 0x404   :  { %1730 = vmatpush.msra.mxu3 %v1670_v11  ;;  %1702 = vmatmul.f32.vlgmr.msrb.gmra.mxu2 %v1646_v7 }
 0x405   :  { %1731 = vmatmul.f32.vlgmr.msra.gmra.mxu3 %v1647_v10 }
 0x409   :  { %v1756_v40 = vpop.permute.xlu1 %1755 }
 0x40c   :  { %1705 = vmatmul.f32.gmra.mxu2 %v1648_v12 }
 0x40d   :  { %1734 = vmatmul.f32.gmra.mxu3 %v1649_v13 }
 0x414   :  { %1708 = vmatmul.f32.gmra.mxu2 %v1650_v14 }
 0x415   :  { %1737 = vmatmul.f32.gmra.mxu3 %v1651_v16 }
 0x41c   :  { %1711 = vmatmul.f32.gmra.mxu2 %v1652_v17 }
 0x41d   :  { %1740 = vmatmul.f32.gmra.mxu3 %v1653_v18  ;;  %v1793_v18 = vld [vmem:[%s3686_s8 + $0x20] sm:$0xff]  ;;  %s2239_s8 = sld [smem:[#allocation4 + $0x2]] }
 0x468   :  { %v1771_v33 = vpop.permute.xlu0 %1770 }
 0x487   :  { %v1703_v19 = vpop.f32.mrf.mxu2 }
 0x488   :  { %v1732_v20 = vpop.f32.mrf.mxu3 }
 0x489   :  { %v1733_v28 = vadd.f32 %v1732_v20, %v1703_v19 }
 0x48b   :  { %v1745_v34 = vmul.f32 %v1744_v27, %v1733_v28 }
 0x48d   :  { %v1773_v41 = vadd.f32 %v1756_v40, %v1745_v34 }
 0x48f   :  { %v1706_v21 = vpop.f32.mrf.mxu2  ;;  %v1781_v49 = vmul.f32 0.1, %v1773_v41  ;;  %vm1777_vm9 = vcmp.ge.f32.partialorder %v1773_v41, 0.0 }
 0x490   :  { %v1735_v22 = vpop.f32.mrf.mxu3 }
 0x491   :  { %v1736_v26 = vadd.f32 %v1735_v22, %v1706_v21  ;;  %v3569_v52 = vsel %vm1777_vm9, %v1773_v41, %v1781_v49 }
 0x493   :  { %v1746_v32 = vmul.f32 %v1744_v27, %v1736_v26 }
 0x495   :  { %v1774_v38 = vadd.f32 %v1761_v37, %v1746_v32 }
 0x497   :  { %v1709_v8 = vpop.f32.mrf.mxu2  ;;  %v1782_v46 = vmul.f32 0.1, %v1774_v38  ;;  %vm1778_vm8 = vcmp.ge.f32.partialorder %v1774_v38, 0.0 }
 0x498   :  { %v1738_v23 = vpop.f32.mrf.mxu3 }
 0x499   :  { %v1739_v24 = vadd.f32 %v1738_v23, %v1709_v8  ;;  %v3563_v50 = vsel %vm1778_vm8, %v1774_v38, %v1782_v46  ;;  %v1798_v8 = vld [vmem:[%s3687_s9 + $0x20] sm:$0xff] }
 0x49b   :  { %v1747_v29 = vmul.f32 %v1744_v27, %v1739_v24 }
 0x49d   :  { %v1775_v35 = vadd.f32 %v1766_v25, %v1747_v29 }
 0x49f   :  { %v1712_v30 = vpop.f32.mrf.mxu2  ;;  %v1783_v44 = vmul.f32 0.1, %v1775_v35  ;;  %vm1779_vm7 = vcmp.ge.f32.partialorder %v1775_v35, 0.0 }
 0x4a0   :  { %v1741_v31 = vpop.f32.mrf.mxu3 }
 0x4a1   :  { %v1742_v15 = vadd.f32 %v1741_v31, %v1712_v30  ;;  %v3560_v48 = vsel %vm1779_vm7, %v1775_v35, %v1783_v44 }
 0x4a3   :  { %v1748_v36 = vmul.f32 %v1744_v27, %v1742_v15 }
 0x4a5   :  { %v1776_v39 = vadd.f32 %v1771_v33, %v1748_v36 }
 0x4a7   :  { %vm1780_vm6 = vcmp.ge.f32.partialorder %v1776_v39, 0.0  ;;  %v1784_v42 = vmul.f32 0.1, %v1776_v39 }
 0x4a9   :  { %v3557_v45 = vsel %vm1780_vm6, %v1776_v39, %v1784_v42 }
 0x4aa   :  { %1852 = vmatpush.msra.mxu0 %v3557_v45 }
 0x4ac   :  { %1853 = vmatpush.msra.mxu0 %v3560_v48 }
 0x4ae   :  { %1854 = vmatpush.msra.mxu0 %v3563_v50 }
 0x4b0   :  { %1855 = vmatpush.msra.mxu0 %v3569_v52 }
 0x4b1   :  { %2828 = vmatmul.msk.f32.vlgmr.msra.gmra.mxu0 %vm1824_vm10, %v1789_v51 }
 0x4b9   :  { %2829 = vmatmul.msk.f32.gmra.mxu0 %vm1824_vm10, %v1790_v53 }
 0x4c1   :  { %2830 = vmatmul.msk.f32.gmra.mxu0 %vm1824_vm10, %v1791_v54 }
 0x4c9   :  { %2831 = vmatmul.msk.f32.gmra.mxu0 %vm1824_vm10, %v1792_v55 }
 0x4d1   :  { %2832 = vmatmul.msk.f32.gmra.mxu0 %vm1824_vm10, %v1793_v18  ;;  %v2207_v18 = vld [vmem:[%s3688_s10 + $0x10] sm:$0xff] }
 0x52e   :  { %v1857_v57 = vpop.f32.mrf.mxu0 }
 0x52f   :  { %v1858_v58 = vadd.f32 %v1857_v57, %v1802_v56 }
 0x531   :  { %2040 = vrot.lane.b32.xlu0 %v1858_v58, %s3078_s24  ;;  %v1905_v59 = vrot.slane %v1858_v58, 4 }
 0x533   :  { %2075 = vrot.lane.b32.xlu1 %v1905_v59, %s3078_s24  ;;  %2833 = vmatpush.msk.msra.mxu1 %vm1913_vm11, %v1905_v59 }
 0x536   :  { %v1860_v62 = vpop.f32.mrf.mxu0 }
 0x53b   :  { %1811 = vperm.xlu1 %3009, %v1796_v60  }
 0x53e   :  { %v1863_v1 = vpop.f32.mrf.mxu0 }
 0x543   :  { %1816 = vperm.xlu1 %3009, %v1797_v61  }
 0x546   :  { %v1866_v9 = vpop.f32.mrf.mxu0 }
 0x54e   :  { %v1869_v34 = vpop.f32.mrf.mxu0 }
 0x553   :  { %1872 = vxpose.xlu0.b32.start.end [1/1] (short) (narrow) %v1858_v58, 16 }
 0x5a3   :  { %v2041_v63 = vpop.permute.xlu0 %2040 }
 0x5a4   :  { %2043 = vxpose.xlu2.b32.start.end [1/1] (short) (narrow) %v2041_v63, 16 }
 0x5a5   :  { %v2076_v0 = vpop.permute.xlu1 %2075 }
 0x5a6   :  { %2842 = vmatpush.msk.msra.mxu2 %vm1913_vm11, %v2076_v0 }
 0x5ad   :  { %v1812_v2 = vpop.permute.xlu1 %1811 }
 0x5ae   :  { %v3593_v3 = vadd.f32 %v1863_v1, %v1812_v2 }
 0x5b5   :  { %v1817_v10 = vpop.permute.xlu1 %1816 }
 0x5b6   :  { %v3602_v11 = vadd.f32 %v1866_v9, %v1817_v10 }
 0x5c9   :  { %1806 = vperm.xlu0 %3011, %v1795_v43  }
 0x5f7   :  { %v1888_v4 = vpop.trf.xlu0 }
 0x5f8   :  { %2834 = vmatmul.msk.f32.vlgmr.msra.gmra.mxu1 %vm1906_vm12, %v1888_v4 }
 0x5ff   :  { %v1889_v5 = vpop.trf.xlu0 }
 0x600   :  { %2835 = vmatmul.msk.f32.gmra.mxu1 %vm1906_vm12, %v1889_v5 }
 0x63b   :  { %v1807_v47 = vpop.permute.xlu0 %1806 }
 0x63c   :  { %v3598_v6 = vadd.f32 %v1860_v62, %v1807_v47  ;;  %v2008_v47 = vstv %s2239_s8 }
 0x63d   :  { %v2059_v7 = vpop.trf.xlu2 }
 0x63e   :  { %2130 = vrot.lane.b32.xlu0 %v3598_v6, %s3078_s24  ;;  %2843 = vmatmul.msk.f32.vlgmr.msra.gmra.mxu2 %vm1906_vm12, %v2059_v7 }
 0x645   :  { %v2060_v12 = vpop.trf.xlu2 }
 0x646   :  { %2844 = vmatmul.msk.f32.gmra.mxu2 %vm1906_vm12, %v2060_v12  ;;  %2134 = vrot.lane.b32.xlu0 %v3602_v11, %s3078_s24 }
 0x675   :  { %v1933_v13 = vpop.f32.mrf.mxu1 }
 0x676   :  { %v1939_v17 = vsel %vm1323_vm4, %v1933_v13, -inf }
 0x67d   :  { %v1936_v14 = vpop.f32.mrf.mxu1 }
 0x67e   :  { %v1942_v16 = vsel %vm1323_vm4, %v1936_v14, -inf }
 0x67f   :  { %1943 = vmax.xlane.f32.xlu1 %v1942_v16 }
 0x687   :  { %1940 = vmax.xlane.f32.xlu1 %v1939_v17  ;;  %v2205_v17 = vld [vmem:[%s3688_s10] sm:$0xff] }
 0x6b0   :  { %v2131_v57 = vpop.permute.xlu0 %2130 }
 0x6b8   :  { %v2135_v59 = vpop.permute.xlu0 %2134 }
 0x6c1   :  { %v2102_v19 = vpop.f32.mrf.mxu2 }
 0x6c2   :  { %v2108_v20 = vsel %vm1323_vm4, %v2102_v19, -inf }
 0x6c3   :  { %2109 = vmax.xlane.f32.xlu2 %v2108_v20 }
 0x6c9   :  { %v2105_v21 = vpop.f32.mrf.mxu2 }
 0x6ca   :  { %v2111_v22 = vsel %vm1323_vm4, %v2105_v21, -inf }
 0x6cb   :  { %2112 = vmax.xlane.f32.xlu1 %v2111_v22 }
 0x6e4   :  { %1821 = vperm.xlu1 %3009, %v1798_v8  }
 0x6f2   :  { %v1944_v23 = vpop.xlane.xlu1 %1943 }
 0x6f3   :  { %v1946_v37 = vsub.f32 %v1936_v14, %v1944_v23 }
 0x6f5   :  { %v1949_v39 = vmul.f32 1.442695, %v1946_v37 }
 0x6fa   :  { %v1941_v24 = vpop.xlane.xlu1 %1940 }
 0x6fb   :  { %v1945_v38 = vsub.f32 %v1933_v13, %v1941_v24 }
 0x6fd   :  { %v1947_v40 = vmul.f32 1.442695, %v1945_v38 }
 0x736   :  { %v2110_v25 = vpop.xlane.xlu2 %2109 }
 0x737   :  { %v2114_v26 = vsub.f32 %v2102_v19, %v2110_v25  ;;  %v2208_v25 = vld [vmem:[%s3688_s10 + $0x18] sm:$0xff] }
 0x739   :  { %v2116_v27 = vmul.f32 1.442695, %v2114_v26 }
 0x73b   :  { %3012 = vpow2.f32 %v2116_v27 }
 0x73e   :  { %v2113_v28 = vpop.xlane.xlu1 %2112 }
 0x73f   :  { %v2115_v29 = vsub.f32 %v2105_v21, %v2113_v28 }
 0x741   :  { %v3013_v30 = vpop.eup %3012  ;;  %v2118_v31 = vmul.f32 1.442695, %v2115_v29 }
 0x742   :  { %v2120_v32 = vsel %vm1323_vm4, %v3013_v30, 0.0 }
 0x743   :  { %3014 = vpow2.f32 %v2118_v31  ;;  %2121 = vadd.xlane.f32.xlu2 %v2120_v32 }
 0x744   :  { %3016 = vpow2.f32 %v1949_v39 }
 0x745   :  { %3018 = vpow2.f32 %v1947_v40 }
 0x749   :  { %v3015_v15 = vpop.eup %3014 }
 0x74a   :  { %v2123_v33 = vsel %vm1323_vm4, %v3015_v15, 0.0  ;;  %v3017_v41 = vpop.eup %3016 }
 0x74b   :  { %2124 = vadd.xlane.f32.xlu1 %v2123_v33  ;;  %v3019_v42 = vpop.eup %3018  ;;  %v1954_v44 = vsel %vm1323_vm4, %v3017_v41, 0.0 }
 0x74c   :  { %v1951_v46 = vsel %vm1323_vm4, %v3019_v42, 0.0 }
 0x756   :  { %v1822_v35 = vpop.permute.xlu1 %1821 }
 0x757   :  { %v1870_v36 = vadd.f32 %v1869_v34, %v1822_v35 }
 0x759   :  { %2136 = vrot.lane.b32.xlu0 %v1870_v36, %s3078_s24 }
 0x75b   :  { %2132 = vrot.lane.b32.xlu2 %v3593_v3, %s3078_s24 }
 0x764   :  { %2189 = vrot.lane.b32.xlu1 %v3569_v52, %s3078_s24 }
 0x76c   :  { %2191 = vrot.lane.b32.xlu1 %v3563_v50, %s3078_s24 }
 0x783   :  { %1955 = vadd.xlane.f32.xlu0 %v1954_v44 }
 0x784   :  { %1952 = vadd.xlane.f32.xlu2 %v1951_v46 }
 0x797   :  { %2193 = vrot.lane.b32.xlu0 %v3560_v48, %s3078_s24 }
 0x79c   :  { %2195 = vrot.lane.b32.xlu2 %v3557_v45, %s3078_s24 }
 0x7b6   :  { %v2122_v49 = vpop.xlane.xlu2 %2121 }
 0x7be   :  { %v2125_v51 = vpop.xlane.xlu1 %2124  ;;  %v2133_v58 = vpop.permute.xlu2 %2132 }
 0x7bf   :  { %3020 = vrcp.f32 %v2125_v51 }
 0x7c0   :  { %3022 = vrcp.f32 %v2122_v49 }
 0x7c5   :  { %v3021_v53 = vpop.eup %3020 }
 0x7c6   :  { %v2129_v54 = vmul.f32 %v3021_v53, %v3015_v15  ;;  %v3023_v55 = vpop.eup %3022 }
 0x7c7   :  { %v2128_v56 = vmul.f32 %v3023_v55, %v3013_v30 }
 0x7c8   :  { %2845 = vmatpush.xpose.msk.msrb.mxu3 %vm1323_vm4, %v2129_v54 }
 0x7cb   :  { %v2137_v60 = vpop.permute.xlu0 %2136 }
 0x7cc   :  { %2846 = vmatpush.xpose.msk.msrb.mxu3 %vm1323_vm4, %v2128_v56 }
 0x7cf   :  { %2847 = vmatmul.msk.f32.vlgmr.msrb.gmra.mxu3 %vm1323_vm4, %v2131_v57 }
 0x7d6   :  { %v2190_v4 = vpop.permute.xlu1 %2189 }
 0x7d7   :  { %2848 = vmatmul.msk.f32.gmra.mxu3 %vm1323_vm4, %v2133_v58 }
 0x7de   :  { %v2192_v10 = vpop.permute.xlu1 %2191 }
 0x7df   :  { %2849 = vmatmul.msk.f32.gmra.mxu3 %vm1323_vm4, %v2135_v59 }
 0x7e7   :  { %2850 = vmatmul.msk.f32.gmra.mxu3 %vm1323_vm4, %v2137_v60 }
 0x7f6   :  { %v1956_v61 = vpop.xlane.xlu0 %1955 }
 0x7f7   :  { %3024 = vrcp.f32 %v1956_v61  ;;  %v1953_v62 = vpop.xlane.xlu2 %1952 }
 0x7f8   :  { %3026 = vrcp.f32 %v1953_v62 }
 0x7fd   :  { %v3025_v63 = vpop.eup %3024 }
 0x7fe   :  { %v1960_v0 = vmul.f32 %v3025_v63, %v3017_v41  ;;  %v3027_v1 = vpop.eup %3026 }
 0x7ff   :  { %v1959_v2 = vmul.f32 %v3027_v1, %v3019_v42  ;;  %v2196_v24 = vpop.permute.xlu2 %2195 }
 0x800   :  { %2836 = vmatpush.xpose.msk.msrb.mxu1 %vm1323_vm4, %v1960_v0 }
 0x804   :  { %2837 = vmatpush.xpose.msk.msrb.mxu1 %vm1323_vm4, %v1959_v2 }
 0x807   :  { %2838 = vmatmul.msk.f32.vlgmr.msrb.gmra.mxu1 %vm1323_vm4, %v3598_v6 }
 0x809   :  { %v2194_v6 = vpop.permute.xlu0 %2193 }
 0x80f   :  { %2839 = vmatmul.msk.f32.gmra.mxu1 %vm1323_vm4, %v3593_v3  ;;  %v2206_v3 = vld [vmem:[%s3688_s10 + $0x8] sm:$0xff] }
 0x817   :  { %2840 = vmatmul.msk.f32.gmra.mxu1 %vm1323_vm4, %v3602_v11 }
 0x81f   :  { %2841 = vmatmul.msk.f32.gmra.mxu1 %vm1323_vm4, %v1870_v36 }
 0x852   :  { %v2169_v43 = vpop.f32.mrf.mxu3 }
 0x853   :  { %v2181_v9 = vmul.f32 %v2169_v43, %v2008_v47 }
 0x855   :  { %v2201_v16 = vadd.f32 %v2190_v4, %v2181_v9 }
 0x857   :  { %v2209_v20 = vmul.f32 %v2205_v17, %v2201_v16 }
 0x859   :  { %v2213_v26 = vsel %vm1323_vm4, %v2209_v20, 0.0 }
 0x85a   :  { %v2172_v5 = vpop.f32.mrf.mxu3 }
 0x85b   :  { %v2182_v7 = vmul.f32 %v2172_v5, %v2008_v47 }
 0x85d   :  { %v2202_v13 = vadd.f32 %v2192_v10, %v2182_v7 }
 0x85f   :  { %v2210_v19 = vmul.f32 %v2206_v3, %v2202_v13 }
 0x861   :  { %v2214_v8 = vsel %vm1323_vm4, %v2210_v19, 0.0 }
 0x862   :  { %v2175_v12 = vpop.f32.mrf.mxu3  ;;  %v2215_v29 = vadd.f32 %v2214_v8, %v2213_v26 }
 0x863   :  { %v2183_v14 = vmul.f32 %v2175_v12, %v2008_v47 }
 0x865   :  { %v2203_v11 = vadd.f32 %v2194_v6, %v2183_v14 }
 0x867   :  { %v2211_v21 = vmul.f32 %v2207_v18, %v2203_v11 }
 0x869   :  { %v2216_v27 = vsel %vm1323_vm4, %v2211_v21, 0.0 }
 0x86a   :  { %v2178_v22 = vpop.f32.mrf.mxu3  ;;  %v2217_v31 = vadd.f32 %v2216_v27, %v2215_v29 }
 0x86b   :  { %v2184_v23 = vmul.f32 %v2178_v22, %v2008_v47 }
 0x86d   :  { %v2204_v28 = vadd.f32 %v2196_v24, %v2184_v23 }
 0x86f   :  { %v2212_v30 = vmul.f32 %v2208_v25, %v2204_v28 }
 0x871   :  { %v2218_v32 = vsel %vm1323_vm4, %v2212_v30, 0.0 }
 0x872   :  { %v2219_v15 = vadd.f32 %v2218_v32, %v2217_v31 }
 0x874   :  { %v2220_v33 = vrot.slane %v2219_v15, 4 }
 0x876   :  { %v2221_v34 = vadd.f32 %v2220_v33, %v2219_v15 }
 0x878   :  { %v2222_v35 = vrot.slane %v2221_v34, 2 }
 0x87a   :  { %v2223_v36 = vadd.f32 %v2222_v35, %v2221_v34 }
 0x87c   :  { %v2224_v37 = vrot.slane %v2223_v36, 1 }
 0x87e   :  { %v2225_v38 = vadd.f32 %v2224_v37, %v2223_v36 }
 0x880   :  { %2227 = vrot.lane.b32.xlu1 %v2225_v38, %s3075_s21 }
 0x884   :  { %v1996_v39 = vpop.f32.mrf.mxu1 }
 0x885   :  { %v2009_v42 = vmul.f32 %v2008_v47, %v1996_v39 }
 0x887   :  { %v2013_v51 = vadd.f32 %v2009_v42, %v3569_v52 }
 0x889   :  { %v2021_v55 = vmul.f32 %v2205_v17, %v2013_v51 }
 0x88b   :  { %v2025_v60 = vsel %vm1323_vm4, %v2021_v55, 0.0 }
 0x88c   :  { %v1999_v40 = vpop.f32.mrf.mxu1 }
 0x88d   :  { %v2010_v41 = vmul.f32 %v2008_v47, %v1999_v40 }
 0x88f   :  { %v2014_v46 = vadd.f32 %v2010_v41, %v3563_v50 }
 0x891   :  { %v2022_v54 = vmul.f32 %v2206_v3, %v2014_v46 }
 0x893   :  { %v2026_v58 = vsel %vm1323_vm4, %v2022_v54, 0.0 }
 0x894   :  { %v2002_v44 = vpop.f32.mrf.mxu1  ;;  %v2027_v63 = vadd.f32 %v2026_v58, %v2025_v60 }
 0x895   :  { %v2011_v49 = vmul.f32 %v2008_v47, %v2002_v44 }
 0x897   :  { %v2015_v53 = vadd.f32 %v2011_v49, %v3560_v48 }
 0x899   :  { %v2023_v56 = vmul.f32 %v2207_v18, %v2015_v53 }
 0x89b   :  { %v2028_v61 = vsel %vm1323_vm4, %v2023_v56, 0.0 }
 0x89c   :  { %v2005_v57 = vpop.f32.mrf.mxu1  ;;  %v2029_v0 = vadd.f32 %v2028_v61, %v2027_v63 }
 0x89d   :  { %v2012_v59 = vmul.f32 %v2008_v47, %v2005_v57 }
 0x89f   :  { %v2016_v62 = vadd.f32 %v2012_v59, %v3557_v45 }
 0x8a1   :  { %v2024_v50 = vmul.f32 %v2208_v25, %v2016_v62 }
 0x8a3   :  { %v2030_v52 = vsel %vm1323_vm4, %v2024_v50, 0.0 }
 0x8a4   :  { %v2031_v1 = vadd.f32 %v2030_v52, %v2029_v0 }
 0x8a6   :  { %v2032_v48 = vrot.slane %v2031_v1, 4 }
 0x8a8   :  { %v2033_v2 = vadd.f32 %v2032_v48, %v2031_v1 }
 0x8aa   :  { %v2034_v43 = vrot.slane %v2033_v2, 2 }
 0x8ac   :  { %v2035_v4 = vadd.f32 %v2034_v43, %v2033_v2 }
 0x8ae   :  { %v2036_v5 = vrot.slane %v2035_v4, 1 }
 0x8b0   :  { %v2037_v7 = vadd.f32 %v2036_v5, %v2035_v4 }
 0x8b2   :  { %2039 = vst.msk [vmem:[%s3689_s11] sm:$0x1] %vm2038_vm13, %v2037_v7 }
 0x8f2   :  { %v2228_v47 = vpop.permute.xlu1 %2227 }
 0x8f3   :  { %2231 = vst.msk [vmem:[%s3689_s11] sm:$0x1] %vm2230_vm14, %v2228_v47 }
 0x8f4   :  { %2236 = vsyncpa [#allocation5], 1 }
 0x8f5   :  { %2237 = vsyncpa [#allocation6], 1 }

</bundles_post_ra>
